<compile_context>
chip_gen: v6e
topology: v6e:2x2x1
jax: 0.10.0
libtpu: 0.0.40
codegen_flags: <defaults>
</compile_context>

<pallas_src>
import math

import jax
import jax.numpy as jnp
from jax import lax
from jax.experimental import pallas as pl
from jax.experimental.pallas import tpu as pltpu


_VMEM_LIMIT_BYTES = 32 * 1024 * 1024   # explicit scoped-VMEM cap (safe on v5e/v6e/v7x)


# ----------------------------- Pallas kernels -----------------------------

def _layernorm(x, g, b, eps=1e-5):
    mu = jnp.mean(x, axis=-1, keepdims=True)
    var = jnp.mean((x - mu) ** 2, axis=-1, keepdims=True)
    return (x - mu) * jax.lax.rsqrt(var + eps) * g + b


def bert_cls_layer_kernel(x_ref, bias_ref,
                          wq_ref, bq_ref, wkv_ref, bkv_ref,
                          wo_ref, bo_ref, ln1g_ref, ln1b_ref,
                          w1_ref, b1_ref, w2_ref, b2_ref,
                          ln2g_ref, ln2b_ref,
                          cls_ref):
    """Single-head transformer encoder layer, CLS-only path.

    Only position 0 feeds the GRU, so Q / softmax / context / output projection /
    LayerNorms / FFN are computed for the CLS row of every example only; K/V still
    cover all S positions via one fused (n*S,H)x(H,2H) bf16 MXU matmul.  Attention
    scores and context are batched MXU dot_generals (not VPU/XLU reductions).
    """
    x = x_ref[...]                               # (B, n_c, S, H) bf16
    Bb, n_c, S, H = x.shape
    n = Bb * n_c
    scale = 1.0 / math.sqrt(H)

    # K|V fused projection over all positions (one big MXU pass).
    x2 = x.reshape(n * S, H)
    kv = (jnp.dot(x2, wkv_ref[...], preferred_element_type=jnp.float32)
          + bkv_ref[...]).reshape(n, S, 2 * H)
    k = kv[..., :H].astype(jnp.bfloat16)         # (n, S, H)
    v = kv[..., H:].astype(jnp.bfloat16)

    # Q for the CLS row only.
    x_cls = x[:, :, 0, :].reshape(n, H)          # (n, H) bf16
    q = jnp.dot(x_cls, wq_ref[...], preferred_element_type=jnp.float32) + bq_ref[...]

    # scores / context on the MXU (batched over n, query length 1).
    q3 = q.astype(jnp.bfloat16)[:, None, :]                               # (n, 1, H)
    scores = jnp.einsum('nqh,nsh->nqs', q3, k,
                        preferred_element_type=jnp.float32)[:, 0, :]      # (n, S)
    scores = scores * scale + bias_ref[...].reshape(n, S)
    attn = jax.nn.softmax(scores, axis=-1)                                # f32
    a3 = attn.astype(jnp.bfloat16)[:, None, :]                            # (n, 1, S)
    ctx = jnp.einsum('nqs,nsh->nqh', a3, v,
                     preferred_element_type=jnp.float32)[:, 0, :]         # (n, H)

    ao = jnp.dot(ctx.astype(jnp.bfloat16), wo_ref[...],
                 preferred_element_type=jnp.float32) + bo_ref[...]
    h1 = _layernorm(x_cls.astype(jnp.float32) + ao, ln1g_ref[...], ln1b_ref[...])

    f = jnp.dot(h1.astype(jnp.bfloat16), w1_ref[...],
                preferred_element_type=jnp.float32) + b1_ref[...]
    f = jax.nn.gelu(f)
    f = jnp.dot(f.astype(jnp.bfloat16), w2_ref[...],
                preferred_element_type=jnp.float32) + b2_ref[...]
    out = _layernorm(h1 + f, ln2g_ref[...], ln2b_ref[...])                # (n, H) f32

    # Emit directly in (chunk, batch, H) bf16 layout (no wrapper transpose/cast op).
    out = out.reshape(Bb, n_c, H).astype(jnp.bfloat16)
    for b in range(Bb):                          # static, tiny unroll over batch
        cls_ref[:, b, :] = out[b]


def gru_crf_loss_kernel(x_ref, mask_ref, tags_oh_ref,
                        wih_ref, bih_ref,
                        whh_f_ref, bhh_f_ref, whh_b_ref, bhh_b_ref,
                        wfc_f_ref, wfc_b_ref, bfc_ref,
                        trans_ref, start_ref, end_ref,
                        loss_ref, fwd_ref, bwd_ref, gi_ref, em_ref):
    """Fused BiGRU + fc + CRF mean NLL.

    Emulates pack_padded_sequence/pad_packed_sequence: hidden state frozen at padded
    steps, padded outputs zeroed.  Input->hidden projections for both directions are
    fused into one (T*B,H)x(H,6*Hh) MXU matmul hoisted out of the recurrence; the
    forward/backward recurrences are interleaved in one fori_loop (2x ILP in the
    serial region); only the CRF forward algorithm remains serial over T.
    """
    T, B, H = x_ref.shape
    Hh = whh_f_ref.shape[0]
    C = trans_ref.shape[0]

    # Fused, hoisted input->hidden projection for both directions (single MXU pass).
    x2 = x_ref[...].reshape(T * B, H)
    gi_ref[...] = (jnp.dot(x2, wih_ref[...], preferred_element_type=jnp.float32)
                   + bih_ref[...]).reshape(T, B, 6 * Hh)

    whh_f, bhh_f = whh_f_ref[...], bhh_f_ref[...]
    whh_b, bhh_b = whh_b_ref[...], bhh_b_ref[...]

    def cell(gi, h, whh, bhh):
        gh = jnp.dot(h.astype(jnp.bfloat16), whh,
                     preferred_element_type=jnp.float32) + bhh
        r = jax.nn.sigmoid(gi[:, 0:Hh] + gh[:, 0:Hh])
        z = jax.nn.sigmoid(gi[:, Hh:2 * Hh] + gh[:, Hh:2 * Hh])
        nl = jnp.tanh(gi[:, 2 * Hh:3 * Hh] + r * gh[:, 2 * Hh:3 * Hh])
        return (1.0 - z) * nl + z * h

    def gru_step(t, carry):
        h_f, h_b = carry
        tb = T - 1 - t
        m_f = mask_ref[t]                         # (B, 1)
        m_b = mask_ref[tb]
        gi_f = gi_ref[t]                          # (B, 6*Hh)
        gi_b = gi_ref[tb]
        h_f = m_f * cell(gi_f[:, :3 * Hh], h_f, whh_f, bhh_f) + (1.0 - m_f) * h_f
        h_b = m_b * cell(gi_b[:, 3 * Hh:], h_b, whh_b, bhh_b) + (1.0 - m_b) * h_b
        fwd_ref[t] = h_f * m_f
        bwd_ref[tb] = h_b * m_b
        return h_f, h_b

    h0 = jnp.zeros((B, Hh), jnp.float32)
    _ = lax.fori_loop(0, T, gru_step, (h0, h0))

    # emissions = fc([fwd | bwd]) without materializing the concatenation.
    f_all = fwd_ref[...].reshape(T * B, Hh).astype(jnp.bfloat16)
    b_all = bwd_ref[...].reshape(T * B, Hh).astype(jnp.bfloat16)
    em = (jnp.dot(f_all, wfc_f_ref[...], preferred_element_type=jnp.float32)
          + jnp.dot(b_all, wfc_b_ref[...], preferred_element_type=jnp.float32)
          + bfc_ref[...]).reshape(T, B, C)
    em_ref[...] = em

    oh = tags_oh_ref[...]                         # (T, B, C)
    mask_col = mask_ref[...]                      # (T, B, 1)
    trans = trans_ref[...]                        # (C, C)
    start = start_ref[...]                        # (1, C)
    end = end_ref[...]                            # (1, C)

    # ---- numerator: gold-path score (vectorized over time) ----
    # torchcrf requires mask[:, 0] == 1, so the t=0 terms are unmasked.
    em_gold = jnp.sum(em * oh, axis=-1, keepdims=True)                   # (T, B, 1)
    num = jnp.sum(start * oh[0], axis=-1, keepdims=True) + em_gold[0]    # (B, 1)
    num = num + jnp.sum(mask_col[1:] * em_gold[1:], axis=0)
    tr = jnp.dot(oh[:-1].reshape((T - 1) * B, C), trans,
                 preferred_element_type=jnp.float32).reshape(T - 1, B, C)
    tr = jnp.sum(tr * oh[1:], axis=-1, keepdims=True)                    # (T-1, B, 1)
    num = num + jnp.sum(mask_col[1:] * tr, axis=0)
    mask_next = jnp.concatenate(
        [mask_col[1:], jnp.zeros_like(mask_col[:1])], axis=0)            # (T, B, 1)
    last_oh = jnp.sum((mask_col - mask_next) * oh, axis=0)               # (B, C)
    num = num + jnp.sum(end * last_oh, axis=-1, keepdims=True)

    # ---- denominator: log partition function (inherently serial over T) ----
    trans_b = trans[None, :, :]                   # hoisted broadcast (made once, not per step)

    def crf_step(t, score):
        em_t = em_ref[t]                          # (B, C)
        m_t = mask_ref[t]                         # (B, 1)
        nxt = score[:, :, None] + trans_b + em_t[:, None, :]             # (B, C, C)
        mx = jnp.max(nxt, axis=1, keepdims=True)
        lse = jnp.log(jnp.sum(jnp.exp(nxt - mx), axis=1)) + mx[:, 0, :]
        return jnp.where(m_t > 0.0, lse, score)

    score = lax.fori_loop(1, T, crf_step, start + em[0])
    score = score + end
    mx = jnp.max(score, axis=-1, keepdims=True)
    logz = jnp.log(jnp.sum(jnp.exp(score - mx), axis=-1, keepdims=True)) + mx   # (B, 1)

    loss_ref[...] = jnp.reshape(-jnp.mean(num - logz), (1, 1))


# ------------------------------- glue / wrapper -------------------------------

def _pick_tile_ch(B, CH, S, H, budget_bytes):
    """Largest chunk tile (multiple of 8, or full CH) whose working set fits VMEM."""
    def need(t):
        n = B * t
        return (2 * n * S * H * 2        # x tile (bf16), double buffered
                + 2 * n * S * 4          # attention-bias tile (f32), double buffered
                + n * S * 2 * H * 4      # f32 K|V projection temp
                + 2 * n * S * H * 2      # bf16 K / V copies
                + 16 * n * H * 4         # CLS-path f32 temps (q/ctx/ffn/ln, generous)
                + 2 * n * H * 2)         # output tile (bf16), double buffered
    best = None
    for t in range(1, CH + 1):
        if CH % t or (t != CH and t % 8):
            continue
        if need(t) <= budget_bytes:
            best = t
    return best if best is not None else (8 if CH % 8 == 0 else CH)


def _bert_weight_list(params):
    return (params['wq'], params['bq'], params['wkv'], params['bkv'],
            params['wo'], params['bo'], params['ln1_g'], params['ln1_b'],
            params['w1'], params['b1'], params['w2'], params['b2'],
            params['ln2_g'], params['ln2_b'])


def _run_bert_layer(x, attn_bias, weights, *, tile_ch, single_buffer_weights):
    B, CH, S, H = x.shape

    def wspec(w):
        zeros = (0,) * w.ndim
        if single_buffer_weights:
            # Constant-index weights: keep a single resident VMEM copy instead of the
            # default double buffering (halves resident weight footprint; matters at
            # roberta-base size on v7x's 64 MiB / v5e's 16 MiB scoped VMEM).
            return pl.BlockSpec(w.shape, lambda c, z=zeros: z,
                                pipeline_mode=pl.Buffered(1))
        return pl.BlockSpec(w.shape, lambda c, z=zeros: z)

    return pl.pallas_call(
        bert_cls_layer_kernel,
        out_shape=jax.ShapeDtypeStruct((CH, B, H), jnp.bfloat16),
        grid=(CH // tile_ch,),
        in_specs=[pl.BlockSpec((B, tile_ch, S, H), lambda c: (0, c, 0, 0)),
                  pl.BlockSpec((B, tile_ch, S), lambda c: (0, c, 0))]
                 + [wspec(w) for w in weights],
        out_specs=pl.BlockSpec((tile_ch, B, H), lambda c: (c, 0, 0)),
        compiler_params=pltpu.CompilerParams(
            dimension_semantics=("parallel",),
            vmem_limit_bytes=_VMEM_LIMIT_BYTES),
    )(x, attn_bias, *weights)


def init_params(key, vocab, seq_len, nhid, nclass):
    ks = list(jax.random.split(key, 40))
    bf = jnp.bfloat16

    def nrm(shape, scale=0.02, dtype=jnp.float32):
        return (scale * jax.random.normal(ks.pop(), shape)).astype(dtype)

    Hh = nhid // 2
    p = {
        # BERT stand-in (single transformer layer); matmul weights stored in bf16.
        # NOTE: production sizes should keep nhid / 3*Hh multiples of 128 (lane-dense).
        'word_emb': nrm((vocab, nhid)),
        'pos_emb': nrm((seq_len, nhid)),
        'wq': nrm((nhid, nhid), dtype=bf), 'bq': jnp.zeros((1, nhid), jnp.float32),
        'wkv': nrm((nhid, 2 * nhid), dtype=bf), 'bkv': jnp.zeros((1, 2 * nhid), jnp.float32),
        'wo': nrm((nhid, nhid), dtype=bf), 'bo': jnp.zeros((1, nhid), jnp.float32),
        'ln1_g': jnp.ones((1, nhid), jnp.float32), 'ln1_b': jnp.zeros((1, nhid), jnp.float32),
        'w1': nrm((nhid, 4 * nhid), dtype=bf), 'b1': jnp.zeros((1, 4 * nhid), jnp.float32),
        'w2': nrm((4 * nhid, nhid), dtype=bf), 'b2': jnp.zeros((1, nhid), jnp.float32),
        'ln2_g': jnp.ones((1, nhid), jnp.float32), 'ln2_b': jnp.zeros((1, nhid), jnp.float32),
        # bidirectional GRU (nn.GRU(nhid, nhid//2, bidirectional=True); gates r,z,n);
        # input->hidden weights of both directions fused into one (H, 6*Hh) matrix.
        'wih': nrm((nhid, 6 * Hh), dtype=bf), 'bih': jnp.zeros((1, 6 * Hh), jnp.float32),
        'whh_f': nrm((Hh, 3 * Hh), dtype=bf), 'bhh_f': jnp.zeros((1, 3 * Hh), jnp.float32),
        'whh_b': nrm((Hh, 3 * Hh), dtype=bf), 'bhh_b': jnp.zeros((1, 3 * Hh), jnp.float32),
        # fc split into [fwd | bwd] halves so the kernel never materializes the concat
        'wfc_f': nrm((Hh, nclass), dtype=bf), 'wfc_b': nrm((Hh, nclass), dtype=bf),
        'bfc': jnp.zeros((1, nclass), jnp.float32),
        # CRF
        'crf_trans': nrm((nclass, nclass), 0.1),
        'crf_start': nrm((1, nclass), 0.1),
        'crf_end': nrm((1, nclass), 0.1),
    }
    return p


def bcrf_forward(params, input_ids, attention_mask, chunk_lens,
                 speaker_ids, topic_labels, labels, nclass):
    # speaker_info == 'none' / topic_info == 'none' => speaker/topic embeddings unused.
    del speaker_ids, topic_labels
    B, CH, S = input_ids.shape
    H = params['word_emb'].shape[-1]
    Hh = H // 2

    # Glue: embedding gather (token + position); everything else runs in kernels.
    x = (params['word_emb'][input_ids]
         + params['pos_emb'][None, None, :, :]).astype(jnp.bfloat16)      # (B, CH, S, H)
    attn_bias = (attention_mask.astype(jnp.float32) - 1.0) * 1e9          # 0 valid / -1e9 pad

    # ---- BERT-stub layer: grid over chunk tiles, full batch per block ----
    weights = _bert_weight_list(params)
    w_bytes = sum(int(w.size) * w.dtype.itemsize for w in weights)
    tile_budget = max(_VMEM_LIMIT_BYTES - 2 * w_bytes - (2 << 20), 1 << 20)
    tile_ch = _pick_tile_ch(B, CH, S, H, tile_budget)

    try:
        cls = _run_bert_layer(x, attn_bias, weights,
                              tile_ch=tile_ch, single_buffer_weights=True)
    except Exception:
        # TODO(synk): pipeline_mode=pl.Buffered(1) unsupported in this jax build;
        # fall back to default double-buffered weight blocks.
        cls = _run_bert_layer(x, attn_bias, weights,
                              tile_ch=tile_ch, single_buffer_weights=False)

    # ---- fused BiGRU + fc + CRF loss (cls already (T=CH, B, H) bf16) ----
    step_mask = (jnp.arange(CH)[:, None] < chunk_lens[None, :]).astype(jnp.float32)
    step_mask = step_mask[:, :, None]                                     # (T, B, 1)
    # TODO(synk): nn.Dropout(p=0.5) is identity here (eval-mode semantics; no RNG dropout).
    # Note: pad_packed_sequence would trim the time axis to max(chunk_lens); since the
    # CRF mask zeroes all trimmed steps this truncation is a mathematical no-op here.
    tags_oh = jnp.transpose(jax.nn.one_hot(labels, nclass, dtype=jnp.float32), (1, 0, 2))

    # TODO(synk): on v7x (2 TensorCores) this call could take a parallel grid over B
    # with per-row (num - logz) reduced in the wrapper; kept single-core here since B
    # is tiny and v5e/v6e have a single TensorCore.
    vm = pl.BlockSpec(memory_space=pltpu.MemorySpace.VMEM)
    loss = pl.pallas_call(
        gru_crf_loss_kernel,
        out_shape=jax.ShapeDtypeStruct((1, 1), jnp.float32),
        in_specs=[vm] * 15,
        out_specs=vm,
        scratch_shapes=[pltpu.VMEM((CH, B, Hh), jnp.float32),       # fwd GRU outputs
                        pltpu.VMEM((CH, B, Hh), jnp.float32),       # bwd GRU outputs
                        pltpu.VMEM((CH, B, 6 * Hh), jnp.float32),   # fused i->h projections
                        pltpu.VMEM((CH, B, nclass), jnp.float32)],  # emissions
        compiler_params=pltpu.CompilerParams(
            vmem_limit_bytes=_VMEM_LIMIT_BYTES),
    )(cls, step_mask, tags_oh,
      params['wih'], params['bih'],
      params['whh_f'], params['bhh_f'], params['whh_b'], params['bhh_b'],
      params['wfc_f'], params['wfc_b'], params['bfc'],
      params['crf_trans'], params['crf_start'], params['crf_end'])
    return loss[0, 0]


if __name__ == "__main__":
    B, CH, S = 2, 8, 16          # batch, chunk_size, seq_len
    vocab, nhid, nclass = 100, 32, 4

    key = jax.random.PRNGKey(0)
    kp, ki, kl = jax.random.split(key, 3)
    params = init_params(kp, vocab, S, nhid, nclass)

    input_ids = jax.random.randint(ki, (B, CH, S), 0, vocab, dtype=jnp.int32)
    seq_valid = jnp.array([[S] * CH, [S - 4] * CH], jnp.int32)   # some token padding
    attention_mask = (jnp.arange(S)[None, None, :] < seq_valid[:, :, None]).astype(jnp.int32)
    chunk_lens = jnp.array([CH, 5], jnp.int32)                   # ragged chunk lengths
    speaker_ids = jnp.zeros((B, CH), jnp.int32)
    topic_labels = jnp.zeros((B, CH), jnp.int32)
    labels = jax.random.randint(kl, (B, CH), 0, nclass, dtype=jnp.int32)

    loss = bcrf_forward(params, input_ids, attention_mask, chunk_lens,
                        speaker_ids, topic_labels, labels, nclass)
    loss = jax.block_until_ready(loss)
    assert bool(jnp.isfinite(loss))
    print("KERNEL_OK")
</pallas_src>

<mosaic_0001>
module attributes {stable_mosaic.version = 11 : i64} {
  func.func @bert_cls_layer_kernel(%arg0: i32, %arg1: memref<2x8x16x32xbf16, #tpu.memory_space<vmem>>, %arg2: memref<2x8x16xf32, #tpu.memory_space<vmem>>, %arg3: memref<32x32xbf16, #tpu.memory_space<vmem>>, %arg4: memref<1x32xf32, #tpu.memory_space<vmem>>, %arg5: memref<32x64xbf16, #tpu.memory_space<vmem>>, %arg6: memref<1x64xf32, #tpu.memory_space<vmem>>, %arg7: memref<32x32xbf16, #tpu.memory_space<vmem>>, %arg8: memref<1x32xf32, #tpu.memory_space<vmem>>, %arg9: memref<1x32xf32, #tpu.memory_space<vmem>>, %arg10: memref<1x32xf32, #tpu.memory_space<vmem>>, %arg11: memref<32x128xbf16, #tpu.memory_space<vmem>>, %arg12: memref<1x128xf32, #tpu.memory_space<vmem>>, %arg13: memref<128x32xbf16, #tpu.memory_space<vmem>>, %arg14: memref<1x32xf32, #tpu.memory_space<vmem>>, %arg15: memref<1x32xf32, #tpu.memory_space<vmem>>, %arg16: memref<1x32xf32, #tpu.memory_space<vmem>>, %arg17: memref<8x2x32xbf16, #tpu.memory_space<vmem>>) attributes {dimension_semantics = [#tpu.dimension_semantics<parallel>], iteration_bounds = array<i64: 1>, scalar_prefetch = 0 : i64, scratch_operands = 0 : i64, tpu.core_type = #tpu.core_type<tc>, window_params = [{transform_indices = @transform_0, window_bounds = array<i64: 2, 8, 16, 32>}, {transform_indices = @transform_1, window_bounds = array<i64: 2, 8, 16>}, {pipeline_mode = #tpu.pipeline_mode<synchronous>, transform_indices = @transform_2, window_bounds = array<i64: 32, 32>}, {pipeline_mode = #tpu.pipeline_mode<synchronous>, transform_indices = @transform_3, window_bounds = array<i64: 1, 32>}, {pipeline_mode = #tpu.pipeline_mode<synchronous>, transform_indices = @transform_4, window_bounds = array<i64: 32, 64>}, {pipeline_mode = #tpu.pipeline_mode<synchronous>, transform_indices = @transform_5, window_bounds = array<i64: 1, 64>}, {pipeline_mode = #tpu.pipeline_mode<synchronous>, transform_indices = @transform_6, window_bounds = array<i64: 32, 32>}, {pipeline_mode = #tpu.pipeline_mode<synchronous>, transform_indices = @transform_7, window_bounds = array<i64: 1, 32>}, {pipeline_mode = #tpu.pipeline_mode<synchronous>, transform_indices = @transform_8, window_bounds = array<i64: 1, 32>}, {pipeline_mode = #tpu.pipeline_mode<synchronous>, transform_indices = @transform_9, window_bounds = array<i64: 1, 32>}, {pipeline_mode = #tpu.pipeline_mode<synchronous>, transform_indices = @transform_10, window_bounds = array<i64: 32, 128>}, {pipeline_mode = #tpu.pipeline_mode<synchronous>, transform_indices = @transform_11, window_bounds = array<i64: 1, 128>}, {pipeline_mode = #tpu.pipeline_mode<synchronous>, transform_indices = @transform_12, window_bounds = array<i64: 128, 32>}, {pipeline_mode = #tpu.pipeline_mode<synchronous>, transform_indices = @transform_13, window_bounds = array<i64: 1, 32>}, {pipeline_mode = #tpu.pipeline_mode<synchronous>, transform_indices = @transform_14, window_bounds = array<i64: 1, 32>}, {pipeline_mode = #tpu.pipeline_mode<synchronous>, transform_indices = @transform_15, window_bounds = array<i64: 1, 32>}, {transform_indices = @transform_16, window_bounds = array<i64: 8, 2, 32>}]} {
    %c0 = arith.constant 0 : index
    %c0_0 = arith.constant 0 : index
    %c0_1 = arith.constant 0 : index
    %c0_2 = arith.constant 0 : index
    %0 = vector.load %arg1[%c0, %c0_0, %c0_1, %c0_2] : memref<2x8x16x32xbf16, #tpu.memory_space<vmem>>, vector<2x8x16x32xbf16>
    %1 = vector.shape_cast %0 : vector<2x8x16x32xbf16> to vector<256x32xbf16>
    %c0_3 = arith.constant 0 : index
    %c0_4 = arith.constant 0 : index
    %2 = vector.load %arg5[%c0_3, %c0_4] : memref<32x64xbf16, #tpu.memory_space<vmem>>, vector<32x64xbf16>
    %cst = arith.constant dense<0.000000e+00> : vector<256x64xf32>
    %3 = tpu.matmul %1, %2, %cst {dimension_numbers = #tpu.dot_dimension_numbers<[1], [0], [0], [1], [0, 0, 1, 1], [], []>} : vector<256x32xbf16>, vector<32x64xbf16>, vector<256x64xf32> -> vector<256x64xf32>
    %c0_5 = arith.constant 0 : index
    %c0_6 = arith.constant 0 : index
    %4 = vector.load %arg6[%c0_5, %c0_6] : memref<1x64xf32, #tpu.memory_space<vmem>>, vector<1x64xf32>
    %5 = vector.broadcast %4 : vector<1x64xf32> to vector<256x64xf32>
    %6 = arith.addf %3, %5 : vector<256x64xf32>
    %7 = vector.shape_cast %6 : vector<256x64xf32> to vector<16x16x64xf32>
    %8 = vector.extract_strided_slice %7 {offsets = [0, 0, 0], sizes = [16, 16, 32], strides = [1, 1, 1]} : vector<16x16x64xf32> to vector<16x16x32xf32>
    %9 = arith.truncf %8 : vector<16x16x32xf32> to vector<16x16x32xbf16>
    %10 = vector.extract_strided_slice %7 {offsets = [0, 0, 32], sizes = [16, 16, 32], strides = [1, 1, 1]} : vector<16x16x64xf32> to vector<16x16x32xf32>
    %11 = arith.truncf %10 : vector<16x16x32xf32> to vector<16x16x32xbf16>
    %12 = vector.extract_strided_slice %0 {offsets = [0, 0, 0, 0], sizes = [2, 8, 1, 32], strides = [1, 1, 1, 1]} : vector<2x8x16x32xbf16> to vector<2x8x1x32xbf16>
    %13 = vector.shape_cast %12 : vector<2x8x1x32xbf16> to vector<2x8x32xbf16>
    %14 = vector.shape_cast %13 : vector<2x8x32xbf16> to vector<16x32xbf16>
    %c0_7 = arith.constant 0 : index
    %c0_8 = arith.constant 0 : index
    %15 = vector.load %arg3[%c0_7, %c0_8] : memref<32x32xbf16, #tpu.memory_space<vmem>>, vector<32x32xbf16>
    %cst_9 = arith.constant dense<0.000000e+00> : vector<16x32xf32>
    %16 = tpu.matmul %14, %15, %cst_9 {dimension_numbers = #tpu.dot_dimension_numbers<[1], [0], [0], [1], [0, 0, 1, 1], [], []>} : vector<16x32xbf16>, vector<32x32xbf16>, vector<16x32xf32> -> vector<16x32xf32>
    %c0_10 = arith.constant 0 : index
    %c0_11 = arith.constant 0 : index
    %17 = vector.load %arg4[%c0_10, %c0_11] : memref<1x32xf32, #tpu.memory_space<vmem>>, vector<1x32xf32>
    %18 = vector.broadcast %17 : vector<1x32xf32> to vector<16x32xf32>
    %19 = arith.addf %16, %18 : vector<16x32xf32>
    %20 = arith.truncf %19 : vector<16x32xf32> to vector<16x32xbf16>
    %21 = vector.shape_cast %20 : vector<16x32xbf16> to vector<16x1x32xbf16>
    "tpu.trace_start"() <{level = 10 : i32, message = "nqh,nsh->nqs"}> : () -> ()
    %cst_12 = arith.constant dense<0.000000e+00> : vector<16x1x16xf32>
    %22 = tpu.matmul %21, %9, %cst_12 {dimension_numbers = #tpu.dot_dimension_numbers<[2], [2], [1], [1], [0, 0, 0, 1, 1, 1], [0], [0]>} : vector<16x1x32xbf16>, vector<16x16x32xbf16>, vector<16x1x16xf32> -> vector<16x1x16xf32>
    "tpu.trace_stop"() : () -> ()
    %23 = vector.shape_cast %22 : vector<16x1x16xf32> to vector<16x16xf32>
    %cst_13 = arith.constant 0.176776692 : f32
    %24 = vector.broadcast %cst_13 : f32 to vector<16x16xf32>
    %25 = arith.mulf %23, %24 : vector<16x16xf32>
    %c0_14 = arith.constant 0 : index
    %c0_15 = arith.constant 0 : index
    %c0_16 = arith.constant 0 : index
    %26 = vector.load %arg2[%c0_14, %c0_15, %c0_16] : memref<2x8x16xf32, #tpu.memory_space<vmem>>, vector<2x8x16xf32>
    %27 = vector.shape_cast %26 : vector<2x8x16xf32> to vector<16x16xf32>
    %28 = arith.addf %25, %27 : vector<16x16xf32>
    %cst_17 = arith.constant dense<0xFF800000> : vector<16xf32>
    %29 = vector.multi_reduction <maximumf>, %28, %cst_17 [1] : vector<16x16xf32> to vector<16xf32>
    %cst_18 = arith.constant 0xFF800000 : f32
    %30 = vector.broadcast %cst_18 : f32 to vector<16xf32>
    %31 = arith.maximumf %30, %29 : vector<16xf32>
    %32 = vector.shape_cast %31 : vector<16xf32> to vector<16x1xf32>
    %33 = vector.broadcast %32 : vector<16x1xf32> to vector<16x16xf32>
    %34 = arith.subf %28, %33 : vector<16x16xf32>
    %35 = math.exp %34 : vector<16x16xf32>
    %cst_19 = arith.constant dense<0.000000e+00> : vector<16xf32>
    %36 = vector.multi_reduction <add>, %35, %cst_19 [1] : vector<16x16xf32> to vector<16xf32>
    %37 = vector.shape_cast %36 : vector<16xf32> to vector<16x1xf32>
    %38 = vector.broadcast %37 : vector<16x1xf32> to vector<16x16xf32>
    %39 = arith.divf %35, %38 : vector<16x16xf32>
    %40 = arith.truncf %39 : vector<16x16xf32> to vector<16x16xbf16>
    %41 = vector.shape_cast %40 : vector<16x16xbf16> to vector<16x1x16xbf16>
    "tpu.trace_start"() <{level = 10 : i32, message = "nqs,nsh->nqh"}> : () -> ()
    %cst_20 = arith.constant dense<0.000000e+00> : vector<16x1x32xf32>
    %42 = tpu.matmul %41, %11, %cst_20 {dimension_numbers = #tpu.dot_dimension_numbers<[2], [1], [1], [2], [0, 0, 0, 1, 1, 2], [0], [0]>} : vector<16x1x16xbf16>, vector<16x16x32xbf16>, vector<16x1x32xf32> -> vector<16x1x32xf32>
    "tpu.trace_stop"() : () -> ()
    %43 = vector.shape_cast %42 : vector<16x1x32xf32> to vector<16x32xf32>
    %44 = arith.truncf %43 : vector<16x32xf32> to vector<16x32xbf16>
    %c0_21 = arith.constant 0 : index
    %c0_22 = arith.constant 0 : index
    %45 = vector.load %arg7[%c0_21, %c0_22] : memref<32x32xbf16, #tpu.memory_space<vmem>>, vector<32x32xbf16>
    %cst_23 = arith.constant dense<0.000000e+00> : vector<16x32xf32>
    %46 = tpu.matmul %44, %45, %cst_23 {dimension_numbers = #tpu.dot_dimension_numbers<[1], [0], [0], [1], [0, 0, 1, 1], [], []>} : vector<16x32xbf16>, vector<32x32xbf16>, vector<16x32xf32> -> vector<16x32xf32>
    %c0_24 = arith.constant 0 : index
    %c0_25 = arith.constant 0 : index
    %47 = vector.load %arg8[%c0_24, %c0_25] : memref<1x32xf32, #tpu.memory_space<vmem>>, vector<1x32xf32>
    %48 = vector.broadcast %47 : vector<1x32xf32> to vector<16x32xf32>
    %49 = arith.addf %46, %48 : vector<16x32xf32>
    %50 = arith.extf %14 : vector<16x32xbf16> to vector<16x32xf32>
    %51 = arith.addf %50, %49 : vector<16x32xf32>
    %c0_26 = arith.constant 0 : index
    %c0_27 = arith.constant 0 : index
    %52 = vector.load %arg9[%c0_26, %c0_27] : memref<1x32xf32, #tpu.memory_space<vmem>>, vector<1x32xf32>
    %c0_28 = arith.constant 0 : index
    %c0_29 = arith.constant 0 : index
    %53 = vector.load %arg10[%c0_28, %c0_29] : memref<1x32xf32, #tpu.memory_space<vmem>>, vector<1x32xf32>
    %cst_30 = arith.constant dense<0.000000e+00> : vector<16xf32>
    %54 = vector.multi_reduction <add>, %51, %cst_30 [1] : vector<16x32xf32> to vector<16xf32>
    %55 = vector.shape_cast %54 : vector<16xf32> to vector<16x1xf32>
    %cst_31 = arith.constant 3.200000e+01 : f32
    %56 = vector.broadcast %cst_31 : f32 to vector<16x1xf32>
    %57 = arith.divf %55, %56 : vector<16x1xf32>
    %58 = vector.broadcast %57 : vector<16x1xf32> to vector<16x32xf32>
    %59 = arith.subf %51, %58 : vector<16x32xf32>
    %60 = arith.mulf %59, %59 : vector<16x32xf32>
    %cst_32 = arith.constant dense<0.000000e+00> : vector<16xf32>
    %61 = vector.multi_reduction <add>, %60, %cst_32 [1] : vector<16x32xf32> to vector<16xf32>
    %62 = vector.shape_cast %61 : vector<16xf32> to vector<16x1xf32>
    %cst_33 = arith.constant 3.200000e+01 : f32
    %63 = vector.broadcast %cst_33 : f32 to vector<16x1xf32>
    %64 = arith.divf %62, %63 : vector<16x1xf32>
    %65 = vector.broadcast %57 : vector<16x1xf32> to vector<16x32xf32>
    %66 = arith.subf %51, %65 : vector<16x32xf32>
    %cst_34 = arith.constant 9.99999974E-6 : f32
    %67 = vector.broadcast %cst_34 : f32 to vector<16x1xf32>
    %68 = arith.addf %64, %67 : vector<16x1xf32>
    %69 = math.rsqrt %68 : vector<16x1xf32>
    %70 = vector.broadcast %69 : vector<16x1xf32> to vector<16x32xf32>
    %71 = arith.mulf %66, %70 : vector<16x32xf32>
    %72 = vector.broadcast %52 : vector<1x32xf32> to vector<16x32xf32>
    %73 = arith.mulf %71, %72 : vector<16x32xf32>
    %74 = vector.broadcast %53 : vector<1x32xf32> to vector<16x32xf32>
    %75 = arith.addf %73, %74 : vector<16x32xf32>
    %76 = arith.truncf %75 : vector<16x32xf32> to vector<16x32xbf16>
    %c0_35 = arith.constant 0 : index
    %c0_36 = arith.constant 0 : index
    %77 = vector.load %arg11[%c0_35, %c0_36] : memref<32x128xbf16, #tpu.memory_space<vmem>>, vector<32x128xbf16>
    %cst_37 = arith.constant dense<0.000000e+00> : vector<16x128xf32>
    %78 = tpu.matmul %76, %77, %cst_37 {dimension_numbers = #tpu.dot_dimension_numbers<[1], [0], [0], [1], [0, 0, 1, 1], [], []>} : vector<16x32xbf16>, vector<32x128xbf16>, vector<16x128xf32> -> vector<16x128xf32>
    %c0_38 = arith.constant 0 : index
    %c0_39 = arith.constant 0 : index
    %79 = vector.load %arg12[%c0_38, %c0_39] : memref<1x128xf32, #tpu.memory_space<vmem>>, vector<1x128xf32>
    %80 = vector.broadcast %79 : vector<1x128xf32> to vector<16x128xf32>
    %81 = arith.addf %78, %80 : vector<16x128xf32>
    %82 = arith.mulf %81, %81 : vector<16x128xf32>
    %83 = arith.mulf %81, %82 : vector<16x128xf32>
    %cst_40 = arith.constant 4.471500e-02 : f32
    %84 = vector.broadcast %cst_40 : f32 to vector<16x128xf32>
    %85 = arith.mulf %84, %83 : vector<16x128xf32>
    %86 = arith.addf %81, %85 : vector<16x128xf32>
    %cst_41 = arith.constant 0.797884583 : f32
    %87 = vector.broadcast %cst_41 : f32 to vector<16x128xf32>
    %88 = arith.mulf %87, %86 : vector<16x128xf32>
    %89 = math.tanh %88 : vector<16x128xf32>
    %cst_42 = arith.constant 1.000000e+00 : f32
    %90 = vector.broadcast %cst_42 : f32 to vector<16x128xf32>
    %91 = arith.addf %90, %89 : vector<16x128xf32>
    %cst_43 = arith.constant 5.000000e-01 : f32
    %92 = vector.broadcast %cst_43 : f32 to vector<16x128xf32>
    %93 = arith.mulf %92, %91 : vector<16x128xf32>
    %94 = arith.mulf %81, %93 : vector<16x128xf32>
    %95 = arith.truncf %94 : vector<16x128xf32> to vector<16x128xbf16>
    %c0_44 = arith.constant 0 : index
    %c0_45 = arith.constant 0 : index
    %96 = vector.load %arg13[%c0_44, %c0_45] : memref<128x32xbf16, #tpu.memory_space<vmem>>, vector<128x32xbf16>
    %cst_46 = arith.constant dense<0.000000e+00> : vector<16x32xf32>
    %97 = tpu.matmul %95, %96, %cst_46 {dimension_numbers = #tpu.dot_dimension_numbers<[1], [0], [0], [1], [0, 0, 1, 1], [], []>} : vector<16x128xbf16>, vector<128x32xbf16>, vector<16x32xf32> -> vector<16x32xf32>
    %c0_47 = arith.constant 0 : index
    %c0_48 = arith.constant 0 : index
    %98 = vector.load %arg14[%c0_47, %c0_48] : memref<1x32xf32, #tpu.memory_space<vmem>>, vector<1x32xf32>
    %99 = vector.broadcast %98 : vector<1x32xf32> to vector<16x32xf32>
    %100 = arith.addf %97, %99 : vector<16x32xf32>
    %101 = arith.addf %75, %100 : vector<16x32xf32>
    %c0_49 = arith.constant 0 : index
    %c0_50 = arith.constant 0 : index
    %102 = vector.load %arg15[%c0_49, %c0_50] : memref<1x32xf32, #tpu.memory_space<vmem>>, vector<1x32xf32>
    %c0_51 = arith.constant 0 : index
    %c0_52 = arith.constant 0 : index
    %103 = vector.load %arg16[%c0_51, %c0_52] : memref<1x32xf32, #tpu.memory_space<vmem>>, vector<1x32xf32>
    %cst_53 = arith.constant dense<0.000000e+00> : vector<16xf32>
    %104 = vector.multi_reduction <add>, %101, %cst_53 [1] : vector<16x32xf32> to vector<16xf32>
    %105 = vector.shape_cast %104 : vector<16xf32> to vector<16x1xf32>
    %cst_54 = arith.constant 3.200000e+01 : f32
    %106 = vector.broadcast %cst_54 : f32 to vector<16x1xf32>
    %107 = arith.divf %105, %106 : vector<16x1xf32>
    %108 = vector.broadcast %107 : vector<16x1xf32> to vector<16x32xf32>
    %109 = arith.subf %101, %108 : vector<16x32xf32>
    %110 = arith.mulf %109, %109 : vector<16x32xf32>
    %cst_55 = arith.constant dense<0.000000e+00> : vector<16xf32>
    %111 = vector.multi_reduction <add>, %110, %cst_55 [1] : vector<16x32xf32> to vector<16xf32>
    %112 = vector.shape_cast %111 : vector<16xf32> to vector<16x1xf32>
    %cst_56 = arith.constant 3.200000e+01 : f32
    %113 = vector.broadcast %cst_56 : f32 to vector<16x1xf32>
    %114 = arith.divf %112, %113 : vector<16x1xf32>
    %115 = vector.broadcast %107 : vector<16x1xf32> to vector<16x32xf32>
    %116 = arith.subf %101, %115 : vector<16x32xf32>
    %cst_57 = arith.constant 9.99999974E-6 : f32
    %117 = vector.broadcast %cst_57 : f32 to vector<16x1xf32>
    %118 = arith.addf %114, %117 : vector<16x1xf32>
    %119 = math.rsqrt %118 : vector<16x1xf32>
    %120 = vector.broadcast %119 : vector<16x1xf32> to vector<16x32xf32>
    %121 = arith.mulf %116, %120 : vector<16x32xf32>
    %122 = vector.broadcast %102 : vector<1x32xf32> to vector<16x32xf32>
    %123 = arith.mulf %121, %122 : vector<16x32xf32>
    %124 = vector.broadcast %103 : vector<1x32xf32> to vector<16x32xf32>
    %125 = arith.addf %123, %124 : vector<16x32xf32>
    %126 = vector.shape_cast %125 : vector<16x32xf32> to vector<2x8x32xf32>
    %127 = arith.truncf %126 : vector<2x8x32xf32> to vector<2x8x32xbf16>
    %128 = vector.extract_strided_slice %127 {offsets = [0, 0, 0], sizes = [1, 8, 32], strides = [1, 1, 1]} : vector<2x8x32xbf16> to vector<1x8x32xbf16>
    %129 = vector.shape_cast %128 : vector<1x8x32xbf16> to vector<8x32xbf16>
    %c0_58 = arith.constant 0 : index
    %c0_59 = arith.constant 0 : index
    %c0_60 = arith.constant 0 : index
    %130 = vector.load %arg17[%c0_58, %c0_59, %c0_60] : memref<8x2x32xbf16, #tpu.memory_space<vmem>>, vector<8x1x32xbf16>
    %131 = vector.shape_cast %130 : vector<8x1x32xbf16> to vector<8x32xbf16>
    %132 = vector.shape_cast %129 : vector<8x32xbf16> to vector<8x1x32xbf16>
    tpu.vector_store %arg17[%c0_58, %c0_59, %c0_60], %132 {strides = array<i32>} : memref<8x2x32xbf16, #tpu.memory_space<vmem>>, vector<8x1x32xbf16>,
    %133 = vector.extract_strided_slice %127 {offsets = [1, 0, 0], sizes = [1, 8, 32], strides = [1, 1, 1]} : vector<2x8x32xbf16> to vector<1x8x32xbf16>
    %134 = vector.shape_cast %133 : vector<1x8x32xbf16> to vector<8x32xbf16>
    %c0_61 = arith.constant 0 : index
    %c1 = arith.constant 1 : index
    %c0_62 = arith.constant 0 : index
    %135 = vector.load %arg17[%c0_61, %c1, %c0_62] : memref<8x2x32xbf16, #tpu.memory_space<vmem>>, vector<8x1x32xbf16>
    %136 = vector.shape_cast %135 : vector<8x1x32xbf16> to vector<8x32xbf16>
    %137 = vector.shape_cast %134 : vector<8x32xbf16> to vector<8x1x32xbf16>
    tpu.vector_store %arg17[%c0_61, %c1, %c0_62], %137 {strides = array<i32>} : memref<8x2x32xbf16, #tpu.memory_space<vmem>>, vector<8x1x32xbf16>,
    return
  }
  func.func @transform_0(%arg0: i32) -> (i32, i32, i32, i32) {
    %c0_i32 = arith.constant 0 : i32
    %c0_i32_0 = arith.constant 0 : i32
    %c0_i32_1 = arith.constant 0 : i32
    %c0_i32_2 = arith.constant 0 : i32
    return %c0_i32, %arg0, %c0_i32_0, %c0_i32_1 : i32, i32, i32, i32
  }
  func.func @transform_1(%arg0: i32) -> (i32, i32, i32) {
    %c0_i32 = arith.constant 0 : i32
    %c0_i32_0 = arith.constant 0 : i32
    %c0_i32_1 = arith.constant 0 : i32
    return %c0_i32, %arg0, %c0_i32_0 : i32, i32, i32
  }
  func.func @transform_2(%arg0: i32) -> (i32, i32) {
    %c0_i32 = arith.constant 0 : i32
    %c0_i32_0 = arith.constant 0 : i32
    %c0_i32_1 = arith.constant 0 : i32
    return %c0_i32, %c0_i32_0 : i32, i32
  }
  func.func @transform_3(%arg0: i32) -> (i32, i32) {
    %c0_i32 = arith.constant 0 : i32
    %c0_i32_0 = arith.constant 0 : i32
    %c0_i32_1 = arith.constant 0 : i32
    return %c0_i32, %c0_i32_0 : i32, i32
  }
  func.func @transform_4(%arg0: i32) -> (i32, i32) {
    %c0_i32 = arith.constant 0 : i32
    %c0_i32_0 = arith.constant 0 : i32
    %c0_i32_1 = arith.constant 0 : i32
    return %c0_i32, %c0_i32_0 : i32, i32
  }
  func.func @transform_5(%arg0: i32) -> (i32, i32) {
    %c0_i32 = arith.constant 0 : i32
    %c0_i32_0 = arith.constant 0 : i32
    %c0_i32_1 = arith.constant 0 : i32
    return %c0_i32, %c0_i32_0 : i32, i32
  }
  func.func @transform_6(%arg0: i32) -> (i32, i32) {
    %c0_i32 = arith.constant 0 : i32
    %c0_i32_0 = arith.constant 0 : i32
    %c0_i32_1 = arith.constant 0 : i32
    return %c0_i32, %c0_i32_0 : i32, i32
  }
  func.func @transform_7(%arg0: i32) -> (i32, i32) {
    %c0_i32 = arith.constant 0 : i32
    %c0_i32_0 = arith.constant 0 : i32
    %c0_i32_1 = arith.constant 0 : i32
    return %c0_i32, %c0_i32_0 : i32, i32
  }
  func.func @transform_8(%arg0: i32) -> (i32, i32) {
    %c0_i32 = arith.constant 0 : i32
    %c0_i32_0 = arith.constant 0 : i32
    %c0_i32_1 = arith.constant 0 : i32
    return %c0_i32, %c0_i32_0 : i32, i32
  }
  func.func @transform_9(%arg0: i32) -> (i32, i32) {
    %c0_i32 = arith.constant 0 : i32
    %c0_i32_0 = arith.constant 0 : i32
    %c0_i32_1 = arith.constant 0 : i32
    return %c0_i32, %c0_i32_0 : i32, i32
  }
  func.func @transform_10(%arg0: i32) -> (i32, i32) {
    %c0_i32 = arith.constant 0 : i32
    %c0_i32_0 = arith.constant 0 : i32
    %c0_i32_1 = arith.constant 0 : i32
    return %c0_i32, %c0_i32_0 : i32, i32
  }
  func.func @transform_11(%arg0: i32) -> (i32, i32) {
    %c0_i32 = arith.constant 0 : i32
    %c0_i32_0 = arith.constant 0 : i32
    %c0_i32_1 = arith.constant 0 : i32
    return %c0_i32, %c0_i32_0 : i32, i32
  }
  func.func @transform_12(%arg0: i32) -> (i32, i32) {
    %c0_i32 = arith.constant 0 : i32
    %c0_i32_0 = arith.constant 0 : i32
    %c0_i32_1 = arith.constant 0 : i32
    return %c0_i32, %c0_i32_0 : i32, i32
  }
  func.func @transform_13(%arg0: i32) -> (i32, i32) {
    %c0_i32 = arith.constant 0 : i32
    %c0_i32_0 = arith.constant 0 : i32
    %c0_i32_1 = arith.constant 0 : i32
    return %c0_i32, %c0_i32_0 : i32, i32
  }
  func.func @transform_14(%arg0: i32) -> (i32, i32) {
    %c0_i32 = arith.constant 0 : i32
    %c0_i32_0 = arith.constant 0 : i32
    %c0_i32_1 = arith.constant 0 : i32
    return %c0_i32, %c0_i32_0 : i32, i32
  }
  func.func @transform_15(%arg0: i32) -> (i32, i32) {
    %c0_i32 = arith.constant 0 : i32
    %c0_i32_0 = arith.constant 0 : i32
    %c0_i32_1 = arith.constant 0 : i32
    return %c0_i32, %c0_i32_0 : i32, i32
  }
  func.func @transform_16(%arg0: i32) -> (i32, i32, i32) {
    %c0_i32 = arith.constant 0 : i32
    %c0_i32_0 = arith.constant 0 : i32
    %c0_i32_1 = arith.constant 0 : i32
    return %arg0, %c0_i32, %c0_i32_0 : i32, i32, i32
  }
}

module attributes {stable_mosaic.version = 11 : i64} {
  func.func @bert_cls_layer_kernel(%arg0: i32, %arg1: memref<2x8x16x32xbf16, #tpu.memory_space<vmem>>, %arg2: memref<2x8x16xf32, #tpu.memory_space<vmem>>, %arg3: memref<32x32xbf16, #tpu.memory_space<vmem>>, %arg4: memref<1x32xf32, #tpu.memory_space<vmem>>, %arg5: memref<32x64xbf16, #tpu.memory_space<vmem>>, %arg6: memref<1x64xf32, #tpu.memory_space<vmem>>, %arg7: memref<32x32xbf16, #tpu.memory_space<vmem>>, %arg8: memref<1x32xf32, #tpu.memory_space<vmem>>, %arg9: memref<1x32xf32, #tpu.memory_space<vmem>>, %arg10: memref<1x32xf32, #tpu.memory_space<vmem>>, %arg11: memref<32x128xbf16, #tpu.memory_space<vmem>>, %arg12: memref<1x128xf32, #tpu.memory_space<vmem>>, %arg13: memref<128x32xbf16, #tpu.memory_space<vmem>>, %arg14: memref<1x32xf32, #tpu.memory_space<vmem>>, %arg15: memref<1x32xf32, #tpu.memory_space<vmem>>, %arg16: memref<1x32xf32, #tpu.memory_space<vmem>>, %arg17: memref<8x2x32xbf16, #tpu.memory_space<vmem>>) attributes {dimension_semantics = [#tpu.dimension_semantics<parallel>], iteration_bounds = array<i64: 1>, scalar_prefetch = 0 : i64, scratch_operands = 0 : i64, tpu.core_type = #tpu.core_type<tc>, window_params = [{transform_indices = @transform_0, window_bounds = array<i64: 2, 8, 16, 32>}, {transform_indices = @transform_1, window_bounds = array<i64: 2, 8, 16>}, {pipeline_mode = #tpu.pipeline_mode<synchronous>, transform_indices = @transform_2, window_bounds = array<i64: 32, 32>}, {pipeline_mode = #tpu.pipeline_mode<synchronous>, transform_indices = @transform_3, window_bounds = array<i64: 1, 32>}, {pipeline_mode = #tpu.pipeline_mode<synchronous>, transform_indices = @transform_4, window_bounds = array<i64: 32, 64>}, {pipeline_mode = #tpu.pipeline_mode<synchronous>, transform_indices = @transform_5, window_bounds = array<i64: 1, 64>}, {pipeline_mode = #tpu.pipeline_mode<synchronous>, transform_indices = @transform_6, window_bounds = array<i64: 32, 32>}, {pipeline_mode = #tpu.pipeline_mode<synchronous>, transform_indices = @transform_7, window_bounds = array<i64: 1, 32>}, {pipeline_mode = #tpu.pipeline_mode<synchronous>, transform_indices = @transform_8, window_bounds = array<i64: 1, 32>}, {pipeline_mode = #tpu.pipeline_mode<synchronous>, transform_indices = @transform_9, window_bounds = array<i64: 1, 32>}, {pipeline_mode = #tpu.pipeline_mode<synchronous>, transform_indices = @transform_10, window_bounds = array<i64: 32, 128>}, {pipeline_mode = #tpu.pipeline_mode<synchronous>, transform_indices = @transform_11, window_bounds = array<i64: 1, 128>}, {pipeline_mode = #tpu.pipeline_mode<synchronous>, transform_indices = @transform_12, window_bounds = array<i64: 128, 32>}, {pipeline_mode = #tpu.pipeline_mode<synchronous>, transform_indices = @transform_13, window_bounds = array<i64: 1, 32>}, {pipeline_mode = #tpu.pipeline_mode<synchronous>, transform_indices = @transform_14, window_bounds = array<i64: 1, 32>}, {pipeline_mode = #tpu.pipeline_mode<synchronous>, transform_indices = @transform_15, window_bounds = array<i64: 1, 32>}, {transform_indices = @transform_16, window_bounds = array<i64: 8, 2, 32>}]} {
    %c0 = arith.constant 0 : index
    %c0_0 = arith.constant 0 : index
    %c0_1 = arith.constant 0 : index
    %c0_2 = arith.constant 0 : index
    %0 = vector.load %arg1[%c0, %c0_0, %c0_1, %c0_2] : memref<2x8x16x32xbf16, #tpu.memory_space<vmem>>, vector<2x8x16x32xbf16>
    %1 = vector.shape_cast %0 : vector<2x8x16x32xbf16> to vector<256x32xbf16>
    %c0_3 = arith.constant 0 : index
    %c0_4 = arith.constant 0 : index
    %2 = vector.load %arg5[%c0_3, %c0_4] : memref<32x64xbf16, #tpu.memory_space<vmem>>, vector<32x64xbf16>
    %cst = arith.constant dense<0.000000e+00> : vector<256x64xf32>
    %3 = tpu.matmul %1, %2, %cst {dimension_numbers = #tpu.dot_dimension_numbers<[1], [0], [0], [1], [0, 0, 1, 1], [], []>} : vector<256x32xbf16>, vector<32x64xbf16>, vector<256x64xf32> -> vector<256x64xf32>
    %c0_5 = arith.constant 0 : index
    %c0_6 = arith.constant 0 : index
    %4 = vector.load %arg6[%c0_5, %c0_6] : memref<1x64xf32, #tpu.memory_space<vmem>>, vector<1x64xf32>
    %5 = vector.broadcast %4 : vector<1x64xf32> to vector<256x64xf32>
    %6 = arith.addf %3, %5 : vector<256x64xf32>
    %7 = vector.shape_cast %6 : vector<256x64xf32> to vector<16x16x64xf32>
    %8 = vector.extract_strided_slice %7 {offsets = [0, 0, 0], sizes = [16, 16, 32], strides = [1, 1, 1]} : vector<16x16x64xf32> to vector<16x16x32xf32>
    %9 = arith.truncf %8 : vector<16x16x32xf32> to vector<16x16x32xbf16>
    %10 = vector.extract_strided_slice %7 {offsets = [0, 0, 32], sizes = [16, 16, 32], strides = [1, 1, 1]} : vector<16x16x64xf32> to vector<16x16x32xf32>
    %11 = arith.truncf %10 : vector<16x16x32xf32> to vector<16x16x32xbf16>
    %12 = vector.extract_strided_slice %0 {offsets = [0, 0, 0, 0], sizes = [2, 8, 1, 32], strides = [1, 1, 1, 1]} : vector<2x8x16x32xbf16> to vector<2x8x1x32xbf16>
    %13 = vector.shape_cast %12 : vector<2x8x1x32xbf16> to vector<2x8x32xbf16>
    %14 = vector.shape_cast %13 : vector<2x8x32xbf16> to vector<16x32xbf16>
    %c0_7 = arith.constant 0 : index
    %c0_8 = arith.constant 0 : index
    %15 = vector.load %arg3[%c0_7, %c0_8] : memref<32x32xbf16, #tpu.memory_space<vmem>>, vector<32x32xbf16>
    %cst_9 = arith.constant dense<0.000000e+00> : vector<16x32xf32>
    %16 = tpu.matmul %14, %15, %cst_9 {dimension_numbers = #tpu.dot_dimension_numbers<[1], [0], [0], [1], [0, 0, 1, 1], [], []>} : vector<16x32xbf16>, vector<32x32xbf16>, vector<16x32xf32> -> vector<16x32xf32>
    %c0_10 = arith.constant 0 : index
    %c0_11 = arith.constant 0 : index
    %17 = vector.load %arg4[%c0_10, %c0_11] : memref<1x32xf32, #tpu.memory_space<vmem>>, vector<1x32xf32>
    %18 = vector.broadcast %17 : vector<1x32xf32> to vector<16x32xf32>
    %19 = arith.addf %16, %18 : vector<16x32xf32>
    %20 = arith.truncf %19 : vector<16x32xf32> to vector<16x32xbf16>
    %21 = vector.shape_cast %20 : vector<16x32xbf16> to vector<16x1x32xbf16>
    "tpu.trace_start"() <{level = 10 : i32, message = "nqh,nsh->nqs"}> : () -> ()
    %cst_12 = arith.constant dense<0.000000e+00> : vector<16x1x16xf32>
    %22 = tpu.matmul %21, %9, %cst_12 {dimension_numbers = #tpu.dot_dimension_numbers<[2], [2], [1], [1], [0, 0, 0, 1, 1, 1], [0], [0]>} : vector<16x1x32xbf16>, vector<16x16x32xbf16>, vector<16x1x16xf32> -> vector<16x1x16xf32>
    "tpu.trace_stop"() : () -> ()
    %23 = vector.shape_cast %22 : vector<16x1x16xf32> to vector<16x16xf32>
    %cst_13 = arith.constant 0.176776692 : f32
    %24 = vector.broadcast %cst_13 : f32 to vector<16x16xf32>
    %25 = arith.mulf %23, %24 : vector<16x16xf32>
    %c0_14 = arith.constant 0 : index
    %c0_15 = arith.constant 0 : index
    %c0_16 = arith.constant 0 : index
    %26 = vector.load %arg2[%c0_14, %c0_15, %c0_16] : memref<2x8x16xf32, #tpu.memory_space<vmem>>, vector<2x8x16xf32>
    %27 = vector.shape_cast %26 : vector<2x8x16xf32> to vector<16x16xf32>
    %28 = arith.addf %25, %27 : vector<16x16xf32>
    %cst_17 = arith.constant dense<0xFF800000> : vector<16xf32>
    %29 = vector.multi_reduction <maximumf>, %28, %cst_17 [1] : vector<16x16xf32> to vector<16xf32>
    %cst_18 = arith.constant 0xFF800000 : f32
    %30 = vector.broadcast %cst_18 : f32 to vector<16xf32>
    %31 = arith.maximumf %30, %29 : vector<16xf32>
    %32 = vector.shape_cast %31 : vector<16xf32> to vector<16x1xf32>
    %33 = vector.broadcast %32 : vector<16x1xf32> to vector<16x16xf32>
    %34 = arith.subf %28, %33 : vector<16x16xf32>
    %35 = math.exp %34 : vector<16x16xf32>
    %cst_19 = arith.constant dense<0.000000e+00> : vector<16xf32>
    %36 = vector.multi_reduction <add>, %35, %cst_19 [1] : vector<16x16xf32> to vector<16xf32>
    %37 = vector.shape_cast %36 : vector<16xf32> to vector<16x1xf32>
    %38 = vector.broadcast %37 : vector<16x1xf32> to vector<16x16xf32>
    %39 = arith.divf %35, %38 : vector<16x16xf32>
    %40 = arith.truncf %39 : vector<16x16xf32> to vector<16x16xbf16>
    %41 = vector.shape_cast %40 : vector<16x16xbf16> to vector<16x1x16xbf16>
    "tpu.trace_start"() <{level = 10 : i32, message = "nqs,nsh->nqh"}> : () -> ()
    %cst_20 = arith.constant dense<0.000000e+00> : vector<16x1x32xf32>
    %42 = tpu.matmul %41, %11, %cst_20 {dimension_numbers = #tpu.dot_dimension_numbers<[2], [1], [1], [2], [0, 0, 0, 1, 1, 2], [0], [0]>} : vector<16x1x16xbf16>, vector<16x16x32xbf16>, vector<16x1x32xf32> -> vector<16x1x32xf32>
    "tpu.trace_stop"() : () -> ()
    %43 = vector.shape_cast %42 : vector<16x1x32xf32> to vector<16x32xf32>
    %44 = arith.truncf %43 : vector<16x32xf32> to vector<16x32xbf16>
    %c0_21 = arith.constant 0 : index
    %c0_22 = arith.constant 0 : index
    %45 = vector.load %arg7[%c0_21, %c0_22] : memref<32x32xbf16, #tpu.memory_space<vmem>>, vector<32x32xbf16>
    %cst_23 = arith.constant dense<0.000000e+00> : vector<16x32xf32>
    %46 = tpu.matmul %44, %45, %cst_23 {dimension_numbers = #tpu.dot_dimension_numbers<[1], [0], [0], [1], [0, 0, 1, 1], [], []>} : vector<16x32xbf16>, vector<32x32xbf16>, vector<16x32xf32> -> vector<16x32xf32>
    %c0_24 = arith.constant 0 : index
    %c0_25 = arith.constant 0 : index
    %47 = vector.load %arg8[%c0_24, %c0_25] : memref<1x32xf32, #tpu.memory_space<vmem>>, vector<1x32xf32>
    %48 = vector.broadcast %47 : vector<1x32xf32> to vector<16x32xf32>
    %49 = arith.addf %46, %48 : vector<16x32xf32>
    %50 = arith.extf %14 : vector<16x32xbf16> to vector<16x32xf32>
    %51 = arith.addf %50, %49 : vector<16x32xf32>
    %c0_26 = arith.constant 0 : index
    %c0_27 = arith.constant 0 : index
    %52 = vector.load %arg9[%c0_26, %c0_27] : memref<1x32xf32, #tpu.memory_space<vmem>>, vector<1x32xf32>
    %c0_28 = arith.constant 0 : index
    %c0_29 = arith.constant 0 : index
    %53 = vector.load %arg10[%c0_28, %c0_29] : memref<1x32xf32, #tpu.memory_space<vmem>>, vector<1x32xf32>
    %cst_30 = arith.constant dense<0.000000e+00> : vector<16xf32>
    %54 = vector.multi_reduction <add>, %51, %cst_30 [1] : vector<16x32xf32> to vector<16xf32>
    %55 = vector.shape_cast %54 : vector<16xf32> to vector<16x1xf32>
    %cst_31 = arith.constant 3.200000e+01 : f32
    %56 = vector.broadcast %cst_31 : f32 to vector<16x1xf32>
    %57 = arith.divf %55, %56 : vector<16x1xf32>
    %58 = vector.broadcast %57 : vector<16x1xf32> to vector<16x32xf32>
    %59 = arith.subf %51, %58 : vector<16x32xf32>
    %60 = arith.mulf %59, %59 : vector<16x32xf32>
    %cst_32 = arith.constant dense<0.000000e+00> : vector<16xf32>
    %61 = vector.multi_reduction <add>, %60, %cst_32 [1] : vector<16x32xf32> to vector<16xf32>
    %62 = vector.shape_cast %61 : vector<16xf32> to vector<16x1xf32>
    %cst_33 = arith.constant 3.200000e+01 : f32
    %63 = vector.broadcast %cst_33 : f32 to vector<16x1xf32>
    %64 = arith.divf %62, %63 : vector<16x1xf32>
    %65 = vector.broadcast %57 : vector<16x1xf32> to vector<16x32xf32>
    %66 = arith.subf %51, %65 : vector<16x32xf32>
    %cst_34 = arith.constant 9.99999974E-6 : f32
    %67 = vector.broadcast %cst_34 : f32 to vector<16x1xf32>
    %68 = arith.addf %64, %67 : vector<16x1xf32>
    %69 = math.rsqrt %68 : vector<16x1xf32>
    %70 = vector.broadcast %69 : vector<16x1xf32> to vector<16x32xf32>
    %71 = arith.mulf %66, %70 : vector<16x32xf32>
    %72 = vector.broadcast %52 : vector<1x32xf32> to vector<16x32xf32>
    %73 = arith.mulf %71, %72 : vector<16x32xf32>
    %74 = vector.broadcast %53 : vector<1x32xf32> to vector<16x32xf32>
    %75 = arith.addf %73, %74 : vector<16x32xf32>
    %76 = arith.truncf %75 : vector<16x32xf32> to vector<16x32xbf16>
    %c0_35 = arith.constant 0 : index
    %c0_36 = arith.constant 0 : index
    %77 = vector.load %arg11[%c0_35, %c0_36] : memref<32x128xbf16, #tpu.memory_space<vmem>>, vector<32x128xbf16>
    %cst_37 = arith.constant dense<0.000000e+00> : vector<16x128xf32>
    %78 = tpu.matmul %76, %77, %cst_37 {dimension_numbers = #tpu.dot_dimension_numbers<[1], [0], [0], [1], [0, 0, 1, 1], [], []>} : vector<16x32xbf16>, vector<32x128xbf16>, vector<16x128xf32> -> vector<16x128xf32>
    %c0_38 = arith.constant 0 : index
    %c0_39 = arith.constant 0 : index
    %79 = vector.load %arg12[%c0_38, %c0_39] : memref<1x128xf32, #tpu.memory_space<vmem>>, vector<1x128xf32>
    %80 = vector.broadcast %79 : vector<1x128xf32> to vector<16x128xf32>
    %81 = arith.addf %78, %80 : vector<16x128xf32>
    %82 = arith.mulf %81, %81 : vector<16x128xf32>
    %83 = arith.mulf %81, %82 : vector<16x128xf32>
    %cst_40 = arith.constant 4.471500e-02 : f32
    %84 = vector.broadcast %cst_40 : f32 to vector<16x128xf32>
    %85 = arith.mulf %84, %83 : vector<16x128xf32>
    %86 = arith.addf %81, %85 : vector<16x128xf32>
    %cst_41 = arith.constant 0.797884583 : f32
    %87 = vector.broadcast %cst_41 : f32 to vector<16x128xf32>
    %88 = arith.mulf %87, %86 : vector<16x128xf32>
    %89 = math.tanh %88 : vector<16x128xf32>
    %cst_42 = arith.constant 1.000000e+00 : f32
    %90 = vector.broadcast %cst_42 : f32 to vector<16x128xf32>
    %91 = arith.addf %90, %89 : vector<16x128xf32>
    %cst_43 = arith.constant 5.000000e-01 : f32
    %92 = vector.broadcast %cst_43 : f32 to vector<16x128xf32>
    %93 = arith.mulf %92, %91 : vector<16x128xf32>
    %94 = arith.mulf %81, %93 : vector<16x128xf32>
    %95 = arith.truncf %94 : vector<16x128xf32> to vector<16x128xbf16>
    %c0_44 = arith.constant 0 : index
    %c0_45 = arith.constant 0 : index
    %96 = vector.load %arg13[%c0_44, %c0_45] : memref<128x32xbf16, #tpu.memory_space<vmem>>, vector<128x32xbf16>
    %cst_46 = arith.constant dense<0.000000e+00> : vector<16x32xf32>
    %97 = tpu.matmul %95, %96, %cst_46 {dimension_numbers = #tpu.dot_dimension_numbers<[1], [0], [0], [1], [0, 0, 1, 1], [], []>} : vector<16x128xbf16>, vector<128x32xbf16>, vector<16x32xf32> -> vector<16x32xf32>
    %c0_47 = arith.constant 0 : index
    %c0_48 = arith.constant 0 : index
    %98 = vector.load %arg14[%c0_47, %c0_48] : memref<1x32xf32, #tpu.memory_space<vmem>>, vector<1x32xf32>
    %99 = vector.broadcast %98 : vector<1x32xf32> to vector<16x32xf32>
    %100 = arith.addf %97, %99 : vector<16x32xf32>
    %101 = arith.addf %75, %100 : vector<16x32xf32>
    %c0_49 = arith.constant 0 : index
    %c0_50 = arith.constant 0 : index
    %102 = vector.load %arg15[%c0_49, %c0_50] : memref<1x32xf32, #tpu.memory_space<vmem>>, vector<1x32xf32>
    %c0_51 = arith.constant 0 : index
    %c0_52 = arith.constant 0 : index
    %103 = vector.load %arg16[%c0_51, %c0_52] : memref<1x32xf32, #tpu.memory_space<vmem>>, vector<1x32xf32>
    %cst_53 = arith.constant dense<0.000000e+00> : vector<16xf32>
    %104 = vector.multi_reduction <add>, %101, %cst_53 [1] : vector<16x32xf32> to vector<16xf32>
    %105 = vector.shape_cast %104 : vector<16xf32> to vector<16x1xf32>
    %cst_54 = arith.constant 3.200000e+01 : f32
    %106 = vector.broadcast %cst_54 : f32 to vector<16x1xf32>
    %107 = arith.divf %105, %106 : vector<16x1xf32>
    %108 = vector.broadcast %107 : vector<16x1xf32> to vector<16x32xf32>
    %109 = arith.subf %101, %108 : vector<16x32xf32>
    %110 = arith.mulf %109, %109 : vector<16x32xf32>
    %cst_55 = arith.constant dense<0.000000e+00> : vector<16xf32>
    %111 = vector.multi_reduction <add>, %110, %cst_55 [1] : vector<16x32xf32> to vector<16xf32>
    %112 = vector.shape_cast %111 : vector<16xf32> to vector<16x1xf32>
    %cst_56 = arith.constant 3.200000e+01 : f32
    %113 = vector.broadcast %cst_56 : f32 to vector<16x1xf32>
    %114 = arith.divf %112, %113 : vector<16x1xf32>
    %115 = vector.broadcast %107 : vector<16x1xf32> to vector<16x32xf32>
    %116 = arith.subf %101, %115 : vector<16x32xf32>
    %cst_57 = arith.constant 9.99999974E-6 : f32
    %117 = vector.broadcast %cst_57 : f32 to vector<16x1xf32>
    %118 = arith.addf %114, %117 : vector<16x1xf32>
    %119 = math.rsqrt %118 : vector<16x1xf32>
    %120 = vector.broadcast %119 : vector<16x1xf32> to vector<16x32xf32>
    %121 = arith.mulf %116, %120 : vector<16x32xf32>
    %122 = vector.broadcast %102 : vector<1x32xf32> to vector<16x32xf32>
    %123 = arith.mulf %121, %122 : vector<16x32xf32>
    %124 = vector.broadcast %103 : vector<1x32xf32> to vector<16x32xf32>
    %125 = arith.addf %123, %124 : vector<16x32xf32>
    %126 = vector.shape_cast %125 : vector<16x32xf32> to vector<2x8x32xf32>
    %127 = arith.truncf %126 : vector<2x8x32xf32> to vector<2x8x32xbf16>
    %128 = vector.extract_strided_slice %127 {offsets = [0, 0, 0], sizes = [1, 8, 32], strides = [1, 1, 1]} : vector<2x8x32xbf16> to vector<1x8x32xbf16>
    %129 = vector.shape_cast %128 : vector<1x8x32xbf16> to vector<8x32xbf16>
    %c0_58 = arith.constant 0 : index
    %c0_59 = arith.constant 0 : index
    %c0_60 = arith.constant 0 : index
    %130 = vector.load %arg17[%c0_58, %c0_59, %c0_60] : memref<8x2x32xbf16, #tpu.memory_space<vmem>>, vector<8x1x32xbf16>
    %131 = vector.shape_cast %130 : vector<8x1x32xbf16> to vector<8x32xbf16>
    %132 = vector.shape_cast %129 : vector<8x32xbf16> to vector<8x1x32xbf16>
    tpu.vector_store %arg17[%c0_58, %c0_59, %c0_60], %132 {strides = array<i32>} : memref<8x2x32xbf16, #tpu.memory_space<vmem>>, vector<8x1x32xbf16>,
    %133 = vector.extract_strided_slice %127 {offsets = [1, 0, 0], sizes = [1, 8, 32], strides = [1, 1, 1]} : vector<2x8x32xbf16> to vector<1x8x32xbf16>
    %134 = vector.shape_cast %133 : vector<1x8x32xbf16> to vector<8x32xbf16>
    %c0_61 = arith.constant 0 : index
    %c1 = arith.constant 1 : index
    %c0_62 = arith.constant 0 : index
    %135 = vector.load %arg17[%c0_61, %c1, %c0_62] : memref<8x2x32xbf16, #tpu.memory_space<vmem>>, vector<8x1x32xbf16>
    %136 = vector.shape_cast %135 : vector<8x1x32xbf16> to vector<8x32xbf16>
    %137 = vector.shape_cast %134 : vector<8x32xbf16> to vector<8x1x32xbf16>
    tpu.vector_store %arg17[%c0_61, %c1, %c0_62], %137 {strides = array<i32>} : memref<8x2x32xbf16, #tpu.memory_space<vmem>>, vector<8x1x32xbf16>,
    return
  }
  func.func @transform_0(%arg0: i32) -> (i32, i32, i32, i32) {
    %c0_i32 = arith.constant 0 : i32
    %c0_i32_0 = arith.constant 0 : i32
    %c0_i32_1 = arith.constant 0 : i32
    %c0_i32_2 = arith.constant 0 : i32
    return %c0_i32, %arg0, %c0_i32_0, %c0_i32_1 : i32, i32, i32, i32
  }
  func.func @transform_1(%arg0: i32) -> (i32, i32, i32) {
    %c0_i32 = arith.constant 0 : i32
    %c0_i32_0 = arith.constant 0 : i32
    %c0_i32_1 = arith.constant 0 : i32
    return %c0_i32, %arg0, %c0_i32_0 : i32, i32, i32
  }
  func.func @transform_2(%arg0: i32) -> (i32, i32) {
    %c0_i32 = arith.constant 0 : i32
    %c0_i32_0 = arith.constant 0 : i32
    %c0_i32_1 = arith.constant 0 : i32
    return %c0_i32, %c0_i32_0 : i32, i32
  }
  func.func @transform_3(%arg0: i32) -> (i32, i32) {
    %c0_i32 = arith.constant 0 : i32
    %c0_i32_0 = arith.constant 0 : i32
    %c0_i32_1 = arith.constant 0 : i32
    return %c0_i32, %c0_i32_0 : i32, i32
  }
  func.func @transform_4(%arg0: i32) -> (i32, i32) {
    %c0_i32 = arith.constant 0 : i32
    %c0_i32_0 = arith.constant 0 : i32
    %c0_i32_1 = arith.constant 0 : i32
    return %c0_i32, %c0_i32_0 : i32, i32
  }
  func.func @transform_5(%arg0: i32) -> (i32, i32) {
    %c0_i32 = arith.constant 0 : i32
    %c0_i32_0 = arith.constant 0 : i32
    %c0_i32_1 = arith.constant 0 : i32
    return %c0_i32, %c0_i32_0 : i32, i32
  }
  func.func @transform_6(%arg0: i32) -> (i32, i32) {
    %c0_i32 = arith.constant 0 : i32
    %c0_i32_0 = arith.constant 0 : i32
    %c0_i32_1 = arith.constant 0 : i32
    return %c0_i32, %c0_i32_0 : i32, i32
  }
  func.func @transform_7(%arg0: i32) -> (i32, i32) {
    %c0_i32 = arith.constant 0 : i32
    %c0_i32_0 = arith.constant 0 : i32
    %c0_i32_1 = arith.constant 0 : i32
    return %c0_i32, %c0_i32_0 : i32, i32
  }
  func.func @transform_8(%arg0: i32) -> (i32, i32) {
    %c0_i32 = arith.constant 0 : i32
    %c0_i32_0 = arith.constant 0 : i32
    %c0_i32_1 = arith.constant 0 : i32
    return %c0_i32, %c0_i32_0 : i32, i32
  }
  func.func @transform_9(%arg0: i32) -> (i32, i32) {
    %c0_i32 = arith.constant 0 : i32
    %c0_i32_0 = arith.constant 0 : i32
    %c0_i32_1 = arith.constant 0 : i32
    return %c0_i32, %c0_i32_0 : i32, i32
  }
  func.func @transform_10(%arg0: i32) -> (i32, i32) {
    %c0_i32 = arith.constant 0 : i32
    %c0_i32_0 = arith.constant 0 : i32
    %c0_i32_1 = arith.constant 0 : i32
    return %c0_i32, %c0_i32_0 : i32, i32
  }
  func.func @transform_11(%arg0: i32) -> (i32, i32) {
    %c0_i32 = arith.constant 0 : i32
    %c0_i32_0 = arith.constant 0 : i32
    %c0_i32_1 = arith.constant 0 : i32
    return %c0_i32, %c0_i32_0 : i32, i32
  }
  func.func @transform_12(%arg0: i32) -> (i32, i32) {
    %c0_i32 = arith.constant 0 : i32
    %c0_i32_0 = arith.constant 0 : i32
    %c0_i32_1 = arith.constant 0 : i32
    return %c0_i32, %c0_i32_0 : i32, i32
  }
  func.func @transform_13(%arg0: i32) -> (i32, i32) {
    %c0_i32 = arith.constant 0 : i32
    %c0_i32_0 = arith.constant 0 : i32
    %c0_i32_1 = arith.constant 0 : i32
    return %c0_i32, %c0_i32_0 : i32, i32
  }
  func.func @transform_14(%arg0: i32) -> (i32, i32) {
    %c0_i32 = arith.constant 0 : i32
    %c0_i32_0 = arith.constant 0 : i32
    %c0_i32_1 = arith.constant 0 : i32
    return %c0_i32, %c0_i32_0 : i32, i32
  }
  func.func @transform_15(%arg0: i32) -> (i32, i32) {
    %c0_i32 = arith.constant 0 : i32
    %c0_i32_0 = arith.constant 0 : i32
    %c0_i32_1 = arith.constant 0 : i32
    return %c0_i32, %c0_i32_0 : i32, i32
  }
  func.func @transform_16(%arg0: i32) -> (i32, i32, i32) {
    %c0_i32 = arith.constant 0 : i32
    %c0_i32_0 = arith.constant 0 : i32
    %c0_i32_1 = arith.constant 0 : i32
    return %arg0, %c0_i32, %c0_i32_0 : i32, i32, i32
  }
}

</mosaic_0001>

<bundles_post_ra>
// kernel: tpu_custom_call.1
= control target key start
LH: loop header
LB: loop body
LE: loop exit
PB: predicated region body
PF: predicated region fallthrough
CT: control target
= control target key end

     0   :  { %s5905_s0 = inlined_call_operand.hbm [shape: bf16[2,8,16,32], index: 0, kind: input, shape index: {}]   ;;  %s5906_s1 = inlined_call_operand.vmem [shape: f32[2,8,16], index: 1, kind: input, shape index: {}]   ;;  %s5907_s2 = inlined_call_operand.vmem [shape: bf16[32,32], index: 2, kind: input, shape index: {}]   ;;  %s5908_s3 = inlined_call_operand.vmem [shape: f32[1,32], index: 3, kind: input, shape index: {}]   ;;  %s5909_s4 = inlined_call_operand.vmem [shape: bf16[32,64], index: 4, kind: input, shape index: {}]   ;;  %s5910_s5 = inlined_call_operand.vmem [shape: f32[1,64], index: 5, kind: input, shape index: {}]   ;;  %s5911_s6 = inlined_call_operand.vmem [shape: bf16[32,32], index: 6, kind: input, shape index: {}]   ;;  %s5912_s7 = inlined_call_operand.vmem [shape: f32[1,32], index: 7, kind: input, shape index: {}]   ;;  %s5913_s8 = inlined_call_operand.vmem [shape: f32[1,32], index: 8, kind: input, shape index: {}]   ;;  %s5914_s9 = inlined_call_operand.vmem [shape: f32[1,32], index: 9, kind: input, shape index: {}]   ;;  %s5915_s10 = inlined_call_operand.vmem [shape: bf16[32,128], index: 10, kind: input, shape index: {}]   ;;  %s5916_s11 = inlined_call_operand.hbm [shape: f32[1,128], index: 11, kind: input, shape index: {}]   ;;  %s5917_s12 = inlined_call_operand.vmem [shape: bf16[128,32], index: 12, kind: input, shape index: {}]   ;;  %s5918_s13 = inlined_call_operand.vmem [shape: f32[1,32], index: 13, kind: input, shape index: {}]   ;;  %s5919_s14 = inlined_call_operand.vmem [shape: f32[1,32], index: 14, kind: input, shape index: {}]   ;;  %s5920_s15 = inlined_call_operand.vmem [shape: f32[1,32], index: 15, kind: input, shape index: {}]   ;;  %s5921_s16 = inlined_call_operand.hbm [shape: bf16[8,2,32], index: 16, kind: output, shape index: {}]  }
   0x1   :  { %5922 = sst [smem:[#allocation11_spill]] %s5905_s0 }
   0x2   :  { %21 = vsyncpa [#allocation3], 0 }
   0x3   :  { %22 = vsyncpa [#allocation6], 0 }
   0x4   :  { %23 = vsyncpa [#allocation4], 0  ;;  %s4560_s21 = smov [#allocation2]  }
   0x5   :  { %s29_s22 = sshll.u32 %s4560_s21, 4  ;;  %s30_s22 = int_to_ptr.vmem [resolvable:$true] %s29_s22 }
   0x6   :  { %s4502_s23 = scalar_lea.vmem %s30_s22, 2048  ;;  %p4507_p1 = scmp.lt.s32.totalorder %s30_s22, %s30_s22 }
   0x7   :  { %p4503_p0 = scmp.ne.s32.totalorder %s30_s22, %s4502_s23  ;;  %p4508_p2 = scmp.lt.s32.totalorder %s4502_s23, %s4502_s23 }
   0x9   :  { %p4509_p3 = por %p4508_p2, %p4507_p1 }
   0xb   :  { %p4510_p4 = pnand %p4509_p3, %p4503_p0 }
   0xd   :  { %4513 = shalt.err (!%p4510_p4)
}
   0xe   :  { %s4561_s24 = smov 64   ;;  %s4562_s25 = smov 4  }
   0xf   :  { %s5923_s28 = sld [smem:[#allocation11_spill]]  ;;  %s4563_s29 = smov [#allocation5]  }
  0x10   :  { %s62_s30 = sshll.u32 %s4563_s29, 4  ;;  %s63_s30 = int_to_ptr.vmem [resolvable:$true] %s62_s30 }
  0x11   :  { %s4522_s0 = scalar_lea.vmem %s63_s30, 16  ;;  %s4526_s17 = scalar_lea.vmem %s63_s30, 32 }
  0x12   :  { %p4523_p5 = scmp.ne.s32.totalorder %s63_s30, %s4522_s0  ;;  %p4527_p6 = scmp.lt.s32.totalorder %s63_s30, %s63_s30 }
  0x13   :  { %p4528_p7 = scmp.lt.s32.totalorder %s4526_s17, %s4522_s0 }
  0x15   :  { %35 = dma.hbm_to_vmem [thread:$0]  %s5923_s28, 2048, %s30_s22, [#allocation3], %s4561_s24, %s4561_s24, %s4562_s25  }
  0x16   :  { %p4529_p8 = por %p4528_p7, %p4527_p6 }
  0x18   :  { %p4530_p9 = pnand %p4529_p8, %p4523_p5 }
  0x1a   :  { %4533 = shalt.err (!%p4530_p9)
}
  0x1b   :  { %65 = dma.hbm_to_vmem [thread:$0]  %s5916_s11, 16, %s63_s30, [#allocation6]  }
  0x1c   :  { %4554 = dma.done.wait [#allocation3], 2048  }
  0x1d   :  { %4555 = vsyncadd [#allocation3], 4294965248 }
  0x1e   :  { %4556 = dma.done.wait [#allocation6], 16  }
  0x1f   :  { %4557 = vsyncadd [#allocation6], 4294967280  ;;  %v4564_v0 = vmov 0.0   ;;  %vm4565_vm0 = vmmov 0   ;;  %v4354_v1 = vld [vmem:[%s5909_s4 + $0x8] sm:$0xff]   ;;  %v4355_v2 = vld [vmem:[%s5909_s4] sm:$0xff]  }
  0x20   :  { %4115 = vmatprep.subr.bf16.mxu1 %v4564_v0  ;;  %4117 = vmatprep.mubr.msk.bf16.mxu1 %vm4565_vm0, %v4564_v0  ;;  %vm216_vm1 = vcmask 261120   ;;  %v4671_v3 = vld [vmem:[#allocation2] sm:$0xf]  ;;  %v82_v4 = vld [vmem:[#allocation2 + $0x4] sm:$0xf]  ;;  %v4360_v11 = vld [vmem:[%s5907_s2 + $0x8] sm:$0xff]  }
  0x21   :  { %4071 = vmatprep.subr.bf16.mxu0 %v4354_v1  ;;  %v83_v5 = vld [vmem:[#allocation2 + $0x8] sm:$0xf]  ;;  %v3855_v6 = vcombine.low %v4671_v3, %v82_v4  ;;  %v84_v7 = vld [vmem:[#allocation2 + $0xc] sm:$0xf]  ;;  %v85_v8 = vld [vmem:[#allocation2 + $0x10] sm:$0xf]  ;;  %v3890_v41 = vcombine.low %v4671_v3, %v4671_v3 }
  0x22   :  { %4072 = vmatpush3.bf16.msra.mxu0 %v4354_v1  ;;  %v86_v9 = vld [vmem:[#allocation2 + $0x14] sm:$0xf]  ;;  %v3856_v10 = vcombine.low %v83_v5, %v84_v7  ;;  %v87_v13 = vld [vmem:[#allocation2 + $0x18] sm:$0xf]  ;;  %v88_v14 = vld [vmem:[#allocation2 + $0x1c] sm:$0xf]  ;;  %v3891_v34 = vcombine.low %v83_v5, %v83_v5  ;;  %v3892_v39 = vcombine.low %v85_v8, %v85_v8 }
  0x23   :  { %4073 = vmatprep.subr.bf16.mxu0 %v4355_v2  ;;  %4075 = vmatprep.mubr.msk.bf16.mxu0 %vm216_vm1, %v3855_v6  ;;  %v3857_v12 = vcombine.low %v85_v8, %v86_v9  ;;  %v4377_v15 = vld [vmem:[%s5907_s2] sm:$0xff]   ;;  %v3858_v18 = vcombine.low %v87_v13, %v88_v14  ;;  %v4689_v20 = vld [vmem:[#allocation2 + $0x28] sm:$0xf]  ;;  %v92_v21 = vld [vmem:[#allocation2 + $0x2c] sm:$0xf]  ;;  %v3893_v46 = vcombine.low %v87_v13, %v87_v13  ;;  %v469_v51 = vunpack.c.l.b16 %v3890_v41 }
  0x24   :  { %v4684_v16 = vld [vmem:[#allocation2 + $0x20] sm:$0xf]  ;;  %v90_v17 = vld [vmem:[#allocation2 + $0x24] sm:$0xf]  ;;  %v4693_v22 = vld [vmem:[#allocation2 + $0x30] sm:$0xf]  ;;  %v3860_v24 = vcombine.low %v4689_v20, %v92_v21  ;;  %v470_v42 = vunpack.c.l.b16 %v3891_v34  ;;  %v471_v48 = vunpack.c.l.b16 %v3892_v39  ;;  %v3895_v5 = vcombine.low %v4689_v20, %v4689_v20 }
  0x25   :  { %v3859_v19 = vcombine.low %v4684_v16, %v90_v17  ;;  %v94_v23 = vld [vmem:[#allocation2 + $0x34] sm:$0xf]  ;;  %v4699_v26 = vld [vmem:[#allocation2 + $0x38] sm:$0xf]  ;;  %v96_v27 = vld [vmem:[#allocation2 + $0x3c] sm:$0xf]  ;;  %v472_v58 = vunpack.c.l.b16 %v3893_v46  ;;  %v3894_v59 = vcombine.low %v4684_v16, %v4684_v16 }
  0x26   :  { %4074 = vmatpush3.bf16.msra.mxu0 %v4355_v2  ;;  %v3861_v25 = vcombine.low %v4693_v22, %v94_v23  ;;  %v97_v28 = vld [vmem:[#allocation2 + $0x40] sm:$0xf]  ;;  %v98_v29 = vld [vmem:[#allocation2 + $0x44] sm:$0xf]  ;;  %v3862_v30 = vcombine.low %v4699_v26, %v96_v27  ;;  %v99_v32 = vld [vmem:[#allocation2 + $0x48] sm:$0xf]  ;;  %v474_v20 = vunpack.c.l.b16 %v3895_v5 }
  0x27   :  { %4107 = vmatprep.subr.bf16.mxu0 %v4564_v0  ;;  %v3863_v31 = vcombine.low %v97_v28, %v98_v29  ;;  %v100_v33 = vld [vmem:[#allocation2 + $0x4c] sm:$0xf]  ;;  %v101_v35 = vld [vmem:[#allocation2 + $0x50] sm:$0xf]  ;;  %v102_v36 = vld [vmem:[#allocation2 + $0x54] sm:$0xf]  ;;  %v3899_v37 = vcombine.low %v99_v32, %v99_v32  ;;  %v3898_v44 = vcombine.low %v97_v28, %v97_v28  ;;  %v3897_v28 = vcombine.low %v4699_v26, %v4699_v26 }
  0x28   :  { %v3864_v38 = vcombine.low %v99_v32, %v100_v33  ;;  %v3865_v40 = vcombine.low %v101_v35, %v102_v36  ;;  %v3900_v43 = vcombine.low %v101_v35, %v101_v35  ;;  %v103_v47 = vld [vmem:[#allocation2 + $0x58] sm:$0xf]  ;;  %v104_v49 = vld [vmem:[#allocation2 + $0x5c] sm:$0xf]  ;;  %v485_v52 = vrot.slane %v470_v42, 7 }
  0x29   :  { %4076 = vmatmul.mubr.msk.bf16.vlgmr.msra.gmra.mxu0 %vm216_vm1, %v3856_v10  ;;  %v478_v45 = vunpack.c.l.b16 %v3899_v37  ;;  %v3901_v50 = vcombine.low %v103_v47, %v103_v47  ;;  %v105_v54 = vld [vmem:[#allocation2 + $0x60] sm:$0xf]  ;;  %v106_v55 = vld [vmem:[#allocation2 + $0x64] sm:$0xf]  ;;  %vm486_vm2 = vcmask 1041409   ;;  %v477_v56 = vunpack.c.l.b16 %v3898_v44 }
  0x2a   :  { %4108 = vmatpush3.bf16.msra.mxu0 %v4360_v11  ;;  %4079 = vmatprep.mubr.msk.bf16.mxu0 %vm216_vm1, %v3857_v12  ;;  %v479_v53 = vunpack.c.l.b16 %v3900_v43  ;;  %v3866_v60 = vcombine.low %v103_v47, %v104_v49  ;;  %v3902_v61 = vcombine.low %v105_v54, %v105_v54  ;;  %v488_v62 = vrot.slane %v471_v48, 6  ;;  %v107_v4 = vld [vmem:[#allocation2 + $0x68] sm:$0xf]  ;;  %v109_v8 = vld [vmem:[#allocation2 + $0x70] sm:$0xf] }
  0x2b   :  { %4109 = vmatprep.subr.bf16.mxu0 %v4564_v0  ;;  %v506_v57 = vrot.slane %v478_v45, 7  ;;  %v480_v63 = vunpack.c.l.b16 %v3901_v50  ;;  %v3867_v1 = vcombine.low %v105_v54, %v106_v55  ;;  %v487_v2 = vsel %vm486_vm2, %v485_v52, %v469_v51  ;;  %v108_v14 = vld [vmem:[#allocation2 + $0x6c] sm:$0xf]  ;;  %v110_v17 = vld [vmem:[#allocation2 + $0x74] sm:$0xf] }
  0x2c   :  { %vm489_vm3 = vcmask 1042434   ;;  %v508_v3 = vrot.slane %v479_v53, 6  ;;  %v3903_v7 = vcombine.low %v107_v4, %v107_v4  ;;  %v491_v9 = vrot.slane %v472_v58, 5  ;;  %v4743_v51 = vld [vmem:[%s5910_s5] ss:$0 sm:$0xff] }
  0x2d   :  { %v507_v6 = vsel %vm486_vm2, %v506_v57, %v477_v56  ;;  %v473_v10 = vunpack.c.l.b16 %v3894_v59  ;;  %v481_v11 = vunpack.c.l.b16 %v3902_v61  ;;  %v490_v12 = vsel %vm489_vm3, %v488_v62, %v487_v2 }
  0x2e   :  { %4110 = vmatpush3.bf16.msra.mxu0 %v4377_v15  ;;  %vm492_vm4 = vcmask 1043459   ;;  %v510_v13 = vrot.slane %v480_v63, 5  ;;  %v3896_v15 = vcombine.low %v4693_v22, %v4693_v22  ;;  %v509_v16 = vsel %vm489_vm3, %v508_v3, %v507_v6 }
  0x2f   :  { %4157 = vmatprep.subr.bf16.mxu0 %v4564_v0  ;;  %vm495_vm5 = vcmask 1044484   ;;  %v482_v21 = vunpack.c.l.b16 %v3903_v7  ;;  %v493_v23 = vsel %vm492_vm4, %v491_v9, %v490_v12  ;;  %v3868_v27 = vcombine.low %v107_v4, %v108_v14 }
  0x30   :  { %v511_v29 = vsel %vm492_vm4, %v510_v13, %v509_v16  ;;  %v497_v33 = vrot.slane %v474_v20, 3  ;;  %vm498_vm6 = vcmask 1045509   ;;  %v476_v37 = vunpack.c.l.b16 %v3897_v28 }
  0x31   :  { %4080 = vmatmul.mubr.msk.bf16.gmra.mxu0 %vm216_vm1, %v3858_v18  ;;  %v3904_v18 = vcombine.low %v109_v8, %v109_v8  ;;  %v514_v34 = vrot.slane %v482_v21, 3  ;;  %vm501_vm7 = vcmask 1046534   ;;  %vm504_vm8 = vcmask 1047559  }
  0x32   :  { %4083 = vmatprep.mubr.msk.bf16.mxu0 %vm216_vm1, %v3859_v19  ;;  %v111_v19 = vld [vmem:[#allocation2 + $0x78] sm:$0xf]  ;;  %v503_v44 = vrot.slane %v476_v37, 1  ;;  %vm1572_vm9 = vcmask 130048   ;;  %vm3631_vm10 = vcmask 253952  }
  0x33   :  { %v3905_v22 = vcombine.low %v111_v19, %v111_v19  ;;  %v483_v32 = vunpack.c.l.b16 %v3904_v18  ;;  %vm3632_vm11 = vsmask.f32 256  ;;  %vm3810_vm12 = vsmask.f32 7938 }
  0x34   :  { %vm5835_vm13 = vmand %vm3631_vm10, %vm3632_vm11 }
  0x35   :  { %v484_v26 = vunpack.c.l.b16 %v3905_v22  ;;  %vm5882_vm14 = vmand %vm3631_vm10, %vm3810_vm12 }
  0x37   :  { %v518_v45 = vrot.slane %v484_v26, 1 }
  0x39   :  { %4084 = vmatmul.mubr.msk.bf16.gmra.mxu0 %vm216_vm1, %v3860_v24  ;;  %v494_v24 = vrot.slane %v473_v10, 4 }
  0x3a   :  { %4087 = vmatprep.mubr.msk.bf16.mxu0 %vm216_vm1, %v3861_v25  ;;  %v512_v25 = vrot.slane %v481_v11, 4 }
  0x3b   :  { %v496_v35 = vsel %vm495_vm5, %v494_v24, %v493_v23 }
  0x3c   :  { %v513_v36 = vsel %vm495_vm5, %v512_v25, %v511_v29  ;;  %v499_v41 = vsel %vm498_vm6, %v497_v33, %v496_v35 }
  0x3d   :  { %v515_v42 = vsel %vm498_vm6, %v514_v34, %v513_v36 }
  0x41   :  { %4088 = vmatmul.mubr.msk.bf16.gmra.mxu0 %vm216_vm1, %v3862_v30  ;;  %v3869_v30 = vcombine.low %v109_v8, %v110_v17 }
  0x42   :  { %4091 = vmatprep.mubr.msk.bf16.mxu0 %vm216_vm1, %v3863_v31  ;;  %v475_v31 = vunpack.c.l.b16 %v3896_v15 }
  0x44   :  { %v500_v39 = vrot.slane %v475_v31, 2 }
  0x46   :  { %v502_v46 = vsel %vm501_vm7, %v500_v39, %v499_v41 }
  0x47   :  { %v505_v48 = vsel %vm504_vm8, %v503_v44, %v502_v46 }
  0x49   :  { %4092 = vmatmul.mubr.msk.bf16.gmra.mxu0 %vm216_vm1, %v3864_v38  ;;  %v112_v38 = vld [vmem:[#allocation2 + $0x7c] sm:$0xf] }
  0x4a   :  { %4095 = vmatprep.mubr.msk.bf16.mxu0 %vm216_vm1, %v3865_v40  ;;  %v516_v40 = vrot.slane %v483_v32, 2  ;;  %v3870_v43 = vcombine.low %v111_v19, %v112_v38 }
  0x4c   :  { %v517_v47 = vsel %vm501_vm7, %v516_v40, %v515_v42 }
  0x4d   :  { %v519_v49 = vsel %vm504_vm8, %v518_v45, %v517_v47 }
  0x4e   :  { %v520_v50 = vpack.c.b16 %v519_v49, %v505_v48 }
  0x51   :  { %4096 = vmatmul.mubr.msk.bf16.gmra.mxu0 %vm216_vm1, %v3866_v60 }
  0x52   :  { %4099 = vmatprep.mubr.msk.bf16.mxu0 %vm216_vm1, %v3867_v1 }
  0x59   :  { %4100 = vmatmul.mubr.msk.bf16.gmra.mxu0 %vm216_vm1, %v3868_v27 }
  0x5a   :  { %4103 = vmatprep.mubr.msk.bf16.mxu0 %vm216_vm1, %v3869_v30 }
  0x61   :  { %4104 = vmatmul.mubr.msk.bf16.gmra.mxu0 %vm216_vm1, %v3870_v43 }
  0x62   :  { %4111 = vmatprep.mubr.msk.bf16.mxu0 %vm4565_vm0, %v4564_v0 }
  0x69   :  { %4112 = vmatmul.mubr.msk.bf16.vlgmr.msra.gmra.mxu0 %vm216_vm1, %v520_v50 }
  0x6a   :  { %4159 = vmatprep.mubr.msk.bf16.mxu0 %vm4565_vm0, %v4564_v0 }
  0xe9   :  { %v4077_v52 = vpop.f32.mrf.mxu0 }
  0xea   :  { %v308_v53 = vadd.f32 %v4077_v52, %v4743_v51 }
  0xeb   :  { %v299_v54 = vpop.f32.mrf.mxu0 }
  0xec   :  { %v300_v58 = vadd.f32 %v4743_v51, %v299_v54 }
  0xed   :  { %v4078_v55 = vpop.f32.mrf.mxu0 }
  0xee   :  { %v311_v56 = vadd.f32 %v4078_v55, %v4743_v51 }
  0xef   :  { %v302_v57 = vpop.f32.mrf.mxu0 }
  0xf0   :  { %v4748_v59 = vpack.c.bf16 %v311_v56, %v308_v53  ;;  %v303_v60 = vadd.f32 %v4743_v51, %v302_v57  ;;  %v4566_v57 = vmov 1966171168  }
  0xf1   :  { %v4081_v61 = vpop.f32.mrf.mxu0 }
  0xf2   :  { %v324_v62 = vadd.f32 %v4081_v61, %v4743_v51  ;;  %v4752_v63 = vpack.c.bf16 %v303_v60, %v300_v58  ;;  %v581_v58 = vunpack.c.l.s4 %v4566_v57  ;;  %v583_v60 = vlaneseq }
  0xf3   :  { %v315_v1 = vpop.f32.mrf.mxu0 }
  0xf4   :  { %v316_v2 = vadd.f32 %v4743_v51, %v315_v1  ;;  %v653_v3 = vsel %vm216_vm1, %v4752_v63, 0 }
  0xf5   :  { %v4082_v4 = vpop.f32.mrf.mxu0  ;;  %4116 = vmatpush3.bf16.xpose.msra.mxu1 %v653_v3  ;;  %v582_v3 = vunpack.c.0.s8 %v581_v58 }
  0xf6   :  { %v327_v5 = vadd.f32 %v4082_v4, %v4743_v51  ;;  %4121 = vmatprep.subr.bf16.mxu1 %v4564_v0  ;;  %v584_v4 = vshrl.u32 %v583_v60, 7 }
  0xf7   :  { %v318_v6 = vpop.f32.mrf.mxu0 }
  0xf8   :  { %v4759_v7 = vpack.c.bf16 %v327_v5, %v324_v62  ;;  %v319_v8 = vadd.f32 %v4743_v51, %v318_v6  ;;  %v3889_v5 = vld [vmem:[%s5908_s3] ss:$0 sm:$0xff] }
  0xf9   :  { %v4085_v9 = vpop.f32.mrf.mxu0 }
  0xfa   :  { %v4762_v10 = vpack.c.bf16 %v319_v8, %v316_v2  ;;  %v340_v11 = vadd.f32 %v4085_v9, %v4743_v51 }
  0xfb   :  { %v331_v12 = vpop.f32.mrf.mxu0 }
  0xfc   :  { %v332_v13 = vadd.f32 %v4743_v51, %v331_v12  ;;  %v4812_v12 = vsub.s32 %v582_v3, %v584_v4  ;;  %v755_v57 = vsel %vm216_vm1, %v4762_v10, 0 }
  0xfd   :  { %v4086_v14 = vpop.f32.mrf.mxu0 }
  0xfe   :  { %v343_v15 = vadd.f32 %v4086_v14, %v4743_v51 }
  0xff   :  { %v334_v16 = vpop.f32.mrf.mxu0 }
 0x100   :  { %v4767_v17 = vpack.c.bf16 %v343_v15, %v340_v11  ;;  %v335_v18 = vadd.f32 %v4743_v51, %v334_v16 }
 0x101   :  { %v4089_v19 = vpop.f32.mrf.mxu0 }
 0x102   :  { %v4770_v20 = vpack.c.bf16 %v335_v18, %v332_v13  ;;  %v356_v25 = vadd.f32 %v4089_v19, %v4743_v51 }
 0x103   :  { %v347_v21 = vpop.f32.mrf.mxu0 }
 0x104   :  { %v348_v23 = vadd.f32 %v4743_v51, %v347_v21 }
 0x105   :  { %v4090_v24 = vpop.f32.mrf.mxu0 }
 0x106   :  { %v359_v27 = vadd.f32 %v4090_v24, %v4743_v51 }
 0x107   :  { %v350_v28 = vpop.f32.mrf.mxu0 }
 0x108   :  { %v4775_v29 = vpack.c.bf16 %v359_v27, %v356_v25  ;;  %v351_v30 = vadd.f32 %v4743_v51, %v350_v28  ;;  %v4824_v27 = vsub.s32 0, %v584_v4 }
 0x109   :  { %v4093_v22 = vpop.f32.mrf.mxu0 }
 0x10a   :  { %v4778_v31 = vpack.c.bf16 %v351_v30, %v348_v23  ;;  %v1010_v32 = vsel %vm216_vm1, %v4775_v29, 0  ;;  %v372_v30 = vadd.f32 %v4093_v22, %v4743_v51 }
 0x10b   :  { %v363_v33 = vpop.f32.mrf.mxu0  ;;  %4158 = vmatpush3.bf16.xpose.msra.mxu0 %v1010_v32 }
 0x10c   :  { %v364_v34 = vadd.f32 %v4743_v51, %v363_v33  ;;  %4169 = vmatprep.subr.bf16.mxu0 %v4564_v0 }
 0x10d   :  { %v4094_v35 = vpop.f32.mrf.mxu0 }
 0x10e   :  { %v375_v28 = vadd.f32 %v4094_v35, %v4743_v51 }
 0x10f   :  { %v366_v36 = vpop.f32.mrf.mxu0 }
 0x110   :  { %v367_v37 = vadd.f32 %v4743_v51, %v366_v36 }
 0x111   :  { %v4785_v38 = vpop.f32.mrf.mxu0 }
 0x112   :  { %v4787_v26 = vpack.c.bf16 %v367_v37, %v364_v34  ;;  %v4834_v37 = vpack.c.bf16 %v375_v28, %v372_v30 }
 0x113   :  { %v379_v39 = vpop.f32.mrf.mxu0 }
 0x114   :  { %v380_v40 = vadd.f32 %v4743_v51, %v379_v39  ;;  %v704_v39 = vsel %vm216_vm1, %v4748_v59, 0 }
 0x115   :  { %v4098_v41 = vpop.f32.mrf.mxu0 }
 0x117   :  { %v382_v42 = vpop.f32.mrf.mxu0 }
 0x118   :  { %v383_v43 = vadd.f32 %v4743_v51, %v382_v42 }
 0x119   :  { %v4791_v44 = vpop.f32.mrf.mxu0 }
 0x11a   :  { %v4793_v45 = vpack.c.bf16 %v383_v43, %v380_v40 }
 0x11b   :  { %v395_v46 = vpop.f32.mrf.mxu0 }
 0x11c   :  { %v396_v47 = vadd.f32 %v4743_v51, %v395_v46  ;;  %v391_v46 = vadd.f32 %v4098_v41, %v4743_v51 }
 0x11d   :  { %v4796_v48 = vpop.f32.mrf.mxu0 }
 0x11f   :  { %v398_v49 = vpop.f32.mrf.mxu0 }
 0x120   :  { %v399_v50 = vadd.f32 %v4743_v51, %v398_v49  ;;  %v388_v49 = vadd.f32 %v4785_v38, %v4743_v51 }
 0x121   :  { %v4799_v52 = vpop.f32.mrf.mxu0 }
 0x122   :  { %v4801_v53 = vpack.c.bf16 %v399_v50, %v396_v47  ;;  %v1112_v47 = vsel %vm216_vm1, %v4834_v37, 0  ;;  %v4857_v41 = vpack.c.bf16 %v391_v46, %v388_v49  ;;  %v1061_v46 = vsel %vm216_vm1, %v4787_v26, 0 }
 0x123   :  { %v411_v54 = vpop.f32.mrf.mxu0 }
 0x124   :  { %v412_v55 = vadd.f32 %v4743_v51, %v411_v54 }
 0x125   :  { %v4804_v56 = vpop.f32.mrf.mxu0 }
 0x127   :  { %v414_v61 = vpop.f32.mrf.mxu0 }
 0x128   :  { %v415_v62 = vadd.f32 %v4743_v51, %v414_v61  ;;  %v407_v61 = vadd.f32 %v4796_v48, %v4743_v51 }
 0x129   :  { %v570_v1 = vpop.f32.mrf.mxu0 }
 0x12a   :  { %v4807_v2 = vpack.c.bf16 %v415_v62, %v412_v55  ;;  %v571_v9 = vadd.f32 %v3889_v5, %v570_v1  ;;  %v1214_v62 = vsel %vm216_vm1, %v4857_v41, 0  ;;  %v404_v1 = vadd.f32 %v4791_v44, %v4743_v51 }
 0x12b   :  { %v4113_v6 = vpop.f32.mrf.mxu0  ;;  %v806_v44 = vsel %vm216_vm1, %v4759_v7, 0 }
 0x12c   :  { %v4882_v6 = vpack.c.bf16 %v407_v61, %v404_v1 }
 0x12d   :  { %v573_v8 = vpop.f32.mrf.mxu0 }
 0x12e   :  { %v574_v11 = vadd.f32 %v3889_v5, %v573_v8 }
 0x12f   :  { %v4114_v13 = vpop.f32.mrf.mxu0 }
 0x130   :  { %v577_v14 = vpack.c.bf16 %v574_v11, %v571_v9  ;;  %v3909_v16 = vpack.c.bf16 %v574_v11, %v574_v11  ;;  %v423_v13 = vadd.f32 %v4804_v56, %v4743_v51 }
 0x132   :  { %v586_v15 = vrot.slane %v577_v14, %v4812_v12  ;;  %v593_v23 = vrot.slane %v3909_v16, %v4812_v12  ;;  %v1316_v14 = vsel %vm216_vm1, %v4882_v6, 0 }
 0x134   :  { %v594_v18 = vcombine.high %v586_v15, %v586_v15  ;;  %v4816_v19 = vrot.slane %v586_v15, %v4812_v12  ;;  %v4829_v32 = vrot.slane %v593_v23, %v4812_v12  ;;  %v595_v22 = vcombine.high %v593_v23, %v593_v23 }
 0x135   :  { %v420_v15 = vadd.f32 %v4799_v52, %v4743_v51  ;;  %v857_v51 = vsel %vm216_vm1, %v4770_v20, 0 }
 0x136   :  { %v616_v21 = vrot.slane %v594_v18, %v4812_v12  ;;  %v3910_v25 = vpack.i.b16 %v4816_v19, %v4816_v19  ;;  %v629_v33 = vunpack.i.h.s16 %v4816_v19  ;;  %v637_v35 = vunpack.i.h.s16 %v4829_v32 }
 0x137   :  { %v4853_v50 = vrot.slane %v595_v22, %v4812_v12  ;;  %v4878_v3 = vcombine.high %v4829_v32, %v4829_v32  ;;  %v624_v16 = vcombine.high %v4816_v19, %v4816_v19  ;;  %v4909_v23 = vpack.c.bf16 %v423_v13, %v420_v15 }
 0x138   :  { %v4820_v24 = vcombine.high %v616_v21, %v616_v21  ;;  %v648_v34 = vrot.slane %v3910_v25, %v4824_v27  ;;  %v695_v42 = vpack.i.b16 %v629_v33, %v629_v33  ;;  %v1103_v54 = vpack.i.b16 %v637_v35, %v637_v35 }
 0x139   :  { %v639_v38 = vunpack.i.h.s16 %v4853_v50  ;;  %v3913_v58 = vpack.i.b16 %v616_v21, %v616_v21  ;;  %v631_v4 = vunpack.i.h.s16 %v616_v21  ;;  %v641_v8 = vunpack.i.h.s16 %v4878_v3 }
 0x13a   :  { %v635_v36 = vunpack.i.h.s16 %v4820_v24  ;;  %4118 = vmatmul.mubr.msk.bf16.vlgmr.msra.gmra.mxu1 %vm216_vm1, %v648_v34  ;;  %v699_v55 = vrot.slane %v695_v42, %v4824_v27  ;;  %v1107_v60 = vrot.slane %v1103_v54, %v4824_v27  ;;  %v4905_v18 = vcombine.high %v4853_v50, %v4853_v50 }
 0x13b   :  { %4122 = vmatpush3.bf16.xpose.msra.mxu1 %v704_v39  ;;  %4123 = vmatprep.mubr.msk.bf16.mxu1 %vm4565_vm0, %v4564_v0  ;;  %v1205_v5 = vpack.i.b16 %v639_v38, %v639_v38  ;;  %v750_v48 = vrot.slane %v3913_v58, %v4824_v27  ;;  %v797_v9 = vpack.i.b16 %v631_v4, %v631_v4  ;;  %v1418_v28 = vsel %vm216_vm1, %v4909_v23, 0 }
 0x13c   :  { %v1001_v40 = vpack.i.b16 %v635_v36, %v635_v36  ;;  %4127 = vmatprep.subr.bf16.mxu1 %v4564_v0  ;;  %v1307_v56 = vpack.i.b16 %v641_v8, %v641_v8  ;;  %v3916_v52 = vpack.i.b16 %v624_v16, %v624_v16  ;;  %v643_v25 = vunpack.i.h.s16 %v4905_v18 }
 0x13d   :  { %v1209_v11 = vrot.slane %v1205_v5, %v4824_v27  ;;  %v801_v21 = vrot.slane %v797_v9, %v4824_v27  ;;  %v633_v30 = vunpack.i.h.s16 %v624_v16  ;;  %v908_v36 = vsel %vm216_vm1, %v4767_v17, 0 }
 0x13e   :  { %v1005_v43 = vrot.slane %v1001_v40, %v4824_v27  ;;  %v1311_v19 = vrot.slane %v1307_v56, %v4824_v27  ;;  %v852_v33 = vrot.slane %v3916_v52, %v4824_v27  ;;  %v1409_v34 = vpack.i.b16 %v643_v25, %v643_v25 }
 0x13f   :  { %v899_v39 = vpack.i.b16 %v633_v30, %v633_v30  ;;  %v959_v35 = vsel %vm216_vm1, %v4778_v31, 0  ;;  %v3919_v42 = vpack.i.b16 %v4820_v24, %v4820_v24  ;;  %v1163_v24 = vsel %vm216_vm1, %v4793_v45, 0 }
 0x140   :  { %4160 = vmatmul.mubr.msk.bf16.vlgmr.msra.gmra.mxu0 %vm216_vm1, %v1005_v43  ;;  %v1413_v40 = vrot.slane %v1409_v34, %v4824_v27  ;;  %v3925_v54 = vpack.i.b16 %v4853_v50, %v4853_v50  ;;  %v1367_v38 = vsel %vm216_vm1, %v4807_v2, 0  ;;  %v3931_v58 = vpack.i.b16 %v4905_v18, %v4905_v18 }
 0x141   :  { %4170 = vmatpush3.bf16.xpose.msra.mxu0 %v1112_v47  ;;  %4171 = vmatprep.mubr.msk.bf16.mxu0 %vm4565_vm0, %v4564_v0  ;;  %v903_v22 = vrot.slane %v899_v39, %v4824_v27  ;;  %v954_v43 = vrot.slane %v3919_v42, %v4824_v27  ;;  %v3922_v47 = vpack.i.b16 %v4829_v32, %v4829_v32 }
 0x142   :  { %4181 = vmatprep.subr.bf16.mxu0 %v4564_v0  ;;  %4124 = vmatmul.mubr.msk.bf16.vlgmr.msra.gmra.mxu1 %vm216_vm1, %v699_v55  ;;  %v1158_v32 = vrot.slane %v3925_v54, %v4824_v27  ;;  %v1265_v55 = vsel %vm216_vm1, %v4801_v53, 0 }
 0x143   :  { %4128 = vmatpush3.bf16.xpose.msra.mxu1 %v755_v57  ;;  %4129 = vmatprep.mubr.msk.bf16.mxu1 %vm4565_vm0, %v4564_v0  ;;  %v1056_v49 = vrot.slane %v3922_v47, %v4824_v27  ;;  %v3928_v57 = vpack.i.b16 %v4878_v3, %v4878_v3 }
 0x144   :  { %4133 = vmatprep.subr.bf16.mxu1 %v4564_v0 }
 0x145   :  { %v1260_v50 = vrot.slane %v3928_v57, %v4824_v27 }
 0x148   :  { %4172 = vmatmul.mubr.msk.bf16.vlgmr.msra.gmra.mxu0 %vm216_vm1, %v1107_v60  ;;  %v1362_v60 = vrot.slane %v3931_v58, %v4824_v27 }
 0x149   :  { %4182 = vmatpush3.bf16.xpose.msra.mxu0 %v1214_v62  ;;  %4183 = vmatprep.mubr.msk.bf16.mxu0 %vm4565_vm0, %v4564_v0 }
 0x14a   :  { %4193 = vmatprep.subr.bf16.mxu0 %v4564_v0  ;;  %4130 = vmatmul.mubr.msk.bf16.vlgmr.msra.gmra.mxu1 %vm216_vm1, %v750_v48 }
 0x14b   :  { %4134 = vmatpush3.bf16.xpose.msra.mxu1 %v806_v44  ;;  %4135 = vmatprep.mubr.msk.bf16.mxu1 %vm4565_vm0, %v4564_v0 }
 0x14c   :  { %4139 = vmatprep.subr.bf16.mxu1 %v4564_v0 }
 0x150   :  { %4184 = vmatmul.mubr.msk.bf16.vlgmr.msra.gmra.mxu0 %vm216_vm1, %v1209_v11 }
 0x151   :  { %4194 = vmatpush3.bf16.xpose.msra.mxu0 %v1316_v14  ;;  %4195 = vmatprep.mubr.msk.bf16.mxu0 %vm4565_vm0, %v4564_v0 }
 0x152   :  { %4205 = vmatprep.subr.bf16.mxu0 %v4564_v0  ;;  %4136 = vmatmul.mubr.msk.bf16.vlgmr.msra.gmra.mxu1 %vm216_vm1, %v801_v21 }
 0x153   :  { %4140 = vmatpush3.bf16.xpose.msra.mxu1 %v857_v51  ;;  %4141 = vmatprep.mubr.msk.bf16.mxu1 %vm4565_vm0, %v4564_v0 }
 0x154   :  { %4145 = vmatprep.subr.bf16.mxu1 %v4564_v0 }
 0x158   :  { %4196 = vmatmul.mubr.msk.bf16.vlgmr.msra.gmra.mxu0 %vm216_vm1, %v1311_v19 }
 0x159   :  { %4206 = vmatpush3.bf16.xpose.msra.mxu0 %v1418_v28  ;;  %4207 = vmatprep.mubr.msk.bf16.mxu0 %vm4565_vm0, %v4564_v0 }
 0x15a   :  { %4217 = vmatprep.subr.bf16.mxu0 %v4564_v0  ;;  %4142 = vmatmul.mubr.msk.bf16.vlgmr.msra.gmra.mxu1 %vm216_vm1, %v852_v33 }
 0x15b   :  { %4146 = vmatpush3.bf16.xpose.msra.mxu1 %v908_v36  ;;  %4147 = vmatprep.mubr.msk.bf16.mxu1 %vm4565_vm0, %v4564_v0 }
 0x15c   :  { %4151 = vmatprep.subr.bf16.mxu1 %v4564_v0 }
 0x160   :  { %4208 = vmatmul.mubr.msk.bf16.vlgmr.msra.gmra.mxu0 %vm216_vm1, %v1413_v40 }
 0x161   :  { %4219 = vmatprep.mubr.msk.bf16.mxu0 %vm4565_vm0, %v4564_v0 }
 0x162   :  { %4148 = vmatmul.mubr.msk.bf16.vlgmr.msra.gmra.mxu1 %vm216_vm1, %v903_v22 }
 0x163   :  { %4152 = vmatpush3.bf16.xpose.msra.mxu1 %v959_v35  ;;  %4153 = vmatprep.mubr.msk.bf16.mxu1 %vm4565_vm0, %v4564_v0 }
 0x164   :  { %4163 = vmatprep.subr.bf16.mxu1 %v4564_v0 }
 0x16a   :  { %4154 = vmatmul.mubr.msk.bf16.vlgmr.msra.gmra.mxu1 %vm216_vm1, %v954_v43 }
 0x16b   :  { %4164 = vmatpush3.bf16.xpose.msra.mxu1 %v1061_v46  ;;  %4165 = vmatprep.mubr.msk.bf16.mxu1 %vm4565_vm0, %v4564_v0 }
 0x16c   :  { %4175 = vmatprep.subr.bf16.mxu1 %v4564_v0 }
 0x172   :  { %4166 = vmatmul.mubr.msk.bf16.vlgmr.msra.gmra.mxu1 %vm216_vm1, %v1056_v49  ;;  %v1476_v49 = vld [vmem:[%s5906_s1] sm:$0xff] }
 0x173   :  { %4176 = vmatpush3.bf16.xpose.msra.mxu1 %v1163_v24  ;;  %4177 = vmatprep.mubr.msk.bf16.mxu1 %vm4565_vm0, %v4564_v0  ;;  %v1480_v54 = vrot.slane %v1476_v49, 1  ;;  %v1482_v58 = vrot.slane %v1476_v49, 3 }
 0x174   :  { %4187 = vmatprep.subr.bf16.mxu1 %v4564_v0 }
 0x17a   :  { %4178 = vmatmul.mubr.msk.bf16.vlgmr.msra.gmra.mxu1 %vm216_vm1, %v1158_v32 }
 0x17b   :  { %4188 = vmatpush3.bf16.xpose.msra.mxu1 %v1265_v55  ;;  %4189 = vmatprep.mubr.msk.bf16.mxu1 %vm4565_vm0, %v4564_v0 }
 0x17c   :  { %4199 = vmatprep.subr.bf16.mxu1 %v4564_v0 }
 0x182   :  { %4190 = vmatmul.mubr.msk.bf16.vlgmr.msra.gmra.mxu1 %vm216_vm1, %v1260_v50  ;;  %v1481_v50 = vrot.slane %v1476_v49, 2 }
 0x183   :  { %4200 = vmatpush3.bf16.xpose.msra.mxu1 %v1367_v38  ;;  %4201 = vmatprep.mubr.msk.bf16.mxu1 %vm4565_vm0, %v4564_v0 }
 0x184   :  { %4211 = vmatprep.subr.bf16.mxu1 %v4564_v0 }
 0x18a   :  { %4202 = vmatmul.mubr.msk.bf16.vlgmr.msra.gmra.mxu1 %vm216_vm1, %v1362_v60 }
 0x18b   :  { %4213 = vmatprep.mubr.msk.bf16.mxu1 %vm4565_vm0, %v4564_v0 }
 0x1fa   :  { %v689_v61 = vpop.f32.mrf.mxu1 }
 0x1fc   :  { %v4119_v62 = vpop.f32.mrf.mxu1 }
 0x1fe   :  { %v692_v1 = vpop.f32.mrf.mxu1 }
 0x200   :  { %v1046_v3 = vpop.f32.mrf.mxu0  ;;  %v4120_v4 = vpop.f32.mrf.mxu1 }
 0x201   :  { %v1483_v4 = vrot.slane %v1476_v49, 4 }
 0x202   :  { %v4161_v5 = vpop.f32.mrf.mxu0  ;;  %v740_v48 = vpop.f32.mrf.mxu1 }
 0x203   :  { %v1461_v24 = vmul.f32 0.17677669, %v740_v48  ;;  %v1460_v48 = vmul.f32 0.17677669, %v689_v61 }
 0x204   :  { %v1049_v44 = vpop.f32.mrf.mxu0  ;;  %v4125_v8 = vpop.f32.mrf.mxu1 }
 0x205   :  { %v4996_v5 = vadd.f32 %v1480_v54, %v1461_v24  ;;  %v1484_v8 = vrot.slane %v1476_v49, 5 }
 0x206   :  { %v4162_v9 = vpop.f32.mrf.mxu0  ;;  %v743_v11 = vpop.f32.mrf.mxu1 }
 0x208   :  { %v4985_v13 = vpop.f32.mrf.mxu0  ;;  %v4126_v14 = vpop.f32.mrf.mxu1 }
 0x20a   :  { %v4173_v27 = vpop.f32.mrf.mxu0  ;;  %v791_v15 = vpop.f32.mrf.mxu1 }
 0x20b   :  { %v1462_v57 = vmul.f32 0.17677669, %v791_v15 }
 0x20c   :  { %v1151_v16 = vpop.f32.mrf.mxu0  ;;  %v4131_v18 = vpop.f32.mrf.mxu1 }
 0x20d   :  { %v4998_v14 = vadd.f32 %v1481_v50, %v1462_v57  ;;  %v1467_v18 = vmul.f32 0.17677669, %v1046_v3 }
 0x20e   :  { %v4174_v56 = vpop.f32.mrf.mxu0  ;;  %v794_v21 = vpop.f32.mrf.mxu1 }
 0x20f   :  { %v1486_v56 = vrot.slane %v1476_v49, 7  ;;  %v1542_v21 = vrot.slane %v4996_v5, 7 }
 0x210   :  { %v4987_v51 = vpop.f32.mrf.mxu0  ;;  %v4132_v52 = vpop.f32.mrf.mxu1 }
 0x212   :  { %v4185_v19 = vpop.f32.mrf.mxu0  ;;  %v842_v25 = vpop.f32.mrf.mxu1 }
 0x213   :  { %v1463_v38 = vmul.f32 0.17677669, %v842_v25  ;;  %v1544_v25 = vrot.slane %v4998_v14, 6 }
 0x214   :  { %v1253_v28 = vpop.f32.mrf.mxu0  ;;  %v4137_v30 = vpop.f32.mrf.mxu1 }
 0x215   :  { %v5000_v27 = vadd.f32 %v1482_v58, %v1463_v38  ;;  %v1485_v28 = vrot.slane %v1476_v49, 6  ;;  %v5008_v30 = vadd.f32 %v1476_v49, %v1460_v48 }
 0x216   :  { %v4186_v33 = vpop.f32.mrf.mxu0  ;;  %v845_v34 = vpop.f32.mrf.mxu1 }
 0x217   :  { %v1546_v33 = vrot.slane %v5000_v27, 5  ;;  %v1543_v3 = vsel %vm486_vm2, %v1542_v21, %v5008_v30 }
 0x218   :  { %v4989_v36 = vpop.f32.mrf.mxu0  ;;  %v4138_v39 = vpop.f32.mrf.mxu1 }
 0x21a   :  { %v4197_v40 = vpop.f32.mrf.mxu0  ;;  %v893_v22 = vpop.f32.mrf.mxu1 }
 0x21b   :  { %v1464_v1 = vmul.f32 0.17677669, %v893_v22  ;;  %v5012_v40 = vadd.f32 %v1486_v56, %v1467_v18 }
 0x21c   :  { %v1355_v35 = vpop.f32.mrf.mxu0  ;;  %v4143_v42 = vpop.f32.mrf.mxu1 }
 0x21d   :  { %v5002_v15 = vadd.f32 %v1483_v4, %v1464_v1  ;;  %v1545_v42 = vsel %vm489_vm3, %v1544_v25, %v1543_v3 }
 0x21e   :  { %v4198_v43 = vpop.f32.mrf.mxu0  ;;  %v896_v46 = vpop.f32.mrf.mxu1 }
 0x21f   :  { %v1548_v34 = vrot.slane %v5002_v15, 4  ;;  %v1547_v46 = vsel %vm492_vm4, %v1546_v33, %v1545_v42 }
 0x220   :  { %v4991_v47 = vpop.f32.mrf.mxu0  ;;  %v4144_v32 = vpop.f32.mrf.mxu1 }
 0x221   :  { %v1549_v54 = vsel %vm495_vm5, %v1548_v34, %v1547_v46  ;;  %v1554_v32 = vrot.slane %v5012_v40, 1 }
 0x222   :  { %v4209_v55 = vpop.f32.mrf.mxu0  ;;  %v944_v60 = vpop.f32.mrf.mxu1 }
 0x223   :  { %v1465_v44 = vmul.f32 0.17677669, %v944_v60 }
 0x224   :  { %v1457_v62 = vpop.f32.mrf.mxu0  ;;  %v4149_v9 = vpop.f32.mrf.mxu1 }
 0x225   :  { %v5005_v52 = vadd.f32 %v1484_v8, %v1465_v44  ;;  %v1477_v8 = vld [vmem:[%s5906_s1 + $0x8] sm:$0xff]  ;;  %s4567_s1 = smov 96  }
 0x226   :  { %v4210_v11 = vpop.f32.mrf.mxu0  ;;  %v947_v16 = vpop.f32.mrf.mxu1  ;;  %v1488_v48 = vrot.slane %v1477_v8, 2  ;;  %v1487_v18 = vrot.slane %v1477_v8, 1  ;;  %v1489_v34 = vrot.slane %v1477_v8, 3 }
 0x227   :  { %v1550_v22 = vrot.slane %v5005_v52, 3  ;;  %v1469_v16 = vmul.f32 0.17677669, %v4985_v13 }
 0x228   :  { %v4150_v19 = vpop.f32.mrf.mxu1 }
 0x229   :  { %v1551_v57 = vsel %vm498_vm6, %v1550_v22, %v1549_v54  ;;  %v5034_v33 = vadd.f32 %v1487_v18, %v1469_v16  ;;  %v1491_v54 = vrot.slane %v1477_v8, 5 }
 0x22a   :  { %v995_v61 = vpop.f32.mrf.mxu1 }
 0x22b   :  { %v1466_v39 = vmul.f32 0.17677669, %v995_v61  ;;  %v1471_v61 = vmul.f32 0.17677669, %v4987_v51  ;;  %v1556_v46 = vrot.slane %v5034_v33, 7 }
 0x22c   :  { %v4155_v35 = vpop.f32.mrf.mxu1  ;;  %v1475_v51 = vmul.f32 0.17677669, %v4991_v47 }
 0x22d   :  { %v5018_v43 = vadd.f32 %v1485_v28, %v1466_v39  ;;  %v1490_v28 = vrot.slane %v1477_v8, 4 }
 0x22e   :  { %v998_v49 = vpop.f32.mrf.mxu1 }
 0x22f   :  { %v1552_v24 = vrot.slane %v5018_v43, 2  ;;  %v5043_v49 = vadd.f32 %v1489_v34, %v1471_v61 }
 0x230   :  { %v4156_v55 = vpop.f32.mrf.mxu1 }
 0x231   :  { %v1553_v50 = vsel %vm501_vm7, %v1552_v24, %v1551_v57  ;;  %v1473_v24 = vmul.f32 0.17677669, %v4989_v36  ;;  %v1493_v55 = vrot.slane %v1477_v8, 7 }
 0x232   :  { %v1097_v38 = vpop.f32.mrf.mxu1  ;;  %v1555_v58 = vsel %vm504_vm8, %v1554_v32, %v1553_v50 }
 0x233   :  { %v1573_v60 = vsel %vm1572_vm9, %v1555_v58, -inf  ;;  %v1468_v21 = vmul.f32 0.17677669, %v1097_v38 }
 0x234   :  { %1574 = vmax.xlane.f32.xlu0 %v1573_v60  ;;  %v4167_v62 = vpop.f32.mrf.mxu1  ;;  %v1492_v60 = vrot.slane %v1477_v8, 6 }
 0x235   :  { %v5037_v22 = vadd.f32 %v1477_v8, %v1468_v21  ;;  %v1560_v62 = vrot.slane %v5043_v49, 5 }
 0x236   :  { %v1100_v1 = vpop.f32.mrf.mxu1 }
 0x237   :  { %v1557_v57 = vsel %vm486_vm2, %v1556_v46, %v5037_v22  ;;  %v5052_v1 = vadd.f32 %v1491_v54, %v1473_v24 }
 0x238   :  { %v4168_v4 = vpop.f32.mrf.mxu1 }
 0x239   :  { %v1564_v16 = vrot.slane %v5052_v1, 3 }
 0x23a   :  { %v1199_v44 = vpop.f32.mrf.mxu1 }
 0x23b   :  { %v1470_v11 = vmul.f32 0.17677669, %v1199_v44  ;;  %v5054_v44 = vadd.f32 %v1493_v55, %v1475_v51 }
 0x23c   :  { %v4179_v9 = vpop.f32.mrf.mxu1 }
 0x23d   :  { %v5032_v25 = vadd.f32 %v1488_v48, %v1470_v11 }
 0x23e   :  { %v1202_v56 = vpop.f32.mrf.mxu1 }
 0x23f   :  { %v1558_v42 = vrot.slane %v5032_v25, 6  ;;  %v1568_v56 = vrot.slane %v5054_v44, 1 }
 0x240   :  { %v4180_v19 = vpop.f32.mrf.mxu1 }
 0x241   :  { %v1559_v38 = vsel %vm489_vm3, %v1558_v42, %v1557_v57 }
 0x242   :  { %v1301_v39 = vpop.f32.mrf.mxu1  ;;  %v1561_v47 = vsel %vm492_vm4, %v1560_v62, %v1559_v38 }
 0x243   :  { %v1472_v3 = vmul.f32 0.17677669, %v1301_v39 }
 0x244   :  { %v4191_v35 = vpop.f32.mrf.mxu1 }
 0x245   :  { %v5040_v13 = vadd.f32 %v1490_v28, %v1472_v3 }
 0x246   :  { %v1304_v32 = vpop.f32.mrf.mxu1 }
 0x247   :  { %v1562_v58 = vrot.slane %v5040_v13, 4 }
 0x248   :  { %v4192_v50 = vpop.f32.mrf.mxu1 }
 0x249   :  { %v1563_v48 = vsel %vm495_vm5, %v1562_v58, %v1561_v47 }
 0x24a   :  { %v1403_v4 = vpop.f32.mrf.mxu1  ;;  %v1565_v19 = vsel %vm498_vm6, %v1564_v16, %v1563_v48 }
 0x24b   :  { %v1474_v36 = vmul.f32 0.17677669, %v1403_v4 }
 0x24c   :  { %v4203_v9 = vpop.f32.mrf.mxu1 }
 0x24d   :  { %v5057_v11 = vadd.f32 %v1492_v60, %v1474_v36 }
 0x24e   :  { %v1406_v18 = vpop.f32.mrf.mxu1 }
 0x24f   :  { %v1566_v8 = vrot.slane %v5057_v11, 2 }
 0x250   :  { %v4204_v21 = vpop.f32.mrf.mxu1 }
 0x251   :  { %v1567_v28 = vsel %vm501_vm7, %v1566_v8, %v1565_v19 }
 0x252   :  { %v1569_v61 = vsel %vm504_vm8, %v1568_v56, %v1567_v28 }
 0x253   :  { %v1576_v34 = vsel %vm1572_vm9, %v1569_v61, -inf }
 0x254   :  { %1577 = vmax.xlane.f32.xlu0 %v1576_v34 }
 0x26a   :  { %1839 = vrot.lane.b32.xlu0 %v4748_v59, %s4567_s1 }
 0x26e   :  { %1886 = vrot.lane.b32.xlu0 %v4762_v10, %s4567_s1 }
 0x272   :  { %1933 = vrot.lane.b32.xlu0 %v4759_v7, %s4567_s1 }
 0x276   :  { %1980 = vrot.lane.b32.xlu0 %v4770_v20, %s4567_s1 }
 0x27a   :  { %2027 = vrot.lane.b32.xlu0 %v4767_v17, %s4567_s1 }
 0x27e   :  { %2074 = vrot.lane.b32.xlu0 %v4778_v31, %s4567_s1 }
 0x282   :  { %2121 = vrot.lane.b32.xlu0 %v4775_v29, %s4567_s1 }
 0x286   :  { %2168 = vrot.lane.b32.xlu0 %v4787_v26, %s4567_s1 }
 0x28a   :  { %2262 = vrot.lane.b32.xlu0 %v4793_v45, %s4567_s1 }
 0x28e   :  { %2309 = vrot.lane.b32.xlu0 %v4857_v41, %s4567_s1 }
 0x292   :  { %2356 = vrot.lane.b32.xlu0 %v4801_v53, %s4567_s1 }
 0x296   :  { %2403 = vrot.lane.b32.xlu0 %v4882_v6, %s4567_s1 }
 0x29a   :  { %2450 = vrot.lane.b32.xlu0 %v4807_v2, %s4567_s1 }
 0x2bd   :  { %v1575_v59 = vpop.xlane.xlu0 %1574 }
 0x2be   :  { %v1581_v7 = vrot.slane %v1575_v59, 1  ;;  %v1582_v10 = vrot.slane %v1575_v59, 2  ;;  %v1583_v17 = vrot.slane %v1575_v59, 3  ;;  %v1584_v20 = vrot.slane %v1575_v59, 4 }
 0x2bf   :  { %v1585_v29 = vrot.slane %v1575_v59, 5  ;;  %v1586_v31 = vrot.slane %v1575_v59, 6  ;;  %v1587_v26 = vrot.slane %v1575_v59, 7  ;;  %v1611_v45 = vsub.f32 %v5008_v30, %v1575_v59 }
 0x2c0   :  { %v1612_v41 = vsub.f32 %v4996_v5, %v1581_v7  ;;  %v1613_v53 = vsub.f32 %v4998_v14, %v1582_v10  ;;  %v1614_v39 = vsub.f32 %v5000_v27, %v1583_v17  ;;  %v1615_v6 = vsub.f32 %v5002_v15, %v1584_v20 }
 0x2c1   :  { %v1616_v2 = vsub.f32 %v5005_v52, %v1585_v29  ;;  %v1617_v3 = vsub.f32 %v5018_v43, %v1586_v31  ;;  %v1627_v35 = vmul.f32 1.442695, %v1611_v45  ;;  %v1618_v54 = vsub.f32 %v5012_v40, %v1587_v26 }
 0x2c2   :  { %v1629_v42 = vmul.f32 1.442695, %v1612_v41  ;;  %v1631_v46 = vmul.f32 1.442695, %v1613_v53  ;;  %v1633_v24 = vmul.f32 1.442695, %v1614_v39 }
 0x2c3   :  { %4402 = vpow2.f32 %v1627_v35  ;;  %v1635_v30 = vmul.f32 1.442695, %v1615_v6  ;;  %v1637_v5 = vmul.f32 1.442695, %v1616_v2  ;;  %v1639_v14 = vmul.f32 1.442695, %v1617_v3 }
 0x2c4   :  { %4404 = vpow2.f32 %v1629_v42  ;;  %v1641_v27 = vmul.f32 1.442695, %v1618_v54 }
 0x2c5   :  { %4406 = vpow2.f32 %v1631_v46 }
 0x2c6   :  { %4408 = vpow2.f32 %v1633_v24 }
 0x2c7   :  { %4410 = vpow2.f32 %v1635_v30 }
 0x2c8   :  { %4412 = vpow2.f32 %v1637_v5 }
 0x2c9   :  { %4414 = vpow2.f32 %v1639_v14 }
 0x2ca   :  { %4416 = vpow2.f32 %v1641_v27 }
 0x2d0   :  { %v5101_v15 = vpop.eup %4402 }
 0x2d1   :  { %v5103_v52 = vpop.eup %4404 }
 0x2d2   :  { %v5105_v43 = vpop.eup %4406  ;;  %v1675_v40 = vrot.slane %v5103_v52, 7 }
 0x2d3   :  { %v5108_v32 = vpop.eup %4408  ;;  %v1677_v51 = vrot.slane %v5105_v43, 6 }
 0x2d4   :  { %v5111_v55 = vpop.eup %4410  ;;  %v1676_v57 = vsel %vm486_vm2, %v1675_v40, %v5101_v15  ;;  %v1679_v50 = vrot.slane %v5108_v32, 5 }
 0x2d5   :  { %v5116_v38 = vpop.eup %4412  ;;  %v1678_v58 = vsel %vm489_vm3, %v1677_v51, %v1676_v57  ;;  %v1681_v60 = vrot.slane %v5111_v55, 4 }
 0x2d6   :  { %v5120_v62 = vpop.eup %4414  ;;  %v1680_v4 = vsel %vm492_vm4, %v1679_v50, %v1678_v58  ;;  %v1683_v36 = vrot.slane %v5116_v38, 3 }
 0x2d7   :  { %v5124_v9 = vpop.eup %4416  ;;  %v1682_v47 = vsel %vm495_vm5, %v1681_v60, %v1680_v4  ;;  %v1685_v48 = vrot.slane %v5120_v62, 2 }
 0x2d8   :  { %v1684_v16 = vsel %vm498_vm6, %v1683_v36, %v1682_v47  ;;  %v1687_v18 = vrot.slane %v5124_v9, 1 }
 0x2d9   :  { %v1686_v8 = vsel %vm501_vm7, %v1685_v48, %v1684_v16 }
 0x2da   :  { %v1688_v56 = vsel %vm504_vm8, %v1687_v18, %v1686_v8 }
 0x2db   :  { %v1705_v21 = vsel %vm1572_vm9, %v1688_v56, 0.0 }
 0x2dc   :  { %1706 = vadd.xlane.f32.xlu1 %v1705_v21 }
 0x2dd   :  { %v1578_v19 = vpop.xlane.xlu0 %1577 }
 0x2de   :  { %v1588_v28 = vrot.slane %v1578_v19, 1  ;;  %v1589_v61 = vrot.slane %v1578_v19, 2  ;;  %v1590_v10 = vrot.slane %v1578_v19, 3  ;;  %v1619_v20 = vsub.f32 %v5037_v22, %v1578_v19 }
 0x2df   :  { %v1591_v29 = vrot.slane %v1578_v19, 4  ;;  %v1592_v45 = vrot.slane %v1578_v19, 5  ;;  %v1593_v39 = vrot.slane %v1578_v19, 6  ;;  %v1594_v22 = vrot.slane %v1578_v19, 7 }
 0x2e0   :  { %v1620_v34 = vsub.f32 %v5034_v33, %v1588_v28  ;;  %v1621_v7 = vsub.f32 %v5032_v25, %v1589_v61  ;;  %v1622_v26 = vsub.f32 %v5043_v49, %v1590_v10  ;;  %v1643_v41 = vmul.f32 1.442695, %v1619_v20 }
 0x2e1   :  { %v1840_v59 = vpop.permute.xlu0 %1839  ;;  %v1623_v53 = vsub.f32 %v5040_v13, %v1591_v29  ;;  %v1624_v25 = vsub.f32 %v5052_v1, %v1592_v45  ;;  %v1625_v2 = vsub.f32 %v5057_v11, %v1593_v39  ;;  %v1626_v3 = vsub.f32 %v5054_v44, %v1594_v22 }
 0x2e2   :  { %4218 = vmatpush3.bf16.msra.mxu0 %v1840_v59  ;;  %v1645_v17 = vmul.f32 1.442695, %v1620_v34  ;;  %v1647_v31 = vmul.f32 1.442695, %v1621_v7  ;;  %v1649_v33 = vmul.f32 1.442695, %v1622_v26 }
 0x2e3   :  { %4229 = vmatprep.subr.bf16.mxu0 %v4564_v0  ;;  %v1651_v6 = vmul.f32 1.442695, %v1623_v53  ;;  %v1653_v49 = vmul.f32 1.442695, %v1624_v25  ;;  %v1655_v13 = vmul.f32 1.442695, %v1625_v2 }
 0x2e4   :  { %4418 = vpow2.f32 %v1645_v17  ;;  %v1657_v1 = vmul.f32 1.442695, %v1626_v3 }
 0x2e5   :  { %4420 = vpow2.f32 %v1647_v31  ;;  %v1887_v28 = vpop.permute.xlu0 %1886 }
 0x2e6   :  { %4422 = vpow2.f32 %v1643_v41 }
 0x2e7   :  { %4424 = vpow2.f32 %v1649_v33 }
 0x2e8   :  { %4426 = vpow2.f32 %v1651_v6 }
 0x2e9   :  { %4428 = vpow2.f32 %v1653_v49  ;;  %v1934_v59 = vpop.permute.xlu0 %1933 }
 0x2ea   :  { %4430 = vpow2.f32 %v1655_v13 }
 0x2eb   :  { %4432 = vpow2.f32 %v1657_v1 }
 0x2ed   :  { %1792 = vrot.lane.b32.xlu1 %v4752_v63, %s4567_s1  ;;  %v1981_v31 = vpop.permute.xlu0 %1980 }
 0x2f1   :  { %v5144_v35 = vpop.eup %4418  ;;  %v2028_v53 = vpop.permute.xlu0 %2027 }
 0x2f2   :  { %v5146_v42 = vpop.eup %4420  ;;  %v1689_v46 = vrot.slane %v5144_v35, 7 }
 0x2f3   :  { %v5149_v63 = vpop.eup %4422  ;;  %v1691_v24 = vrot.slane %v5146_v42, 6 }
 0x2f4   :  { %v1690_v11 = vsel %vm486_vm2, %v1689_v46, %v5149_v63  ;;  %v5154_v54 = vpop.eup %4424 }
 0x2f5   :  { %v1692_v44 = vsel %vm489_vm3, %v1691_v24, %v1690_v11  ;;  %v5157_v30 = vpop.eup %4426  ;;  %v1693_v5 = vrot.slane %v5154_v54, 5  ;;  %v2075_v22 = vpop.permute.xlu0 %2074 }
 0x2f6   :  { %v5161_v27 = vpop.eup %4428  ;;  %v1695_v40 = vrot.slane %v5157_v30, 4 }
 0x2f7   :  { %v1694_v14 = vsel %vm492_vm4, %v1693_v5, %v1692_v44  ;;  %v5165_v57 = vpop.eup %4430  ;;  %v1697_v50 = vrot.slane %v5161_v27, 3 }
 0x2f8   :  { %v1696_v51 = vsel %vm495_vm5, %v1695_v40, %v1694_v14  ;;  %v5169_v60 = vpop.eup %4432  ;;  %v1699_v4 = vrot.slane %v5165_v57, 2 }
 0x2f9   :  { %v1698_v58 = vsel %vm498_vm6, %v1697_v50, %v1696_v51  ;;  %v1701_v47 = vrot.slane %v5169_v60, 1  ;;  %v2122_v1 = vpop.permute.xlu0 %2121 }
 0x2fa   :  { %v1700_v36 = vsel %vm501_vm7, %v1699_v4, %v1698_v58 }
 0x2fb   :  { %v1702_v48 = vsel %vm504_vm8, %v1701_v47, %v1700_v36 }
 0x2fc   :  { %v1708_v16 = vsel %vm1572_vm9, %v1702_v48, 0.0 }
 0x2fd   :  { %v2169_v11 = vpop.permute.xlu0 %2168 }
 0x301   :  { %v2263_v51 = vpop.permute.xlu0 %2262 }
 0x305   :  { %v2310_v47 = vpop.permute.xlu0 %2309 }
 0x311   :  { %1709 = vadd.xlane.f32.xlu1 %v1708_v16 }
 0x322   :  { %2215 = vrot.lane.b32.xlu1 %v4834_v37, %s4567_s1 }
 0x326   :  { %2497 = vrot.lane.b32.xlu1 %v4909_v23, %s4567_s1 }
 0x365   :  { %v1707_v18 = vpop.xlane.xlu1 %1706 }
 0x366   :  { %v1713_v8 = vrot.slane %v1707_v18, 1  ;;  %v1714_v56 = vrot.slane %v1707_v18, 2  ;;  %4434 = vrcp.f32 %v1707_v18  ;;  %v1715_v21 = vrot.slane %v1707_v18, 3 }
 0x367   :  { %v1716_v61 = vrot.slane %v1707_v18, 4  ;;  %v1717_v34 = vrot.slane %v1707_v18, 5  ;;  %v1718_v17 = vrot.slane %v1707_v18, 6  ;;  %v1719_v26 = vrot.slane %v1707_v18, 7 }
 0x368   :  { %4436 = vrcp.f32 %v1713_v8 }
 0x369   :  { %v1793_v19 = vpop.permute.xlu1 %1792  ;;  %4438 = vrcp.f32 %v1714_v56 }
 0x36a   :  { %4212 = vmatpush3.bf16.msra.mxu1 %v1793_v19  ;;  %4440 = vrcp.f32 %v1715_v21 }
 0x36b   :  { %4223 = vmatprep.subr.bf16.mxu1 %v4564_v0  ;;  %4442 = vrcp.f32 %v1716_v61 }
 0x36c   :  { %4444 = vrcp.f32 %v1717_v34 }
 0x36d   :  { %4446 = vrcp.f32 %v1718_v17 }
 0x36e   :  { %4448 = vrcp.f32 %v1719_v26 }
 0x373   :  { %v4435_v37 = vpop.eup %4434 }
 0x374   :  { %v1744_v7 = vmul.f32 %v4435_v37, %v5101_v15 }
 0x375   :  { %v4437_v23 = vpop.eup %4436 }
 0x376   :  { %v1746_v10 = vmul.f32 %v4437_v23, %v5103_v52  ;;  %v1775_v20 = vpack.c.bf16 %v1744_v7, %v1744_v7  ;;  %v4439_v29 = vpop.eup %4438 }
 0x377   :  { %v4441_v41 = vpop.eup %4440  ;;  %v1748_v15 = vmul.f32 %v4439_v29, %v5105_v43 }
 0x378   :  { %v1776_v45 = vpack.c.bf16 %v1746_v10, %v1746_v10  ;;  %4214 = vmatmul.mubr.msk.bf16.vlgmr.msra.gmra.mxu1 %vm1572_vm9, %v1775_v20  ;;  %v1750_v52 = vmul.f32 %v4441_v41, %v5108_v32  ;;  %v4443_v39 = vpop.eup %4442 }
 0x379   :  { %4224 = vmatpush3.bf16.msra.mxu1 %v1887_v28  ;;  %4225 = vmatprep.mubr.msk.bf16.mxu1 %vm4565_vm0, %v4564_v0  ;;  %v1777_v33 = vpack.c.bf16 %v1748_v15, %v1748_v15  ;;  %v4445_v6 = vpop.eup %4444  ;;  %v1752_v43 = vmul.f32 %v4443_v39, %v5111_v55  ;;  %v2357_v28 = vpop.permute.xlu0 %2356 }
 0x37a   :  { %4220 = vmatmul.mubr.msk.bf16.vlgmr.msra.gmra.mxu0 %vm1572_vm9, %v1776_v45  ;;  %4235 = vmatprep.subr.bf16.mxu1 %v4564_v0  ;;  %v1778_v25 = vpack.c.bf16 %v1750_v52, %v1750_v52  ;;  %v1754_v32 = vmul.f32 %v4445_v6, %v5116_v38  ;;  %v4447_v49 = vpop.eup %4446 }
 0x37b   :  { %4230 = vmatpush3.bf16.msra.mxu0 %v1934_v59  ;;  %4231 = vmatprep.mubr.msk.bf16.mxu0 %vm4565_vm0, %v4564_v0  ;;  %v1779_v2 = vpack.c.bf16 %v1752_v43, %v1752_v43  ;;  %v4449_v13 = vpop.eup %4448  ;;  %v1756_v55 = vmul.f32 %v4447_v49, %v5120_v62 }
 0x37c   :  { %4241 = vmatprep.subr.bf16.mxu0 %v4564_v0  ;;  %v1780_v3 = vpack.c.bf16 %v1754_v32, %v1754_v32  ;;  %v1758_v38 = vmul.f32 %v4449_v13, %v5124_v9 }
 0x37d   :  { %v1781_v46 = vpack.c.bf16 %v1756_v55, %v1756_v55  ;;  %v2404_v23 = vpop.permute.xlu0 %2403 }
 0x37e   :  { %v1782_v24 = vpack.c.bf16 %v1758_v38, %v1758_v38 }
 0x380   :  { %4226 = vmatmul.mubr.msk.bf16.vlgmr.msra.gmra.mxu1 %vm1572_vm9, %v1777_v33 }
 0x381   :  { %4236 = vmatpush3.bf16.msra.mxu1 %v1981_v31  ;;  %4237 = vmatprep.mubr.msk.bf16.mxu1 %vm4565_vm0, %v4564_v0  ;;  %v2451_v29 = vpop.permute.xlu0 %2450 }
 0x382   :  { %4232 = vmatmul.mubr.msk.bf16.vlgmr.msra.gmra.mxu0 %vm1572_vm9, %v1778_v25  ;;  %4247 = vmatprep.subr.bf16.mxu1 %v4564_v0 }
 0x383   :  { %4242 = vmatpush3.bf16.msra.mxu0 %v2028_v53  ;;  %4243 = vmatprep.mubr.msk.bf16.mxu0 %vm4565_vm0, %v4564_v0 }
 0x384   :  { %4253 = vmatprep.subr.bf16.mxu0 %v4564_v0 }
 0x388   :  { %4238 = vmatmul.mubr.msk.bf16.vlgmr.msra.gmra.mxu1 %vm1572_vm9, %v1779_v2 }
 0x389   :  { %4248 = vmatpush3.bf16.msra.mxu1 %v2075_v22  ;;  %4249 = vmatprep.mubr.msk.bf16.mxu1 %vm4565_vm0, %v4564_v0 }
 0x38a   :  { %4244 = vmatmul.mubr.msk.bf16.vlgmr.msra.gmra.mxu0 %vm1572_vm9, %v1780_v3  ;;  %4259 = vmatprep.subr.bf16.mxu1 %v4564_v0 }
 0x38b   :  { %4254 = vmatpush3.bf16.msra.mxu0 %v2122_v1  ;;  %4255 = vmatprep.mubr.msk.bf16.mxu0 %vm4565_vm0, %v4564_v0 }
 0x38c   :  { %4265 = vmatprep.subr.bf16.mxu0 %v4564_v0 }
 0x390   :  { %4250 = vmatmul.mubr.msk.bf16.vlgmr.msra.gmra.mxu1 %vm1572_vm9, %v1781_v46 }
 0x391   :  { %4260 = vmatpush3.bf16.msra.mxu1 %v2169_v11  ;;  %4261 = vmatprep.mubr.msk.bf16.mxu1 %vm4565_vm0, %v4564_v0 }
 0x392   :  { %4256 = vmatmul.mubr.msk.bf16.vlgmr.msra.gmra.mxu0 %vm1572_vm9, %v1782_v24  ;;  %4271 = vmatprep.subr.bf16.mxu1 %v4564_v0 }
 0x393   :  { %4267 = vmatprep.mubr.msk.bf16.mxu0 %vm4565_vm0, %v4564_v0 }
 0x39a   :  { %v1710_v62 = vpop.xlane.xlu1 %1709 }
 0x39b   :  { %v1720_v9 = vrot.slane %v1710_v62, 1  ;;  %v1721_v44 = vrot.slane %v1710_v62, 2  ;;  %4450 = vrcp.f32 %v1710_v62  ;;  %v1722_v5 = vrot.slane %v1710_v62, 3 }
 0x39c   :  { %v1723_v40 = vrot.slane %v1710_v62, 4  ;;  %v1724_v50 = vrot.slane %v1710_v62, 5  ;;  %v1725_v16 = vrot.slane %v1710_v62, 6  ;;  %v1726_v56 = vrot.slane %v1710_v62, 7 }
 0x39d   :  { %4452 = vrcp.f32 %v1720_v9 }
 0x39e   :  { %v2216_v14 = vpop.permute.xlu1 %2215  ;;  %4454 = vrcp.f32 %v1721_v44 }
 0x39f   :  { %4266 = vmatpush3.bf16.msra.mxu0 %v2216_v14  ;;  %4456 = vrcp.f32 %v1722_v5 }
 0x3a0   :  { %4277 = vmatprep.subr.bf16.mxu0 %v4564_v0  ;;  %4458 = vrcp.f32 %v1723_v40 }
 0x3a1   :  { %4460 = vrcp.f32 %v1724_v50 }
 0x3a2   :  { %4462 = vrcp.f32 %v1725_v16  ;;  %v2498_v31 = vpop.permute.xlu1 %2497 }
 0x3a3   :  { %4464 = vrcp.f32 %v1726_v56 }
 0x3a8   :  { %v4451_v58 = vpop.eup %4450 }
 0x3a9   :  { %v1760_v36 = vmul.f32 %v4451_v58, %v5149_v63 }
 0x3aa   :  { %v4453_v4 = vpop.eup %4452 }
 0x3ab   :  { %v1762_v48 = vmul.f32 %v4453_v4, %v5144_v35  ;;  %v1783_v18 = vpack.c.bf16 %v1760_v36, %v1760_v36  ;;  %v4455_v8 = vpop.eup %4454 }
 0x3ac   :  { %v4457_v19 = vpop.eup %4456  ;;  %v1764_v63 = vmul.f32 %v4455_v8, %v5146_v42 }
 0x3ad   :  { %v1784_v21 = vpack.c.bf16 %v1762_v48, %v1762_v48  ;;  %4262 = vmatmul.mubr.msk.bf16.vlgmr.msra.gmra.mxu1 %vm1572_vm9, %v1783_v18  ;;  %v1766_v35 = vmul.f32 %v4457_v19, %v5154_v54  ;;  %v4459_v34 = vpop.eup %4458 }
 0x3ae   :  { %4272 = vmatpush3.bf16.msra.mxu1 %v2263_v51  ;;  %4273 = vmatprep.mubr.msk.bf16.mxu1 %vm4565_vm0, %v4564_v0  ;;  %v1785_v61 = vpack.c.bf16 %v1764_v63, %v1764_v63  ;;  %v4461_v37 = vpop.eup %4460  ;;  %v1768_v42 = vmul.f32 %v4459_v34, %v5157_v30 }
 0x3af   :  { %4268 = vmatmul.mubr.msk.bf16.vlgmr.msra.gmra.mxu0 %vm1572_vm9, %v1784_v21  ;;  %4283 = vmatprep.subr.bf16.mxu1 %v4564_v0  ;;  %v1786_v59 = vpack.c.bf16 %v1766_v35, %v1766_v35  ;;  %v1770_v54 = vmul.f32 %v4461_v37, %v5161_v27  ;;  %v4463_v10 = vpop.eup %4462 }
 0x3b0   :  { %4278 = vmatpush3.bf16.msra.mxu0 %v2310_v47  ;;  %4279 = vmatprep.mubr.msk.bf16.mxu0 %vm4565_vm0, %v4564_v0  ;;  %v1787_v7 = vpack.c.bf16 %v1768_v42, %v1768_v42  ;;  %v4465_v20 = vpop.eup %4464  ;;  %v1772_v30 = vmul.f32 %v4463_v10, %v5165_v57  ;;  %v4390_v57 = vld [vmem:[%s5911_s6 + $0x8] sm:$0xff]  }
 0x3b1   :  { %4289 = vmatprep.subr.bf16.mxu0 %v4564_v0  ;;  %v1788_v17 = vpack.c.bf16 %v1770_v54, %v1770_v54  ;;  %v1774_v27 = vmul.f32 %v4465_v20, %v5169_v60  ;;  %v4391_v60 = vld [vmem:[%s5911_s6] sm:$0xff]  }
 0x3b2   :  { %v1789_v26 = vpack.c.bf16 %v1772_v30, %v1772_v30 }
 0x3b3   :  { %v1790_v45 = vpack.c.bf16 %v1774_v27, %v1774_v27 }
 0x3b5   :  { %4274 = vmatmul.mubr.msk.bf16.vlgmr.msra.gmra.mxu1 %vm1572_vm9, %v1785_v61 }
 0x3b6   :  { %4284 = vmatpush3.bf16.msra.mxu1 %v2357_v28  ;;  %4285 = vmatprep.mubr.msk.bf16.mxu1 %vm4565_vm0, %v4564_v0 }
 0x3b7   :  { %4280 = vmatmul.mubr.msk.bf16.vlgmr.msra.gmra.mxu0 %vm1572_vm9, %v1786_v59  ;;  %4295 = vmatprep.subr.bf16.mxu1 %v4564_v0 }
 0x3b8   :  { %4290 = vmatpush3.bf16.msra.mxu0 %v2404_v23  ;;  %4291 = vmatprep.mubr.msk.bf16.mxu0 %vm4565_vm0, %v4564_v0 }
 0x3b9   :  { %4301 = vmatprep.subr.bf16.mxu0 %v4564_v0 }
 0x3bd   :  { %4286 = vmatmul.mubr.msk.bf16.vlgmr.msra.gmra.mxu1 %vm1572_vm9, %v1787_v7 }
 0x3be   :  { %4296 = vmatpush3.bf16.msra.mxu1 %v2451_v29  ;;  %4297 = vmatprep.mubr.msk.bf16.mxu1 %vm4565_vm0, %v4564_v0 }
 0x3bf   :  { %4292 = vmatmul.mubr.msk.bf16.vlgmr.msra.gmra.mxu0 %vm1572_vm9, %v1788_v17  ;;  %4307 = vmatprep.subr.bf16.mxu1 %v4564_v0 }
 0x3c0   :  { %4302 = vmatpush3.bf16.msra.mxu0 %v2498_v31  ;;  %4303 = vmatprep.mubr.msk.bf16.mxu0 %vm4565_vm0, %v4564_v0 }
 0x3c1   :  { %4315 = vmatprep.subr.bf16.mxu0 %v4564_v0 }
 0x3c5   :  { %4298 = vmatmul.mubr.msk.bf16.vlgmr.msra.gmra.mxu1 %vm1572_vm9, %v1789_v26 }
 0x3c6   :  { %4311 = vmatprep.mubr.msk.bf16.mxu1 %vm4565_vm0, %v4564_v0  ;;  %4308 = vmatpush3.bf16.msra.mxu1 %v4390_v57 }
 0x3c7   :  { %4304 = vmatmul.mubr.msk.bf16.vlgmr.msra.gmra.mxu0 %vm1572_vm9, %v1790_v45  ;;  %4309 = vmatprep.subr.bf16.mxu1 %v4564_v0 }
 0x3c8   :  { %4319 = vmatprep.mubr.msk.bf16.mxu0 %vm4565_vm0, %v4564_v0 }
 0x3ca   :  { %4310 = vmatpush3.bf16.msra.mxu1 %v4391_v60 }
 0x3cb   :  { %4323 = vmatprep.subr.bf16.mxu1 %v4564_v0 }
 0x438   :  { %v1832_v41 = vpop.f32.mrf.mxu1 }
 0x439   :  { %v2543_v52 = vpack.c.bf16 %v1832_v41, %v1832_v41 }
 0x43a   :  { %v1879_v15 = vpop.f32.mrf.mxu0  ;;  %v4215_v53 = vpop.f32.mrf.mxu1 }
 0x43b   :  { %v2544_v33 = vpack.c.bf16 %v1879_v15, %v1879_v15  ;;  %v2586_v22 = vunpack.c.l.b16 %v2543_v52 }
 0x43c   :  { %v4221_v39 = vpop.f32.mrf.mxu0  ;;  %v1835_v6 = vpop.f32.mrf.mxu1 }
 0x43d   :  { %v2587_v25 = vunpack.c.l.b16 %v2544_v33 }
 0x43e   :  { %v1882_v43 = vpop.f32.mrf.mxu0  ;;  %v4216_v2 = vpop.f32.mrf.mxu1 }
 0x43f   :  { %v2602_v32 = vrot.slane %v2587_v25, 7 }
 0x440   :  { %v4222_v49 = vpop.f32.mrf.mxu0  ;;  %v1926_v13 = vpop.f32.mrf.mxu1 }
 0x441   :  { %v2603_v3 = vsel %vm486_vm2, %v2602_v32, %v2586_v22  ;;  %v2545_v1 = vpack.c.bf16 %v1926_v13, %v1926_v13 }
 0x442   :  { %v1973_v55 = vpop.f32.mrf.mxu0  ;;  %v4227_v38 = vpop.f32.mrf.mxu1 }
 0x443   :  { %v2546_v46 = vpack.c.bf16 %v1973_v55, %v1973_v55  ;;  %v2588_v24 = vunpack.c.l.b16 %v2545_v1 }
 0x444   :  { %v4233_v11 = vpop.f32.mrf.mxu0  ;;  %v1929_v9 = vpop.f32.mrf.mxu1 }
 0x445   :  { %v2589_v62 = vunpack.c.l.b16 %v2546_v46  ;;  %v2604_v44 = vrot.slane %v2588_v24, 6 }
 0x446   :  { %v1976_v5 = vpop.f32.mrf.mxu0  ;;  %v4228_v40 = vpop.f32.mrf.mxu1 }
 0x447   :  { %v2606_v14 = vrot.slane %v2589_v62, 5  ;;  %v2605_v51 = vsel %vm489_vm3, %v2604_v44, %v2603_v3 }
 0x448   :  { %v4234_v50 = vpop.f32.mrf.mxu0  ;;  %v2020_v4 = vpop.f32.mrf.mxu1 }
 0x449   :  { %v5270_v58 = vsel %vm492_vm4, %v2606_v14, %v2605_v51  ;;  %v2547_v60 = vpack.c.bf16 %v2020_v4, %v2020_v4 }
 0x44a   :  { %v2067_v36 = vpop.f32.mrf.mxu0  ;;  %v4239_v47 = vpop.f32.mrf.mxu1 }
 0x44b   :  { %v2548_v25 = vpack.c.bf16 %v2067_v36, %v2067_v36  ;;  %v2590_v22 = vunpack.c.l.b16 %v2547_v60 }
 0x44c   :  { %v4245_v48 = vpop.f32.mrf.mxu0  ;;  %v2023_v16 = vpop.f32.mrf.mxu1 }
 0x44d   :  { %v2591_v11 = vunpack.c.l.b16 %v2548_v25  ;;  %v2608_v5 = vrot.slane %v2590_v22, 4  ;;  %v4480_v25 = vld [vmem:[#allocation2 + $0x10] sm:$0xf] }
 0x44e   :  { %v2070_v18 = vpop.f32.mrf.mxu0  ;;  %v4240_v8 = vpop.f32.mrf.mxu1 }
 0x44f   :  { %v2610_v18 = vrot.slane %v2591_v11, 3 }
 0x450   :  { %v4246_v56 = vpop.f32.mrf.mxu0  ;;  %v2114_v21 = vpop.f32.mrf.mxu1 }
 0x451   :  { %v2549_v32 = vpack.c.bf16 %v2114_v21, %v2114_v21  ;;  %v2609_v21 = vsel %vm495_vm5, %v2608_v5, %v5270_v58  ;;  %v4488_v5 = vld [vmem:[#allocation2 + $0x58] sm:$0xf] }
 0x452   :  { %v2161_v19 = vpop.f32.mrf.mxu0  ;;  %v4251_v63 = vpop.f32.mrf.mxu1 }
 0x453   :  { %v2550_v62 = vpack.c.bf16 %v2161_v19, %v2161_v19  ;;  %v2592_v14 = vunpack.c.l.b16 %v2549_v32  ;;  %v4482_v32 = vld [vmem:[#allocation2 + $0x20] sm:$0xf] }
 0x454   :  { %v4257_v28 = vpop.f32.mrf.mxu0  ;;  %v2117_v35 = vpop.f32.mrf.mxu1 }
 0x455   :  { %v2593_v8 = vunpack.c.l.b16 %v2550_v62  ;;  %v2612_v19 = vrot.slane %v2592_v14, 2  ;;  %v4487_v62 = vld [vmem:[#allocation2 + $0x50] sm:$0xf]  ;;  %v2698_v14 = vunpack.c.l.bf16 %v4488_v5 }
 0x456   :  { %v2164_v61 = vpop.f32.mrf.mxu0  ;;  %v4252_v34 = vpop.f32.mrf.mxu1 }
 0x458   :  { %v4258_v59 = vpop.f32.mrf.mxu0 }
 0x46d   :  { %v2208_v37 = vpop.f32.mrf.mxu1 }
 0x46e   :  { %v2551_v6 = vpack.c.bf16 %v2208_v37, %v2208_v37 }
 0x46f   :  { %v2255_v23 = vpop.f32.mrf.mxu0  ;;  %v4263_v42 = vpop.f32.mrf.mxu1 }
 0x470   :  { %v2552_v30 = vpack.c.bf16 %v2255_v23, %v2255_v23  ;;  %v2594_v9 = vunpack.c.l.b16 %v2551_v6  ;;  %v2689_v6 = vunpack.c.l.bf16 %v4480_v25 }
 0x471   :  { %v4269_v54 = vpop.f32.mrf.mxu0  ;;  %v2211_v7 = vpop.f32.mrf.mxu1 }
 0x472   :  { %v2595_v15 = vunpack.c.l.b16 %v2552_v30  ;;  %v2611_v54 = vsel %vm498_vm6, %v2610_v18, %v2609_v21  ;;  %v2614_v7 = vrot.slane %v2593_v8, 1 }
 0x473   :  { %v2258_v10 = vpop.f32.mrf.mxu0  ;;  %v4264_v17 = vpop.f32.mrf.mxu1 }
 0x474   :  { %v2616_v3 = vrot.slane %v2595_v15, 7  ;;  %v3950_v15 = vld [vmem:[%s5912_s7] ss:$0 sm:$0xff] }
 0x475   :  { %v4270_v20 = vpop.f32.mrf.mxu0  ;;  %v2302_v29 = vpop.f32.mrf.mxu1 }
 0x476   :  { %v2553_v26 = vpack.c.bf16 %v2302_v29, %v2302_v29  ;;  %v2617_v51 = vsel %vm486_vm2, %v2616_v3, %v2594_v9  ;;  %v2613_v20 = vsel %vm501_vm7, %v2612_v19, %v2611_v54  ;;  %v2697_v9 = vunpack.c.l.bf16 %v4487_v62  ;;  %v4492_v19 = vld [vmem:[#allocation2 + $0x38] sm:$0xf] }
 0x477   :  { %v2349_v31 = vpop.f32.mrf.mxu0  ;;  %v4275_v27 = vpop.f32.mrf.mxu1 }
 0x478   :  { %v2554_v52 = vpack.c.bf16 %v2349_v31, %v2349_v31  ;;  %v2596_v33 = vunpack.c.l.b16 %v2553_v26 }
 0x479   :  { %v4281_v45 = vpop.f32.mrf.mxu0  ;;  %v2305_v57 = vpop.f32.mrf.mxu1 }
 0x47a   :  { %v2597_v13 = vunpack.c.l.b16 %v2554_v52  ;;  %v2618_v38 = vrot.slane %v2596_v33, 6  ;;  %v2615_v57 = vsel %vm504_vm8, %v2614_v7, %v2613_v20  ;;  %v4478_v52 = vld [vmem:[#allocation2] sm:$0xf]  ;;  %v4479_v33 = vld [vmem:[#allocation2 + $0x8] sm:$0xf] }
 0x47b   :  { %v2352_v41 = vpop.f32.mrf.mxu0  ;;  %v4276_v53 = vpop.f32.mrf.mxu1 }
 0x47c   :  { %v2620_v50 = vrot.slane %v2597_v13, 5  ;;  %v2619_v47 = vsel %vm489_vm3, %v2618_v38, %v2617_v51  ;;  %v2687_v53 = vunpack.c.l.bf16 %v4478_v52  ;;  %v4484_v13 = vld [vmem:[#allocation2 + $0x30] sm:$0xf]  ;;  %v4485_v38 = vld [vmem:[#allocation2 + $0x40] sm:$0xf] }
 0x47d   :  { %v4282_v39 = vpop.f32.mrf.mxu0  ;;  %v2396_v43 = vpop.f32.mrf.mxu1 }
 0x47e   :  { %v2555_v2 = vpack.c.bf16 %v2396_v43, %v2396_v43  ;;  %v2621_v35 = vsel %vm492_vm4, %v2620_v50, %v2619_v47  ;;  %v2688_v39 = vunpack.c.l.bf16 %v4479_v33  ;;  %v4481_v43 = vld [vmem:[#allocation2 + $0x18] sm:$0xf]  ;;  %v4490_v50 = vld [vmem:[#allocation2 + $0x68] sm:$0xf] }
 0x47f   :  { %v2443_v49 = vpop.f32.mrf.mxu0  ;;  %v4287_v1 = vpop.f32.mrf.mxu1  ;;  %v2690_v22 = vunpack.c.l.bf16 %v4481_v43 }
 0x480   :  { %v2556_v55 = vpack.c.bf16 %v2443_v49, %v2443_v49  ;;  %v2598_v46 = vunpack.c.l.b16 %v2555_v2  ;;  %v2691_v2 = vunpack.c.l.bf16 %v4482_v32  ;;  %v4483_v49 = vld [vmem:[#allocation2 + $0x28] sm:$0xf]  ;;  %v2693_v1 = vunpack.c.l.bf16 %v4484_v13 }
 0x481   :  { %v4293_v24 = vpop.f32.mrf.mxu0  ;;  %v2399_v44 = vpop.f32.mrf.mxu1  ;;  %v2692_v3 = vunpack.c.l.bf16 %v4483_v49 }
 0x482   :  { %v2599_v4 = vunpack.c.l.b16 %v2556_v55  ;;  %v2622_v48 = vrot.slane %v2598_v46, 4  ;;  %v2695_v46 = vunpack.c.l.bf16 %v4485_v38  ;;  %v4486_v24 = vld [vmem:[#allocation2 + $0x48] sm:$0xf] }
 0x483   :  { %v2446_v40 = vpop.f32.mrf.mxu0  ;;  %v4288_v36 = vpop.f32.mrf.mxu1  ;;  %v2696_v11 = vunpack.c.l.bf16 %v4486_v24 }
 0x484   :  { %v2624_v61 = vrot.slane %v2599_v4, 3  ;;  %v2623_v37 = vsel %vm495_vm5, %v2622_v48, %v2621_v35  ;;  %v4489_v40 = vld [vmem:[#allocation2 + $0x60] sm:$0xf]  ;;  %v2700_v4 = vunpack.c.l.bf16 %v4490_v50  ;;  %v4491_v36 = vld [vmem:[#allocation2 + $0x70] sm:$0xf] }
 0x485   :  { %v4294_v16 = vpop.f32.mrf.mxu0  ;;  %v2490_v56 = vpop.f32.mrf.mxu1  ;;  %v2699_v51 = vunpack.c.l.bf16 %v4489_v40  ;;  %v2701_v47 = vunpack.c.l.bf16 %v4491_v36 }
 0x486   :  { %v2557_v63 = vpack.c.bf16 %v2490_v56, %v2490_v56  ;;  %v2625_v31 = vsel %vm498_vm6, %v2624_v61, %v2623_v37 }
 0x487   :  { %v2537_v28 = vpop.f32.mrf.mxu0  ;;  %v4299_v34 = vpop.f32.mrf.mxu1 }
 0x488   :  { %v2558_v59 = vpack.c.bf16 %v2537_v28, %v2537_v28  ;;  %v2600_v23 = vunpack.c.l.b16 %v2557_v63  ;;  %v2694_v63 = vunpack.c.l.bf16 %v4492_v19 }
 0x489   :  { %v4305_v42 = vpop.f32.mrf.mxu0  ;;  %v2493_v17 = vpop.f32.mrf.mxu1 }
 0x48a   :  { %v2601_v10 = vunpack.c.l.b16 %v2558_v59  ;;  %v2626_v58 = vrot.slane %v2600_v23, 2  ;;  %v4493_v17 = vld [vmem:[#allocation2 + $0x78] sm:$0xf] }
 0x48b   :  { %v2540_v29 = vpop.f32.mrf.mxu0  ;;  %v4300_v27 = vpop.f32.mrf.mxu1  ;;  %v2702_v20 = vunpack.c.l.bf16 %v4493_v17 }
 0x48c   :  { %v2628_v30 = vrot.slane %v2601_v10, 1  ;;  %v2627_v26 = vsel %vm501_vm7, %v2626_v58, %v2625_v31 }
 0x48d   :  { %v4306_v45 = vpop.f32.mrf.mxu0 }
 0x48e   :  { %v2629_v60 = vsel %vm504_vm8, %v2628_v30, %v2627_v26 }
 0x48f   :  { %v2630_v41 = vpack.c.b16 %v2629_v60, %v2615_v57 }
 0x491   :  { %4312 = vmatmul.mubr.msk.bf16.vlgmr.msra.gmra.mxu1 %vm216_vm1, %v2630_v41 }
 0x492   :  { %4339 = vmatprep.mubr.msk.bf16.mxu1 %vm4565_vm0, %v4564_v0 }
 0x551   :  { %v2680_v55 = vpop.f32.mrf.mxu1 }
 0x552   :  { %v2681_v44 = vadd.f32 %v3950_v15, %v2680_v55 }
 0x553   :  { %v4313_v48 = vpop.f32.mrf.mxu1 }
 0x554   :  { %v2705_v16 = vrot.slane %v2681_v44, 1  ;;  %v2706_v18 = vrot.slane %v2681_v44, 2  ;;  %v2707_v8 = vrot.slane %v2681_v44, 3  ;;  %v2708_v56 = vrot.slane %v2681_v44, 4 }
 0x555   :  { %v2683_v21 = vpop.f32.mrf.mxu1  ;;  %v2709_v28 = vrot.slane %v2681_v44, 5  ;;  %v2710_v35 = vrot.slane %v2681_v44, 6  ;;  %v2711_v61 = vrot.slane %v2681_v44, 7  ;;  %v2735_v58 = vadd.f32 %v2687_v53, %v2681_v44 }
 0x556   :  { %v2684_v34 = vadd.f32 %v3950_v15, %v2683_v21  ;;  %v5290_v59 = vadd.f32 %v2705_v16, %v2688_v39  ;;  %v5292_v37 = vadd.f32 %v2706_v18, %v2689_v6  ;;  %v5294_v23 = vadd.f32 %v2707_v8, %v2690_v22 }
 0x557   :  { %v4314_v42 = vpop.f32.mrf.mxu1  ;;  %v5296_v54 = vadd.f32 %v2708_v56, %v2691_v2  ;;  %v5298_v7 = vadd.f32 %v2709_v28, %v2692_v3  ;;  %v5300_v10 = vadd.f32 %v2710_v35, %v2693_v1  ;;  %v2742_v27 = vadd.f32 %v2711_v61, %v2694_v63 }
 0x558   :  { %v2769_v29 = vrot.slane %v5290_v59, 7  ;;  %v2771_v31 = vrot.slane %v5292_v37, 6  ;;  %v2712_v30 = vrot.slane %v2684_v34, 1  ;;  %v2773_v26 = vrot.slane %v5294_v23, 5 }
 0x559   :  { %v2775_v45 = vrot.slane %v5296_v54, 4  ;;  %v2777_v57 = vrot.slane %v5298_v7, 3  ;;  %v2713_v41 = vrot.slane %v2684_v34, 2  ;;  %v2714_v15 = vrot.slane %v2684_v34, 3 }
 0x55a   :  { %v2770_v60 = vsel %vm486_vm2, %v2769_v29, %v2735_v58  ;;  %v2715_v52 = vrot.slane %v2684_v34, 4  ;;  %v2779_v53 = vrot.slane %v5300_v10, 2  ;;  %v2716_v39 = vrot.slane %v2684_v34, 5 }
 0x55b   :  { %v2772_v33 = vsel %vm489_vm3, %v2771_v31, %v2770_v60  ;;  %v2717_v25 = vrot.slane %v2684_v34, 6  ;;  %v2718_v43 = vrot.slane %v2684_v34, 7  ;;  %v5311_v22 = vadd.f32 %v2712_v30, %v2696_v11 }
 0x55c   :  { %v2774_v6 = vsel %vm492_vm4, %v2773_v26, %v2772_v33  ;;  %v5313_v32 = vadd.f32 %v2713_v41, %v2697_v9  ;;  %v2781_v49 = vrot.slane %v2742_v27, 1  ;;  %v5316_v3 = vadd.f32 %v2714_v15, %v2698_v14 }
 0x55d   :  { %v2776_v2 = vsel %vm495_vm5, %v2775_v45, %v2774_v6  ;;  %v5318_v13 = vadd.f32 %v2715_v52, %v2699_v51  ;;  %v5321_v55 = vadd.f32 %v2695_v46, %v2684_v34  ;;  %v5323_v38 = vadd.f32 %v2716_v39, %v2700_v4 }
 0x55e   :  { %v2778_v1 = vsel %vm498_vm6, %v2777_v57, %v2776_v2  ;;  %v2783_v24 = vrot.slane %v5311_v22, 7  ;;  %v5327_v62 = vadd.f32 %v2717_v25, %v2701_v47  ;;  %v2785_v9 = vrot.slane %v5313_v32, 6 }
 0x55f   :  { %v2780_v11 = vsel %vm501_vm7, %v2779_v53, %v2778_v1  ;;  %v5331_v5 = vadd.f32 %v2718_v43, %v2702_v20  ;;  %v2787_v46 = vrot.slane %v5316_v3, 5  ;;  %v2789_v50 = vrot.slane %v5318_v13, 4 }
 0x560   :  { %v2782_v44 = vsel %vm504_vm8, %v2781_v49, %v2780_v11  ;;  %v2784_v14 = vsel %vm486_vm2, %v2783_v24, %v5321_v55  ;;  %v2791_v36 = vrot.slane %v5323_v38, 3  ;;  %v2793_v48 = vrot.slane %v5327_v62, 2 }
 0x561   :  { %v2799_v40 = vsel %vm216_vm1, %v2782_v44, 0.0  ;;  %v2786_v51 = vsel %vm489_vm3, %v2785_v9, %v2784_v14  ;;  %v2795_v18 = vrot.slane %v5331_v5, 1 }
 0x562   :  { %2800 = vadd.xlane.f32.xlu0 %v2799_v40  ;;  %v2788_v4 = vsel %vm492_vm4, %v2787_v46, %v2786_v51 }
 0x563   :  { %v2790_v47 = vsel %vm495_vm5, %v2789_v50, %v2788_v4 }
 0x564   :  { %v2792_v16 = vsel %vm498_vm6, %v2791_v36, %v2790_v47 }
 0x565   :  { %v2794_v8 = vsel %vm501_vm7, %v2793_v48, %v2792_v16 }
 0x566   :  { %v2796_v56 = vsel %vm504_vm8, %v2795_v18, %v2794_v8 }
 0x567   :  { %v2802_v21 = vsel %vm216_vm1, %v2796_v56, 0.0 }
 0x568   :  { %2803 = vadd.xlane.f32.xlu1 %v2802_v21 }
 0x5eb   :  { %v2801_v19 = vpop.xlane.xlu0 %2800 }
 0x5ec   :  { %v2806_v63 = vmul.f32 0.03125, %v2801_v19 }
 0x5ee   :  { %v2810_v28 = vrot.slane %v2806_v63, 1  ;;  %v2811_v35 = vrot.slane %v2806_v63, 2  ;;  %v2812_v61 = vrot.slane %v2806_v63, 3  ;;  %v2813_v34 = vrot.slane %v2806_v63, 4 }
 0x5ef   :  { %v2814_v42 = vrot.slane %v2806_v63, 5  ;;  %v2815_v17 = vrot.slane %v2806_v63, 6  ;;  %v2816_v20 = vrot.slane %v2806_v63, 7  ;;  %v5348_v29 = vsub.f32 %v2735_v58, %v2806_v63 }
 0x5f0   :  { %v5351_v31 = vsub.f32 %v5290_v59, %v2810_v28  ;;  %v5354_v30 = vsub.f32 %v5292_v37, %v2811_v35  ;;  %v5357_v26 = vsub.f32 %v5294_v23, %v2812_v61  ;;  %v5360_v45 = vsub.f32 %v5296_v54, %v2813_v34 }
 0x5f1   :  { %v2804_v57 = vpop.xlane.xlu1 %2803  ;;  %v5363_v60 = vsub.f32 %v5298_v7, %v2814_v42  ;;  %v5366_v41 = vsub.f32 %v5300_v10, %v2815_v17  ;;  %v5368_v58 = vsub.f32 %v2742_v27, %v2816_v20  ;;  %v2856_v15 = vmul.f32 %v5348_v29, %v5348_v29 }
 0x5f2   :  { %v2807_v59 = vmul.f32 0.03125, %v2804_v57  ;;  %v2857_v37 = vmul.f32 %v5351_v31, %v5351_v31  ;;  %v2858_v23 = vmul.f32 %v5354_v30, %v5354_v30  ;;  %v2859_v54 = vmul.f32 %v5357_v26, %v5357_v26 }
 0x5f3   :  { %v2860_v7 = vmul.f32 %v5360_v45, %v5360_v45  ;;  %v2861_v10 = vmul.f32 %v5363_v60, %v5363_v60  ;;  %v2862_v27 = vmul.f32 %v5366_v41, %v5366_v41  ;;  %v2863_v52 = vmul.f32 %v5368_v58, %v5368_v58 }
 0x5f4   :  { %v2888_v33 = vrot.slane %v2857_v37, 7  ;;  %v2890_v53 = vrot.slane %v2858_v23, 6  ;;  %v2817_v39 = vrot.slane %v2807_v59, 1  ;;  %v2892_v25 = vrot.slane %v2859_v54, 5 }
 0x5f5   :  { %v2894_v6 = vrot.slane %v2860_v7, 4  ;;  %v2896_v43 = vrot.slane %v2861_v10, 3  ;;  %v2898_v2 = vrot.slane %v2862_v27, 2  ;;  %v2818_v1 = vrot.slane %v2807_v59, 2 }
 0x5f6   :  { %v2889_v49 = vsel %vm486_vm2, %v2888_v33, %v2856_v15  ;;  %v2819_v24 = vrot.slane %v2807_v59, 3  ;;  %v2820_v11 = vrot.slane %v2807_v59, 4  ;;  %v2821_v44 = vrot.slane %v2807_v59, 5  ;;  %v4393_v33 = vld [vmem:[%s5915_s10] sm:$0xff]  }
 0x5f7   :  { %v2891_v9 = vsel %vm489_vm3, %v2890_v53, %v2889_v49  ;;  %v2822_v14 = vrot.slane %v2807_v59, 6  ;;  %v2823_v46 = vrot.slane %v2807_v59, 7  ;;  %v5390_v51 = vsub.f32 %v5321_v55, %v2807_v59 }
 0x5f8   :  { %v2893_v40 = vsel %vm492_vm4, %v2892_v25, %v2891_v9  ;;  %v5393_v50 = vsub.f32 %v5311_v22, %v2817_v39  ;;  %v5396_v4 = vsub.f32 %v5313_v32, %v2818_v1  ;;  %v5400_v47 = vsub.f32 %v5316_v3, %v2819_v24  ;;  %v3954_v1 = vld [vmem:[%s5913_s8] ss:$0 sm:$0xff] }
 0x5f9   :  { %v2895_v36 = vsel %vm495_vm5, %v2894_v6, %v2893_v40  ;;  %v5403_v48 = vsub.f32 %v5318_v13, %v2820_v11  ;;  %v5406_v16 = vsub.f32 %v5323_v38, %v2821_v44  ;;  %v2900_v18 = vrot.slane %v2863_v52, 1  ;;  %v4392_v52 = vld [vmem:[%s5915_s10 + $0x8] sm:$0xff]  }
 0x5fa   :  { %v2897_v55 = vsel %vm498_vm6, %v2896_v43, %v2895_v36  ;;  %v5410_v22 = vsub.f32 %v5327_v62, %v2822_v14  ;;  %v5413_v32 = vsub.f32 %v5331_v5, %v2823_v46  ;;  %v2865_v3 = vmul.f32 %v5393_v50, %v5393_v50  ;;  %4316 = vmatpush3.bf16.msra.mxu0 %v4392_v52 }
 0x5fb   :  { %v2899_v8 = vsel %vm501_vm7, %v2898_v2, %v2897_v55  ;;  %v2866_v13 = vmul.f32 %v5396_v4, %v5396_v4  ;;  %v2867_v38 = vmul.f32 %v5400_v47, %v5400_v47  ;;  %v2864_v62 = vmul.f32 %v5390_v51, %v5390_v51  ;;  %4317 = vmatprep.subr.bf16.mxu0 %v4564_v0 }
 0x5fc   :  { %v2901_v56 = vsel %vm504_vm8, %v2900_v18, %v2899_v8  ;;  %v2868_v5 = vmul.f32 %v5403_v48, %v5403_v48  ;;  %v2869_v19 = vmul.f32 %v5406_v16, %v5406_v16  ;;  %v2902_v63 = vrot.slane %v2865_v3, 7 }
 0x5fd   :  { %v2918_v21 = vsel %vm216_vm1, %v2901_v56, 0.0  ;;  %v2904_v28 = vrot.slane %v2866_v13, 6  ;;  %v2870_v35 = vmul.f32 %v5410_v22, %v5410_v22  ;;  %v2871_v61 = vmul.f32 %v5413_v32, %v5413_v32 }
 0x5fe   :  { %2919 = vadd.xlane.f32.xlu0 %v2918_v21  ;;  %v2903_v34 = vsel %vm486_vm2, %v2902_v63, %v2864_v62  ;;  %v2906_v42 = vrot.slane %v2867_v38, 5  ;;  %v2908_v20 = vrot.slane %v2868_v5, 4  ;;  %v2910_v59 = vrot.slane %v2869_v19, 3  ;;  %4318 = vmatpush3.bf16.msra.mxu0 %v4393_v33  ;;  %v3955_v5 = vld [vmem:[%s5914_s9] ss:$0 sm:$0xff] }
 0x5ff   :  { %v2905_v17 = vsel %vm489_vm3, %v2904_v28, %v2903_v34  ;;  %v2912_v23 = vrot.slane %v2870_v35, 2  ;;  %v2914_v15 = vrot.slane %v2871_v61, 1 }
 0x600   :  { %v2907_v57 = vsel %vm492_vm4, %v2906_v42, %v2905_v17 }
 0x601   :  { %v2909_v37 = vsel %vm495_vm5, %v2908_v20, %v2907_v57 }
 0x602   :  { %v2911_v54 = vsel %vm498_vm6, %v2910_v59, %v2909_v37 }
 0x603   :  { %v2913_v7 = vsel %vm501_vm7, %v2912_v23, %v2911_v54 }
 0x604   :  { %v2915_v10 = vsel %vm504_vm8, %v2914_v15, %v2913_v7 }
 0x605   :  { %v2921_v27 = vsel %vm216_vm1, %v2915_v10, 0.0 }
 0x606   :  { %2922 = vadd.xlane.f32.xlu0 %v2921_v27 }
 0x687   :  { %v2920_v53 = vpop.xlane.xlu0 %2919 }
 0x688   :  { %v2924_v39 = vmul.f32 0.03125, %v2920_v53 }
 0x68a   :  { %v2926_v25 = vadd.f32 1e-05, %v2924_v39 }
 0x68c   :  { %4466 = vrsqrt.f32 %v2926_v25 }
 0x68f   :  { %v2923_v6 = vpop.xlane.xlu0 %2922 }
 0x690   :  { %v2925_v43 = vmul.f32 0.03125, %v2923_v6 }
 0x692   :  { %v2927_v2 = vadd.f32 1e-05, %v2925_v43 }
 0x694   :  { %4468 = vrsqrt.f32 %v2927_v2 }
 0x699   :  { %v4467_v49 = vpop.eup %4466 }
 0x69a   :  { %v2932_v24 = vrot.slane %v4467_v49, 1  ;;  %v2933_v11 = vrot.slane %v4467_v49, 2  ;;  %v2934_v9 = vrot.slane %v4467_v49, 3  ;;  %v2935_v44 = vrot.slane %v4467_v49, 4 }
 0x69b   :  { %v2936_v14 = vrot.slane %v4467_v49, 5  ;;  %v2937_v46 = vrot.slane %v4467_v49, 6  ;;  %v2938_v40 = vrot.slane %v4467_v49, 7  ;;  %v2962_v36 = vmul.f32 %v4467_v49, %v5348_v29 }
 0x69c   :  { %v2963_v55 = vmul.f32 %v2932_v24, %v5351_v31  ;;  %v2964_v18 = vmul.f32 %v2933_v11, %v5354_v30  ;;  %v2965_v8 = vmul.f32 %v2934_v9, %v5357_v26  ;;  %v2966_v3 = vmul.f32 %v2935_v44, %v5360_v45 }
 0x69d   :  { %v2967_v13 = vmul.f32 %v2936_v14, %v5363_v60  ;;  %v2968_v38 = vmul.f32 %v2937_v46, %v5366_v41  ;;  %v2969_v56 = vmul.f32 %v2938_v40, %v5368_v58  ;;  %v2984_v62 = vmul.f32 %v3954_v1, %v2962_v36 }
 0x69e   :  { %v2985_v29 = vmul.f32 %v3954_v1, %v2963_v55  ;;  %v2986_v21 = vmul.f32 %v3954_v1, %v2964_v18  ;;  %v2987_v31 = vmul.f32 %v3954_v1, %v2965_v8  ;;  %v2988_v19 = vmul.f32 %v3954_v1, %v2966_v3 }
 0x69f   :  { %v2989_v30 = vmul.f32 %v3954_v1, %v2967_v13  ;;  %v2990_v63 = vmul.f32 %v3954_v1, %v2968_v38  ;;  %v2991_v26 = vmul.f32 %v3954_v1, %v2969_v56  ;;  %v5463_v28 = vadd.f32 %v3955_v5, %v2984_v62 }
 0x6a0   :  { %v5465_v45 = vadd.f32 %v3955_v5, %v2985_v29  ;;  %v5467_v60 = vadd.f32 %v3955_v5, %v2986_v21  ;;  %v5469_v58 = vadd.f32 %v3955_v5, %v2987_v31  ;;  %v5471_v35 = vadd.f32 %v3955_v5, %v2988_v19 }
 0x6a1   :  { %v4469_v41 = vpop.eup %4468  ;;  %v5473_v61 = vadd.f32 %v3955_v5, %v2989_v30  ;;  %v5475_v34 = vadd.f32 %v3955_v5, %v2990_v63  ;;  %v5485_v24 = vadd.f32 %v3955_v5, %v2991_v26  ;;  %v3022_v40 = vpack.c.bf16 %v5463_v28, %v5463_v28 }
 0x6a2   :  { %v2939_v42 = vrot.slane %v4469_v41, 1  ;;  %v2940_v17 = vrot.slane %v4469_v41, 2  ;;  %v2941_v20 = vrot.slane %v4469_v41, 3  ;;  %v2942_v57 = vrot.slane %v4469_v41, 4 }
 0x6a3   :  { %v2943_v59 = vrot.slane %v4469_v41, 5  ;;  %v2944_v37 = vrot.slane %v4469_v41, 6  ;;  %v2945_v23 = vrot.slane %v4469_v41, 7  ;;  %v2970_v54 = vmul.f32 %v4469_v41, %v5390_v51 }
 0x6a4   :  { %v2971_v15 = vmul.f32 %v2939_v42, %v5393_v50  ;;  %v2972_v7 = vmul.f32 %v2940_v17, %v5396_v4  ;;  %v2973_v10 = vmul.f32 %v2941_v20, %v5400_v47  ;;  %v2974_v27 = vmul.f32 %v2942_v57, %v5403_v48 }
 0x6a5   :  { %v2975_v52 = vmul.f32 %v2943_v59, %v5406_v16  ;;  %v2976_v33 = vmul.f32 %v2944_v37, %v5410_v22  ;;  %v2977_v53 = vmul.f32 %v2945_v23, %v5413_v32  ;;  %v2992_v39 = vmul.f32 %v3954_v1, %v2970_v54 }
 0x6a6   :  { %v2993_v25 = vmul.f32 %v3954_v1, %v2971_v15  ;;  %v2994_v6 = vmul.f32 %v3954_v1, %v2972_v7  ;;  %v2995_v43 = vmul.f32 %v3954_v1, %v2973_v10  ;;  %v2996_v2 = vmul.f32 %v3954_v1, %v2974_v27 }
 0x6a7   :  { %v2997_v51 = vmul.f32 %v3954_v1, %v2975_v52  ;;  %v2998_v49 = vmul.f32 %v3954_v1, %v2976_v33  ;;  %v2999_v50 = vmul.f32 %v3954_v1, %v2977_v53  ;;  %v3023_v16 = vpack.c.bf16 %v5465_v45, %v5465_v45 }
 0x6a8   :  { %v5487_v4 = vadd.f32 %v3955_v5, %v2993_v25  ;;  %v5489_v47 = vadd.f32 %v3955_v5, %v2994_v6  ;;  %v5491_v48 = vadd.f32 %v3955_v5, %v2995_v43  ;;  %v5495_v22 = vadd.f32 %v3955_v5, %v2992_v39 }
 0x6a9   :  { %v5497_v32 = vadd.f32 %v3955_v5, %v2996_v2  ;;  %v5499_v11 = vadd.f32 %v3955_v5, %v2997_v51  ;;  %v3024_v1 = vpack.c.bf16 %v5467_v60, %v5467_v60  ;;  %v5503_v9 = vadd.f32 %v3955_v5, %v2998_v49 }
 0x6aa   :  { %v5505_v44 = vadd.f32 %v3955_v5, %v2999_v50  ;;  %v3025_v14 = vpack.c.bf16 %v5469_v58, %v5469_v58  ;;  %v3031_v46 = vpack.c.bf16 %v5487_v4, %v5487_v4  ;;  %v3026_v36 = vpack.c.bf16 %v5471_v35, %v5471_v35 }
 0x6ab   :  { %v3027_v55 = vpack.c.bf16 %v5473_v61, %v5473_v61  ;;  %v3032_v18 = vpack.c.bf16 %v5489_v47, %v5489_v47  ;;  %v3028_v8 = vpack.c.bf16 %v5475_v34, %v5475_v34  ;;  %v3029_v3 = vpack.c.bf16 %v5485_v24, %v5485_v24 }
 0x6ac   :  { %v3033_v13 = vpack.c.bf16 %v5491_v48, %v5491_v48  ;;  %v3066_v38 = vunpack.c.l.b16 %v3023_v16  ;;  %v3030_v56 = vpack.c.bf16 %v5495_v22, %v5495_v22  ;;  %v3034_v62 = vpack.c.bf16 %v5497_v32, %v5497_v32 }
 0x6ad   :  { %v3035_v5 = vpack.c.bf16 %v5499_v11, %v5499_v11  ;;  %v3067_v29 = vunpack.c.l.b16 %v3024_v1  ;;  %v3036_v21 = vpack.c.bf16 %v5503_v9, %v5503_v9  ;;  %v3037_v31 = vpack.c.bf16 %v5505_v44, %v5505_v44 }
 0x6ae   :  { %v3068_v19 = vunpack.c.l.b16 %v3025_v14  ;;  %v3074_v30 = vunpack.c.l.b16 %v3031_v46  ;;  %v3065_v63 = vunpack.c.l.b16 %v3022_v40  ;;  %v3069_v26 = vunpack.c.l.b16 %v3026_v36 }
 0x6af   :  { %v3070_v41 = vunpack.c.l.b16 %v3027_v55  ;;  %v3075_v42 = vunpack.c.l.b16 %v3032_v18  ;;  %v3071_v17 = vunpack.c.l.b16 %v3028_v8  ;;  %v3076_v20 = vunpack.c.l.b16 %v3033_v13 }
 0x6b0   :  { %v3081_v57 = vrot.slane %v3066_v38, 7  ;;  %v3083_v59 = vrot.slane %v3067_v29, 6  ;;  %v3072_v37 = vunpack.c.l.b16 %v3029_v3  ;;  %v3073_v23 = vunpack.c.l.b16 %v3030_v56  ;;  %v4394_v29 = vld [vmem:[%s5917_s12 + $0x38] sm:$0xff]  }
 0x6b1   :  { %v3077_v54 = vunpack.c.l.b16 %v3034_v62  ;;  %v3078_v15 = vunpack.c.l.b16 %v3035_v5  ;;  %v3085_v10 = vrot.slane %v3068_v19, 5  ;;  %v3095_v27 = vrot.slane %v3074_v30, 7  ;;  %4324 = vmatpush3.bf16.msra.mxu1 %v4394_v29  ;;  %v4397_v19 = vld [vmem:[%s5917_s12 + $0x20] sm:$0xff]   ;;  %v4398_v30 = vld [vmem:[%s5917_s12 + $0x18] sm:$0xff]  }
 0x6b2   :  { %v3082_v7 = vsel %vm486_vm2, %v3081_v57, %v3065_v63  ;;  %v3097_v52 = vrot.slane %v3075_v42, 6  ;;  %v3079_v33 = vunpack.c.l.b16 %v3036_v21  ;;  %v3080_v53 = vunpack.c.l.b16 %v3037_v31  ;;  %4325 = vmatprep.subr.bf16.mxu1 %v4564_v0  ;;  %v4395_v21 = vld [vmem:[%s5917_s12 + $0x30] sm:$0xff]   ;;  %v4396_v31 = vld [vmem:[%s5917_s12 + $0x28] sm:$0xff]   ;;  %v3956_v42 = vld [vmem:[#allocation5] ss:$0 sm:$0xff] }
 0x6b3   :  { %v3084_v39 = vsel %vm489_vm3, %v3083_v59, %v3082_v7  ;;  %v3087_v25 = vrot.slane %v3069_v26, 4  ;;  %v3089_v43 = vrot.slane %v3070_v41, 3  ;;  %v3096_v2 = vsel %vm486_vm2, %v3095_v27, %v3073_v23  ;;  %v4399_v63 = vld [vmem:[%s5917_s12 + $0x10] sm:$0xff]   ;;  %v4400_v26 = vld [vmem:[%s5917_s12 + $0x8] sm:$0xff]   ;;  %v4401_v41 = vld [vmem:[%s5917_s12] sm:$0xff]  }
 0x6b4   :  { %v3086_v6 = vsel %vm492_vm4, %v3085_v10, %v3084_v39  ;;  %v3099_v51 = vrot.slane %v3076_v20, 5  ;;  %v3091_v50 = vrot.slane %v3071_v17, 2  ;;  %v3098_v16 = vsel %vm489_vm3, %v3097_v52, %v3096_v2 }
 0x6b5   :  { %v3088_v49 = vsel %vm495_vm5, %v3087_v25, %v3086_v6  ;;  %v3101_v1 = vrot.slane %v3077_v54, 4  ;;  %v3103_v40 = vrot.slane %v3078_v15, 3  ;;  %v3105_v18 = vrot.slane %v3079_v33, 2  ;;  %4326 = vmatpush3.bf16.msra.mxu1 %v4395_v21 }
 0x6b6   :  { %v3090_v14 = vsel %vm498_vm6, %v3089_v43, %v3088_v49  ;;  %v3100_v46 = vsel %vm492_vm4, %v3099_v51, %v3098_v16  ;;  %v3093_v8 = vrot.slane %v3072_v37, 1  ;;  %v3107_v13 = vrot.slane %v3080_v53, 1  ;;  %4327 = vmatprep.subr.bf16.mxu1 %v4564_v0 }
 0x6b7   :  { %v3092_v36 = vsel %vm501_vm7, %v3091_v50, %v3090_v14  ;;  %v3102_v55 = vsel %vm495_vm5, %v3101_v1, %v3100_v46  ;;  %v3960_v14 = vld [vmem:[%s5918_s13] ss:$0 sm:$0xff] }
 0x6b8   :  { %v3104_v3 = vsel %vm498_vm6, %v3103_v40, %v3102_v55  ;;  %v3094_v56 = vsel %vm504_vm8, %v3093_v8, %v3092_v36 }
 0x6b9   :  { %v3106_v38 = vsel %vm501_vm7, %v3105_v18, %v3104_v3  ;;  %4328 = vmatpush3.bf16.msra.mxu1 %v4396_v31 }
 0x6ba   :  { %v3108_v62 = vsel %vm504_vm8, %v3107_v13, %v3106_v38  ;;  %4329 = vmatprep.subr.bf16.mxu1 %v4564_v0 }
 0x6bb   :  { %v3109_v5 = vpack.c.b16 %v3108_v62, %v3094_v56 }
 0x6bd   :  { %4320 = vmatmul.mubr.msk.bf16.vlgmr.msra.gmra.mxu0 %vm216_vm1, %v3109_v5  ;;  %4330 = vmatpush3.bf16.msra.mxu1 %v4397_v19 }
 0x6be   :  { %4331 = vmatprep.subr.bf16.mxu1 %v4564_v0 }
 0x6c1   :  { %4332 = vmatpush3.bf16.msra.mxu1 %v4398_v30 }
 0x6c2   :  { %4333 = vmatprep.subr.bf16.mxu1 %v4564_v0 }
 0x6c5   :  { %4334 = vmatpush3.bf16.msra.mxu1 %v4399_v63 }
 0x6c6   :  { %4335 = vmatprep.subr.bf16.mxu1 %v4564_v0 }
 0x6c9   :  { %4336 = vmatpush3.bf16.msra.mxu1 %v4400_v26 }
 0x6ca   :  { %4337 = vmatprep.subr.bf16.mxu1 %v4564_v0 }
 0x6cd   :  { %4338 = vmatpush3.bf16.msra.mxu1 %v4401_v41 }
 0x77d   :  { %v3159_v17 = vpop.f32.mrf.mxu0 }
 0x77e   :  { %v3160_v20 = vadd.f32 %v3956_v42, %v3159_v17 }
 0x77f   :  { %v4321_v57 = vpop.f32.mrf.mxu0 }
 0x780   :  { %v3166_v59 = vmul.f32 %v3160_v20, %v3160_v20 }
 0x781   :  { %v3162_v37 = vpop.f32.mrf.mxu0 }
 0x782   :  { %v3168_v23 = vmul.f32 %v3166_v59, %v3160_v20  ;;  %v3163_v54 = vadd.f32 %v3956_v42, %v3162_v37 }
 0x783   :  { %v4322_v15 = vpop.f32.mrf.mxu0 }
 0x784   :  { %v3170_v7 = vmul.f32 0.044715, %v3168_v23  ;;  %v3167_v10 = vmul.f32 %v3163_v54, %v3163_v54 }
 0x786   :  { %v3172_v27 = vadd.f32 %v3170_v7, %v3160_v20  ;;  %v3169_v52 = vmul.f32 %v3167_v10, %v3163_v54 }
 0x788   :  { %v3174_v33 = vmul.f32 0.7978846, %v3172_v27  ;;  %v3171_v53 = vmul.f32 0.044715, %v3169_v52 }
 0x78a   :  { %4470 = vtanh.f32 %v3174_v33  ;;  %v3173_v39 = vadd.f32 %v3171_v53, %v3163_v54 }
 0x78c   :  { %v3175_v25 = vmul.f32 0.7978846, %v3173_v39 }
 0x78e   :  { %4472 = vtanh.f32 %v3175_v25 }
 0x797   :  { %v4471_v0 = vpop.eup %4470 }
 0x798   :  { %v3178_v6 = vadd.f32 1.0, %v4471_v0 }
 0x79a   :  { %v3180_v2 = vmul.f32 0.5, %v3178_v6 }
 0x79b   :  { %v4473_v43 = vpop.eup %4472 }
 0x79c   :  { %v3179_v51 = vadd.f32 1.0, %v4473_v43  ;;  %v3182_v50 = vmul.f32 %v3180_v2, %v3160_v20 }
 0x79e   :  { %v3181_v49 = vmul.f32 0.5, %v3179_v51 }
 0x7a0   :  { %v3183_v16 = vmul.f32 %v3181_v49, %v3163_v54 }
 0x7a2   :  { %v3184_v1 = vpack.c.bf16 %v3183_v16, %v3182_v50 }
 0x7a4   :  { %4340 = vmatmul.mubr.bf16.vlgmr.msra.gmra.mxu1 %v3184_v1 }
 0x864   :  { %v3290_v46 = vpop.f32.mrf.mxu1 }
 0x865   :  { %v3291_v40 = vadd.f32 %v3960_v14, %v3290_v46 }
 0x866   :  { %v4341_v36 = vpop.f32.mrf.mxu1 }
 0x867   :  { %v3299_v55 = vrot.slane %v3291_v40, 1  ;;  %v3300_v18 = vrot.slane %v3291_v40, 2  ;;  %v3301_v8 = vrot.slane %v3291_v40, 3  ;;  %v3302_v3 = vrot.slane %v3291_v40, 4 }
 0x868   :  { %v3293_v13 = vpop.f32.mrf.mxu1  ;;  %v3303_v38 = vrot.slane %v3291_v40, 5  ;;  %v3304_v56 = vrot.slane %v3291_v40, 6  ;;  %v3305_v62 = vrot.slane %v3291_v40, 7  ;;  %v3329_v41 = vadd.f32 %v3291_v40, %v5463_v28 }
 0x869   :  { %v3294_v5 = vadd.f32 %v3960_v14, %v3293_v13  ;;  %v5585_v29 = vadd.f32 %v3299_v55, %v5465_v45  ;;  %v5588_v21 = vadd.f32 %v3300_v18, %v5467_v60  ;;  %v5591_v31 = vadd.f32 %v3301_v8, %v5469_v58 }
 0x86a   :  { %v4342_v19 = vpop.f32.mrf.mxu1  ;;  %v5594_v30 = vadd.f32 %v3302_v3, %v5471_v35  ;;  %v5597_v63 = vadd.f32 %v3303_v38, %v5473_v61  ;;  %v5600_v26 = vadd.f32 %v3304_v56, %v5475_v34  ;;  %v3336_v58 = vadd.f32 %v3305_v62, %v5485_v24 }
 0x86b   :  { %v3363_v45 = vrot.slane %v5585_v29, 7  ;;  %v3365_v60 = vrot.slane %v5588_v21, 6  ;;  %v3306_v42 = vrot.slane %v3294_v5, 1  ;;  %v3367_v17 = vrot.slane %v5591_v31, 5 }
 0x86c   :  { %v3369_v35 = vrot.slane %v5594_v30, 4  ;;  %v3371_v20 = vrot.slane %v5597_v63, 3  ;;  %v3307_v57 = vrot.slane %v3294_v5, 2  ;;  %v3308_v34 = vrot.slane %v3294_v5, 3 }
 0x86d   :  { %v3364_v61 = vsel %vm486_vm2, %v3363_v45, %v3329_v41  ;;  %v3309_v59 = vrot.slane %v3294_v5, 4  ;;  %v3373_v37 = vrot.slane %v5600_v26, 2  ;;  %v3310_v23 = vrot.slane %v3294_v5, 5 }
 0x86e   :  { %v3366_v28 = vsel %vm489_vm3, %v3365_v60, %v3364_v61  ;;  %v3311_v54 = vrot.slane %v3294_v5, 6  ;;  %v3312_v24 = vrot.slane %v3294_v5, 7  ;;  %v5614_v7 = vadd.f32 %v3306_v42, %v5487_v4 }
 0x86f   :  { %v3368_v15 = vsel %vm492_vm4, %v3367_v17, %v3366_v28  ;;  %v5617_v10 = vadd.f32 %v3307_v57, %v5489_v47  ;;  %v3375_v52 = vrot.slane %v3336_v58, 1  ;;  %v5621_v33 = vadd.f32 %v3308_v34, %v5491_v48 }
 0x870   :  { %v3370_v27 = vsel %vm495_vm5, %v3369_v35, %v3368_v15  ;;  %v5624_v53 = vadd.f32 %v3309_v59, %v5497_v32  ;;  %v5628_v25 = vadd.f32 %v3294_v5, %v5495_v22  ;;  %v5631_v4 = vadd.f32 %v3310_v23, %v5499_v11 }
 0x871   :  { %v3372_v39 = vsel %vm498_vm6, %v3371_v20, %v3370_v27  ;;  %v3377_v47 = vrot.slane %v5614_v7, 7  ;;  %v5636_v6 = vadd.f32 %v3311_v54, %v5503_v9  ;;  %v3379_v48 = vrot.slane %v5617_v10, 6 }
 0x872   :  { %v3374_v0 = vsel %vm501_vm7, %v3373_v37, %v3372_v39  ;;  %v5641_v43 = vadd.f32 %v3312_v24, %v5505_v44  ;;  %v3381_v11 = vrot.slane %v5621_v33, 5  ;;  %v3383_v49 = vrot.slane %v5624_v53, 4 }
 0x873   :  { %v3376_v32 = vsel %vm504_vm8, %v3375_v52, %v3374_v0  ;;  %v3378_v22 = vsel %vm486_vm2, %v3377_v47, %v5628_v25  ;;  %v3385_v50 = vrot.slane %v5631_v4, 3  ;;  %v3387_v44 = vrot.slane %v5636_v6, 2 }
 0x874   :  { %v3393_v2 = vsel %vm216_vm1, %v3376_v32, 0.0  ;;  %v3380_v51 = vsel %vm489_vm3, %v3379_v48, %v3378_v22  ;;  %v3389_v14 = vrot.slane %v5641_v43, 1 }
 0x875   :  { %3394 = vadd.xlane.f32.xlu1 %v3393_v2  ;;  %v3382_v9 = vsel %vm492_vm4, %v3381_v11, %v3380_v51 }
 0x876   :  { %v3384_v16 = vsel %vm495_vm5, %v3383_v49, %v3382_v9 }
 0x877   :  { %v3386_v1 = vsel %vm498_vm6, %v3385_v50, %v3384_v16 }
 0x878   :  { %v3388_v46 = vsel %vm501_vm7, %v3387_v44, %v3386_v1 }
 0x879   :  { %v3390_v40 = vsel %vm504_vm8, %v3389_v14, %v3388_v46 }
 0x87a   :  { %v3396_v36 = vsel %vm216_vm1, %v3390_v40, 0.0 }
 0x87b   :  { %3397 = vadd.xlane.f32.xlu0 %v3396_v36 }
 0x8fe   :  { %v3395_v55 = vpop.xlane.xlu1 %3394 }
 0x8ff   :  { %v3399_v18 = vmul.f32 0.03125, %v3395_v55 }
 0x901   :  { %v3403_v8 = vrot.slane %v3399_v18, 1  ;;  %v3404_v3 = vrot.slane %v3399_v18, 2  ;;  %v3405_v13 = vrot.slane %v3399_v18, 3  ;;  %v3406_v38 = vrot.slane %v3399_v18, 4 }
 0x902   :  { %v3407_v56 = vrot.slane %v3399_v18, 5  ;;  %v3408_v62 = vrot.slane %v3399_v18, 6  ;;  %v3409_v5 = vrot.slane %v3399_v18, 7  ;;  %v5658_v19 = vsub.f32 %v3329_v41, %v3399_v18 }
 0x903   :  { %v5661_v45 = vsub.f32 %v5585_v29, %v3403_v8  ;;  %v5664_v60 = vsub.f32 %v5588_v21, %v3404_v3  ;;  %v5667_v42 = vsub.f32 %v5591_v31, %v3405_v13  ;;  %v5670_v17 = vsub.f32 %v5594_v30, %v3406_v38 }
 0x904   :  { %v3398_v35 = vpop.xlane.xlu0 %3397  ;;  %v5673_v20 = vsub.f32 %v5597_v63, %v3407_v56  ;;  %v5676_v61 = vsub.f32 %v5600_v26, %v3408_v62  ;;  %v5678_v41 = vsub.f32 %v3336_v58, %v3409_v5  ;;  %v3449_v57 = vmul.f32 %v5658_v19, %v5658_v19 }
 0x905   :  { %v3400_v29 = vmul.f32 0.03125, %v3398_v35  ;;  %v3450_v21 = vmul.f32 %v5661_v45, %v5661_v45  ;;  %v3451_v31 = vmul.f32 %v5664_v60, %v5664_v60  ;;  %v3452_v30 = vmul.f32 %v5667_v42, %v5667_v42 }
 0x906   :  { %v3453_v63 = vmul.f32 %v5670_v17, %v5670_v17  ;;  %v3454_v26 = vmul.f32 %v5673_v20, %v5673_v20  ;;  %v3455_v58 = vmul.f32 %v5676_v61, %v5676_v61  ;;  %v3456_v34 = vmul.f32 %v5678_v41, %v5678_v41 }
 0x907   :  { %v3481_v59 = vrot.slane %v3450_v21, 7  ;;  %v3483_v28 = vrot.slane %v3451_v31, 6  ;;  %v3410_v37 = vrot.slane %v3400_v29, 1  ;;  %v3485_v23 = vrot.slane %v3452_v30, 5 }
 0x908   :  { %v3487_v54 = vrot.slane %v3453_v63, 4  ;;  %v3489_v15 = vrot.slane %v3454_v26, 3  ;;  %v3491_v24 = vrot.slane %v3455_v58, 2  ;;  %v3411_v52 = vrot.slane %v3400_v29, 2 }
 0x909   :  { %v3482_v27 = vsel %vm486_vm2, %v3481_v59, %v3449_v57  ;;  %v3412_v39 = vrot.slane %v3400_v29, 3  ;;  %v3413_v47 = vrot.slane %v3400_v29, 4  ;;  %v3414_v48 = vrot.slane %v3400_v29, 5 }
 0x90a   :  { %v3484_v0 = vsel %vm489_vm3, %v3483_v28, %v3482_v27  ;;  %v3415_v32 = vrot.slane %v3400_v29, 6  ;;  %v3416_v22 = vrot.slane %v3400_v29, 7  ;;  %v5700_v2 = vsub.f32 %v5628_v25, %v3400_v29 }
 0x90b   :  { %v3486_v11 = vsel %vm492_vm4, %v3485_v23, %v3484_v0  ;;  %v5703_v51 = vsub.f32 %v5614_v7, %v3410_v37  ;;  %v5706_v49 = vsub.f32 %v5617_v10, %v3411_v52  ;;  %v5710_v50 = vsub.f32 %v5621_v33, %v3412_v39 }
 0x90c   :  { %v3488_v9 = vsel %vm495_vm5, %v3487_v54, %v3486_v11  ;;  %v5713_v16 = vsub.f32 %v5624_v53, %v3413_v47  ;;  %v5716_v44 = vsub.f32 %v5631_v4, %v3414_v48  ;;  %v3493_v1 = vrot.slane %v3456_v34, 1 }
 0x90d   :  { %v3490_v25 = vsel %vm498_vm6, %v3489_v15, %v3488_v9  ;;  %v5720_v7 = vsub.f32 %v5636_v6, %v3415_v32  ;;  %v5723_v10 = vsub.f32 %v5641_v43, %v3416_v22  ;;  %v3458_v33 = vmul.f32 %v5703_v51, %v5703_v51  ;;  %v5755_v15 = vld [vmem:[%s5919_s14] ss:$0 sm:$0xff]  ;;  %s4568_s14 = smov [#allocation7]  }
 0x90e   :  { %v3492_v14 = vsel %vm501_vm7, %v3491_v24, %v3490_v25  ;;  %v3459_v53 = vmul.f32 %v5706_v49, %v5706_v49  ;;  %v3460_v4 = vmul.f32 %v5710_v50, %v5710_v50  ;;  %v3457_v6 = vmul.f32 %v5700_v2, %v5700_v2  ;;  %v5761_v22 = vld [vmem:[%s5920_s15] ss:$0 sm:$0xff]  ;;  %s3841_s15 = sshll.u32 %s4568_s14, 4  ;;  %s3842_s15 = int_to_ptr.vmem [resolvable:$true] %s3841_s15 }
 0x90f   :  { %v3494_v46 = vsel %vm504_vm8, %v3493_v1, %v3492_v14  ;;  %v3461_v43 = vmul.f32 %v5713_v16, %v5713_v16  ;;  %v3462_v36 = vmul.f32 %v5716_v44, %v5716_v44  ;;  %v3495_v55 = vrot.slane %v3458_v33, 7  ;;  %s4534_s22 = scalar_lea.vmem %s3842_s15, 128  ;;  %p4539_p11 = scmp.lt.s32.totalorder %s3842_s15, %s3842_s15 }
 0x910   :  { %v3511_v40 = vsel %vm216_vm1, %v3494_v46, 0.0  ;;  %v3497_v18 = vrot.slane %v3459_v53, 6  ;;  %v3463_v8 = vmul.f32 %v5720_v7, %v5720_v7  ;;  %v3464_v3 = vmul.f32 %v5723_v10, %v5723_v10  ;;  %p4535_p10 = scmp.ne.s32.totalorder %s3842_s15, %s4534_s22  ;;  %p4540_p12 = scmp.lt.s32.totalorder %s4534_s22, %s4534_s22 }
 0x911   :  { %3512 = vadd.xlane.f32.xlu1 %v3511_v40  ;;  %v3496_v13 = vsel %vm486_vm2, %v3495_v55, %v3457_v6  ;;  %v3499_v38 = vrot.slane %v3460_v4, 5  ;;  %v3501_v62 = vrot.slane %v3461_v43, 4  ;;  %v3503_v35 = vrot.slane %v3462_v36, 3 }
 0x912   :  { %v3498_v56 = vsel %vm489_vm3, %v3497_v18, %v3496_v13  ;;  %v3505_v21 = vrot.slane %v3463_v8, 2  ;;  %v3507_v30 = vrot.slane %v3464_v3, 1  ;;  %p4541_p13 = por %p4540_p12, %p4539_p11 }
 0x913   :  { %v3500_v5 = vsel %vm492_vm4, %v3499_v38, %v3498_v56 }
 0x914   :  { %v3502_v29 = vsel %vm495_vm5, %v3501_v62, %v3500_v5  ;;  %p4542_p0 = pnand %p4541_p13, %p4535_p10 }
 0x915   :  { %v3504_v31 = vsel %vm498_vm6, %v3503_v35, %v3502_v29 }
 0x916   :  { %v3506_v57 = vsel %vm501_vm7, %v3505_v21, %v3504_v31 }
 0x917   :  { %v3508_v63 = vsel %vm504_vm8, %v3507_v30, %v3506_v57 }
 0x918   :  { %v3514_v26 = vsel %vm216_vm1, %v3508_v63, 0.0 }
 0x919   :  { %3515 = vadd.xlane.f32.xlu0 %v3514_v26 }
 0x99a   :  { %v3513_v58 = vpop.xlane.xlu1 %3512 }
 0x99b   :  { %v3517_v34 = vmul.f32 0.03125, %v3513_v58 }
 0x99d   :  { %v3519_v59 = vadd.f32 1e-05, %v3517_v34 }
 0x99f   :  { %4474 = vrsqrt.f32 %v3519_v59 }
 0x9a2   :  { %v3516_v28 = vpop.xlane.xlu0 %3515 }
 0x9a3   :  { %v3518_v37 = vmul.f32 0.03125, %v3516_v28 }
 0x9a5   :  { %v3520_v23 = vadd.f32 1e-05, %v3518_v37 }
 0x9a7   :  { %4476 = vrsqrt.f32 %v3520_v23 }
 0x9ac   :  { %v4475_v54 = vpop.eup %4474 }
 0x9ad   :  { %v3525_v24 = vrot.slane %v4475_v54, 1  ;;  %v3526_v27 = vrot.slane %v4475_v54, 2  ;;  %v3527_v52 = vrot.slane %v4475_v54, 3  ;;  %v3528_v39 = vrot.slane %v4475_v54, 4 }
 0x9ae   :  { %v3529_v47 = vrot.slane %v4475_v54, 5  ;;  %v3530_v0 = vrot.slane %v4475_v54, 6  ;;  %v3531_v48 = vrot.slane %v4475_v54, 7  ;;  %v3555_v32 = vmul.f32 %v4475_v54, %v5658_v19 }
 0x9af   :  { %v3556_v11 = vmul.f32 %v3525_v24, %v5661_v45  ;;  %v3557_v9 = vmul.f32 %v3526_v27, %v5664_v60  ;;  %v3558_v25 = vmul.f32 %v3527_v52, %v5667_v42  ;;  %v3559_v1 = vmul.f32 %v3528_v39, %v5670_v17 }
 0x9b0   :  { %v3560_v14 = vmul.f32 %v3529_v47, %v5673_v20  ;;  %v3561_v33 = vmul.f32 %v3530_v0, %v5676_v61  ;;  %v3562_v53 = vmul.f32 %v3531_v48, %v5678_v41  ;;  %v3577_v19 = vmul.f32 %v5755_v15, %v3555_v32 }
 0x9b1   :  { %v3578_v4 = vmul.f32 %v5755_v15, %v3556_v11  ;;  %v3579_v46 = vmul.f32 %v5755_v15, %v3557_v9  ;;  %v3580_v45 = vmul.f32 %v5755_v15, %v3558_v25  ;;  %v3581_v60 = vmul.f32 %v5755_v15, %v3559_v1  ;;  %v3634_v11 = vld [vmem:[#allocation7] sm:$0x1]  ;;  %v3637_v9 = vld [vmem:[#allocation7 + $0x1] sm:$0x1]  ;;  %v3640_v25 = vld [vmem:[#allocation7 + $0x2] sm:$0x1] }
 0x9b2   :  { %v3582_v42 = vmul.f32 %v5755_v15, %v3560_v14  ;;  %v3583_v17 = vmul.f32 %v5755_v15, %v3561_v33  ;;  %v3584_v20 = vmul.f32 %v5755_v15, %v3562_v53  ;;  %v5779_v61 = vadd.f32 %v5761_v22, %v3577_v19  ;;  %v3643_v19 = vld [vmem:[#allocation7 + $0x3] sm:$0x1] }
 0x9b3   :  { %v5782_v41 = vadd.f32 %v5761_v22, %v3578_v4  ;;  %v5785_v6 = vadd.f32 %v5761_v22, %v3579_v46  ;;  %v5788_v43 = vadd.f32 %v5761_v22, %v3580_v45  ;;  %v5791_v40 = vadd.f32 %v5761_v22, %v3581_v60  ;;  %v3646_v4 = vld [vmem:[#allocation7 + $0x4] sm:$0x1]  ;;  %v3649_v46 = vld [vmem:[#allocation7 + $0x5] sm:$0x1] }
 0x9b4   :  { %v5794_v36 = vadd.f32 %v5761_v22, %v3582_v42  ;;  %v5797_v55 = vadd.f32 %v5761_v22, %v3583_v17  ;;  %v5800_v18 = vadd.f32 %v5761_v22, %v3584_v20  ;;  %v3615_v8 = vpack.c.bf16 %v5779_v61, %v5779_v61  ;;  %v4477_v3 = vpop.eup %4476  ;;  %v3652_v17 = vld [vmem:[#allocation7 + $0x6] sm:$0x1]  ;;  %v3655_v20 = vld [vmem:[#allocation7 + $0x7] sm:$0x1] }
 0x9b5   :  { %v3616_v13 = vpack.c.bf16 %v5782_v41, %v5782_v41  ;;  %v3617_v38 = vpack.c.bf16 %v5785_v6, %v5785_v6  ;;  %v3618_v56 = vpack.c.bf16 %v5788_v43, %v5788_v43  ;;  %v3619_v62 = vpack.c.bf16 %v5791_v40, %v5791_v40 }
 0x9b6   :  { %v3532_v5 = vrot.slane %v4477_v3, 1  ;;  %v3533_v35 = vrot.slane %v4477_v3, 2  ;;  %v3534_v29 = vrot.slane %v4477_v3, 3  ;;  %v3535_v21 = vrot.slane %v4477_v3, 4 }
 0x9b7   :  { %v3536_v31 = vrot.slane %v4477_v3, 5  ;;  %v3537_v30 = vrot.slane %v4477_v3, 6  ;;  %v3538_v57 = vrot.slane %v4477_v3, 7  ;;  %v3563_v63 = vmul.f32 %v4477_v3, %v5700_v2 }
 0x9b8   :  { %v3564_v26 = vmul.f32 %v3532_v5, %v5703_v51  ;;  %v3565_v58 = vmul.f32 %v3533_v35, %v5706_v49  ;;  %v3566_v34 = vmul.f32 %v3534_v29, %v5710_v50  ;;  %v3567_v59 = vmul.f32 %v3535_v21, %v5713_v16 }
 0x9b9   :  { %v3568_v28 = vmul.f32 %v3536_v31, %v5716_v44  ;;  %v3569_v37 = vmul.f32 %v3537_v30, %v5720_v7  ;;  %v3570_v23 = vmul.f32 %v3538_v57, %v5723_v10  ;;  %v3585_v54 = vmul.f32 %v5755_v15, %v3563_v63 }
 0x9ba   :  { %v3586_v24 = vmul.f32 %v5755_v15, %v3564_v26  ;;  %v3587_v2 = vmul.f32 %v5755_v15, %v3565_v58  ;;  %v3588_v51 = vmul.f32 %v5755_v15, %v3566_v34  ;;  %v3589_v49 = vmul.f32 %v5755_v15, %v3567_v59 }
 0x9bb   :  { %v3590_v50 = vmul.f32 %v5755_v15, %v3568_v28  ;;  %v3591_v16 = vmul.f32 %v5755_v15, %v3569_v37  ;;  %v3592_v44 = vmul.f32 %v5755_v15, %v3570_v23  ;;  %v3607_v7 = vadd.f32 %v5761_v22, %v3585_v54 }
 0x9bc   :  { %v3608_v10 = vadd.f32 %v5761_v22, %v3586_v24  ;;  %v3609_v27 = vadd.f32 %v5761_v22, %v3587_v2  ;;  %v3610_v52 = vadd.f32 %v5761_v22, %v3588_v51  ;;  %v3611_v39 = vadd.f32 %v5761_v22, %v3589_v49 }
 0x9bd   :  { %v3612_v0 = vadd.f32 %v5761_v22, %v3590_v50  ;;  %v3613_v15 = vadd.f32 %v5761_v22, %v3591_v16  ;;  %v3614_v48 = vadd.f32 %v5761_v22, %v3592_v44  ;;  %v3620_v32 = vpack.c.bf16 %v5794_v36, %v5794_v36 }
 0x9be   :  { %v3621_v1 = vpack.c.bf16 %v5797_v55, %v5797_v55  ;;  %v3622_v14 = vpack.c.bf16 %v5800_v18, %v5800_v18  ;;  %v3623_v33 = vpack.c.bf16 %v3607_v7, %v3607_v7  ;;  %v3624_v53 = vpack.c.bf16 %v3608_v10, %v3608_v10 }
 0x9bf   :  { %v3625_v45 = vpack.c.bf16 %v3609_v27, %v3609_v27  ;;  %v3626_v60 = vpack.c.bf16 %v3610_v52, %v3610_v52  ;;  %v3627_v22 = vpack.c.bf16 %v3611_v39, %v3611_v39  ;;  %v3628_v42 = vpack.c.bf16 %v3612_v0, %v3612_v0 }
 0x9c0   :  { %v3629_v61 = vpack.c.bf16 %v3613_v15, %v3613_v15  ;;  %v3630_v41 = vpack.c.bf16 %v3614_v48, %v3614_v48  ;;  %v3635_v6 = vsel %vm5835_vm13, %v3615_v8, %v3634_v11  ;;  %v3638_v43 = vsel %vm5835_vm13, %v3616_v13, %v3637_v9 }
 0x9c1   :  { %3636 = vst [vmem:[#allocation7] sm:$0x1] %v3635_v6  ;;  %3639 = vst [vmem:[#allocation7 + $0x1] sm:$0x1] %v3638_v43  ;;  %v3641_v40 = vsel %vm5835_vm13, %v3617_v38, %v3640_v25  ;;  %v3644_v36 = vsel %vm5835_vm13, %v3618_v56, %v3643_v19  ;;  %v3647_v55 = vsel %vm5835_vm13, %v3619_v62, %v3646_v4 }
 0x9c2   :  { %v3650_v18 = vsel %vm5835_vm13, %v3620_v32, %v3649_v46  ;;  %3642 = vst [vmem:[#allocation7 + $0x2] sm:$0x1] %v3641_v40  ;;  %3645 = vst [vmem:[#allocation7 + $0x3] sm:$0x1] %v3644_v36  ;;  %v3653_v8 = vsel %vm5835_vm13, %v3621_v1, %v3652_v17  ;;  %v3656_v3 = vsel %vm5835_vm13, %v3622_v14, %v3655_v20 }
 0x9c3   :  { %3648 = vst [vmem:[#allocation7 + $0x4] sm:$0x1] %v3647_v55  ;;  %3651 = vst [vmem:[#allocation7 + $0x5] sm:$0x1] %v3650_v18  ;;  %v3672_v13 = vrot.slane %v3623_v33, %v4812_v12  ;;  %v3686_v38 = vrot.slane %v3624_v53, %v4812_v12  ;;  %v3700_v56 = vrot.slane %v3625_v45, %v4812_v12 }
 0x9c4   :  { %3654 = vst [vmem:[#allocation7 + $0x6] sm:$0x1] %v3653_v8  ;;  %3657 = vst [vmem:[#allocation7 + $0x7] sm:$0x1] %v3656_v3  ;;  %v3714_v62 = vrot.slane %v3626_v60, %v4812_v12  ;;  %v3728_v5 = vrot.slane %v3627_v22, %v4812_v12  ;;  %v3742_v35 = vrot.slane %v3628_v42, %v4812_v12 }
 0x9c5   :  { %v3679_v29 = vrot.slane %v3672_v13, %v4812_v12  ;;  %v3693_v21 = vrot.slane %v3686_v38, %v4812_v12  ;;  %v3756_v31 = vrot.slane %v3629_v61, %v4812_v12  ;;  %v3770_v30 = vrot.slane %v3630_v41, %v4812_v12 }
 0x9c6   :  { %v3707_v57 = vrot.slane %v3700_v56, %v4812_v12  ;;  %v3721_v63 = vrot.slane %v3714_v62, %v4812_v12  ;;  %v3735_v26 = vrot.slane %v3728_v5, %v4812_v12  ;;  %v3749_v58 = vrot.slane %v3742_v35, %v4812_v12 }
 0x9c7   :  { %v3763_v34 = vrot.slane %v3756_v31, %v4812_v12  ;;  %v3777_v59 = vrot.slane %v3770_v30, %v4812_v12  ;;  %v3779_v28 = vshll.u32 %v3679_v29, 16  ;;  %v3782_v37 = vshll.u32 %v3693_v21, 16 }
 0x9c8   :  { %v3785_v54 = vshll.u32 %v3707_v57, 16  ;;  %v3788_v24 = vshll.u32 %v3721_v63, 16  ;;  %v3791_v2 = vshll.u32 %v3735_v26, 16  ;;  %v3794_v51 = vshll.u32 %v3749_v58, 16  ;;  %v3812_v16 = vld [vmem:[#allocation7] sm:$0x1] }
 0x9c9   :  { %v3797_v49 = vshll.u32 %v3763_v34, 16  ;;  %v3800_v50 = vshll.u32 %v3777_v59, 16  ;;  %v3815_v44 = vld [vmem:[#allocation7 + $0x1] sm:$0x1]  ;;  %v3813_v12 = vsel %vm5882_vm14, %v3779_v28, %v3812_v16  ;;  %v3818_v10 = vld [vmem:[#allocation7 + $0x2] sm:$0x1] }
 0x9ca   :  { %v3816_v7 = vsel %vm5882_vm14, %v3782_v37, %v3815_v44  ;;  %v3821_v27 = vld [vmem:[#allocation7 + $0x3] sm:$0x1]  ;;  %v3824_v52 = vld [vmem:[#allocation7 + $0x4] sm:$0x1]  ;;  %3814 = vst [vmem:[#allocation7] sm:$0x1] %v3813_v12  ;;  %v3819_v39 = vsel %vm5882_vm14, %v3785_v54, %v3818_v10 }
 0x9cb   :  { %3817 = vst [vmem:[#allocation7 + $0x1] sm:$0x1] %v3816_v7  ;;  %v3822_v47 = vsel %vm5882_vm14, %v3788_v24, %v3821_v27  ;;  %v3825_v0 = vsel %vm5882_vm14, %v3791_v2, %v3824_v52  ;;  %v3827_v15 = vld [vmem:[#allocation7 + $0x5] sm:$0x1]  ;;  %v3830_v48 = vld [vmem:[#allocation7 + $0x6] sm:$0x1] }
 0x9cc   :  { %v3833_v32 = vld [vmem:[#allocation7 + $0x7] sm:$0x1]  ;;  %3820 = vst [vmem:[#allocation7 + $0x2] sm:$0x1] %v3819_v39  ;;  %3823 = vst [vmem:[#allocation7 + $0x3] sm:$0x1] %v3822_v47  ;;  %v3828_v11 = vsel %vm5882_vm14, %v3794_v51, %v3827_v15  ;;  %v3831_v9 = vsel %vm5882_vm14, %v3797_v49, %v3830_v48 }
 0x9cd   :  { %3826 = vst [vmem:[#allocation7 + $0x4] sm:$0x1] %v3825_v0  ;;  %v3834_v25 = vsel %vm5882_vm14, %v3800_v50, %v3833_v32  ;;  %3829 = vst [vmem:[#allocation7 + $0x5] sm:$0x1] %v3828_v11 }
 0x9ce   :  { %3832 = vst [vmem:[#allocation7 + $0x6] sm:$0x1] %v3831_v9  ;;  %3835 = vst [vmem:[#allocation7 + $0x7] sm:$0x1] %v3834_v25 }
 0x9cf   :  { %4545 = shalt.err (!%p4542_p0)
}
 0x9d0   :  { %s4569_s23 = smov 16   ;;  %s4570_s11 = smov 1  }
 0x9d1   :  { %3847 = dma.vmem_to_hbm [thread:$0]  %s3842_s15, 128, %s5921_s16, [#allocation4], %s4569_s23, %s4569_s23, %s4570_s11  }
 0x9d2   :  { %4558 = dma.done.wait [#allocation4], 128  }
 0x9d3   :  { %4559 = vsyncadd [#allocation4], 4294967168 }
 0x9d4   :  { %3851 = vsyncpa [#allocation3], 1 }
 0x9d5   :  { %3852 = vsyncpa [#allocation6], 1 }
 0x9d6   :  { %3853 = vsyncpa [#allocation4], 1 }

// kernel: tpu_custom_call.1
= control target key start
LH: loop header
LB: loop body
LE: loop exit
PB: predicated region body
PF: predicated region fallthrough
CT: control target
= control target key end

     0   :  { %s5905_s0 = inlined_call_operand.hbm [shape: bf16[2,8,16,32], index: 0, kind: input, shape index: {}]   ;;  %s5906_s1 = inlined_call_operand.vmem [shape: f32[2,8,16], index: 1, kind: input, shape index: {}]   ;;  %s5907_s2 = inlined_call_operand.vmem [shape: bf16[32,32], index: 2, kind: input, shape index: {}]   ;;  %s5908_s3 = inlined_call_operand.vmem [shape: f32[1,32], index: 3, kind: input, shape index: {}]   ;;  %s5909_s4 = inlined_call_operand.vmem [shape: bf16[32,64], index: 4, kind: input, shape index: {}]   ;;  %s5910_s5 = inlined_call_operand.vmem [shape: f32[1,64], index: 5, kind: input, shape index: {}]   ;;  %s5911_s6 = inlined_call_operand.vmem [shape: bf16[32,32], index: 6, kind: input, shape index: {}]   ;;  %s5912_s7 = inlined_call_operand.vmem [shape: f32[1,32], index: 7, kind: input, shape index: {}]   ;;  %s5913_s8 = inlined_call_operand.vmem [shape: f32[1,32], index: 8, kind: input, shape index: {}]   ;;  %s5914_s9 = inlined_call_operand.vmem [shape: f32[1,32], index: 9, kind: input, shape index: {}]   ;;  %s5915_s10 = inlined_call_operand.vmem [shape: bf16[32,128], index: 10, kind: input, shape index: {}]   ;;  %s5916_s11 = inlined_call_operand.hbm [shape: f32[1,128], index: 11, kind: input, shape index: {}]   ;;  %s5917_s12 = inlined_call_operand.vmem [shape: bf16[128,32], index: 12, kind: input, shape index: {}]   ;;  %s5918_s13 = inlined_call_operand.vmem [shape: f32[1,32], index: 13, kind: input, shape index: {}]   ;;  %s5919_s14 = inlined_call_operand.vmem [shape: f32[1,32], index: 14, kind: input, shape index: {}]   ;;  %s5920_s15 = inlined_call_operand.vmem [shape: f32[1,32], index: 15, kind: input, shape index: {}]   ;;  %s5921_s16 = inlined_call_operand.hbm [shape: bf16[8,2,32], index: 16, kind: output, shape index: {}]  }
   0x1   :  { %5922 = sst [smem:[#allocation11_spill]] %s5905_s0 }
   0x2   :  { %21 = vsyncpa [#allocation3], 0 }
   0x3   :  { %22 = vsyncpa [#allocation6], 0 }
   0x4   :  { %23 = vsyncpa [#allocation4], 0  ;;  %s4560_s21 = smov [#allocation2]  }
   0x5   :  { %s29_s22 = sshll.u32 %s4560_s21, 4  ;;  %s30_s22 = int_to_ptr.vmem [resolvable:$true] %s29_s22 }
   0x6   :  { %s4502_s23 = scalar_lea.vmem %s30_s22, 2048  ;;  %p4507_p1 = scmp.lt.s32.totalorder %s30_s22, %s30_s22 }
   0x7   :  { %p4503_p0 = scmp.ne.s32.totalorder %s30_s22, %s4502_s23  ;;  %p4508_p2 = scmp.lt.s32.totalorder %s4502_s23, %s4502_s23 }
   0x9   :  { %p4509_p3 = por %p4508_p2, %p4507_p1 }
   0xb   :  { %p4510_p4 = pnand %p4509_p3, %p4503_p0 }
   0xd   :  { %4513 = shalt.err (!%p4510_p4)
}
   0xe   :  { %s4561_s24 = smov 64   ;;  %s4562_s25 = smov 4  }
   0xf   :  { %s5923_s28 = sld [smem:[#allocation11_spill]]  ;;  %s4563_s29 = smov [#allocation5]  }
  0x10   :  { %s62_s30 = sshll.u32 %s4563_s29, 4  ;;  %s63_s30 = int_to_ptr.vmem [resolvable:$true] %s62_s30 }
  0x11   :  { %s4522_s0 = scalar_lea.vmem %s63_s30, 16  ;;  %s4526_s17 = scalar_lea.vmem %s63_s30, 32 }
  0x12   :  { %p4523_p5 = scmp.ne.s32.totalorder %s63_s30, %s4522_s0  ;;  %p4527_p6 = scmp.lt.s32.totalorder %s63_s30, %s63_s30 }
  0x13   :  { %p4528_p7 = scmp.lt.s32.totalorder %s4526_s17, %s4522_s0 }
  0x15   :  { %35 = dma.hbm_to_vmem [thread:$0]  %s5923_s28, 2048, %s30_s22, [#allocation3], %s4561_s24, %s4561_s24, %s4562_s25  }
  0x16   :  { %p4529_p8 = por %p4528_p7, %p4527_p6 }
  0x18   :  { %p4530_p9 = pnand %p4529_p8, %p4523_p5 }
  0x1a   :  { %4533 = shalt.err (!%p4530_p9)
}
  0x1b   :  { %65 = dma.hbm_to_vmem [thread:$0]  %s5916_s11, 16, %s63_s30, [#allocation6]  }
  0x1c   :  { %4554 = dma.done.wait [#allocation3], 2048  }
  0x1d   :  { %4555 = vsyncadd [#allocation3], 4294965248 }
  0x1e   :  { %4556 = dma.done.wait [#allocation6], 16  }
  0x1f   :  { %4557 = vsyncadd [#allocation6], 4294967280  ;;  %v4564_v0 = vmov 0.0   ;;  %vm4565_vm0 = vmmov 0   ;;  %v4354_v1 = vld [vmem:[%s5909_s4 + $0x8] sm:$0xff]   ;;  %v4355_v2 = vld [vmem:[%s5909_s4] sm:$0xff]  }
  0x20   :  { %4115 = vmatprep.subr.bf16.mxu1 %v4564_v0  ;;  %4117 = vmatprep.mubr.msk.bf16.mxu1 %vm4565_vm0, %v4564_v0  ;;  %vm216_vm1 = vcmask 261120   ;;  %v4671_v3 = vld [vmem:[#allocation2] sm:$0xf]  ;;  %v82_v4 = vld [vmem:[#allocation2 + $0x4] sm:$0xf]  ;;  %v4360_v11 = vld [vmem:[%s5907_s2 + $0x8] sm:$0xff]  }
  0x21   :  { %4071 = vmatprep.subr.bf16.mxu0 %v4354_v1  ;;  %v83_v5 = vld [vmem:[#allocation2 + $0x8] sm:$0xf]  ;;  %v3855_v6 = vcombine.low %v4671_v3, %v82_v4  ;;  %v84_v7 = vld [vmem:[#allocation2 + $0xc] sm:$0xf]  ;;  %v85_v8 = vld [vmem:[#allocation2 + $0x10] sm:$0xf]  ;;  %v3890_v41 = vcombine.low %v4671_v3, %v4671_v3 }
  0x22   :  { %4072 = vmatpush3.bf16.msra.mxu0 %v4354_v1  ;;  %v86_v9 = vld [vmem:[#allocation2 + $0x14] sm:$0xf]  ;;  %v3856_v10 = vcombine.low %v83_v5, %v84_v7  ;;  %v87_v13 = vld [vmem:[#allocation2 + $0x18] sm:$0xf]  ;;  %v88_v14 = vld [vmem:[#allocation2 + $0x1c] sm:$0xf]  ;;  %v3891_v34 = vcombine.low %v83_v5, %v83_v5  ;;  %v3892_v39 = vcombine.low %v85_v8, %v85_v8 }
  0x23   :  { %4073 = vmatprep.subr.bf16.mxu0 %v4355_v2  ;;  %4075 = vmatprep.mubr.msk.bf16.mxu0 %vm216_vm1, %v3855_v6  ;;  %v3857_v12 = vcombine.low %v85_v8, %v86_v9  ;;  %v4377_v15 = vld [vmem:[%s5907_s2] sm:$0xff]   ;;  %v3858_v18 = vcombine.low %v87_v13, %v88_v14  ;;  %v4689_v20 = vld [vmem:[#allocation2 + $0x28] sm:$0xf]  ;;  %v92_v21 = vld [vmem:[#allocation2 + $0x2c] sm:$0xf]  ;;  %v3893_v46 = vcombine.low %v87_v13, %v87_v13  ;;  %v469_v51 = vunpack.c.l.b16 %v3890_v41 }
  0x24   :  { %v4684_v16 = vld [vmem:[#allocation2 + $0x20] sm:$0xf]  ;;  %v90_v17 = vld [vmem:[#allocation2 + $0x24] sm:$0xf]  ;;  %v4693_v22 = vld [vmem:[#allocation2 + $0x30] sm:$0xf]  ;;  %v3860_v24 = vcombine.low %v4689_v20, %v92_v21  ;;  %v470_v42 = vunpack.c.l.b16 %v3891_v34  ;;  %v471_v48 = vunpack.c.l.b16 %v3892_v39  ;;  %v3895_v5 = vcombine.low %v4689_v20, %v4689_v20 }
  0x25   :  { %v3859_v19 = vcombine.low %v4684_v16, %v90_v17  ;;  %v94_v23 = vld [vmem:[#allocation2 + $0x34] sm:$0xf]  ;;  %v4699_v26 = vld [vmem:[#allocation2 + $0x38] sm:$0xf]  ;;  %v96_v27 = vld [vmem:[#allocation2 + $0x3c] sm:$0xf]  ;;  %v472_v58 = vunpack.c.l.b16 %v3893_v46  ;;  %v3894_v59 = vcombine.low %v4684_v16, %v4684_v16 }
  0x26   :  { %4074 = vmatpush3.bf16.msra.mxu0 %v4355_v2  ;;  %v3861_v25 = vcombine.low %v4693_v22, %v94_v23  ;;  %v97_v28 = vld [vmem:[#allocation2 + $0x40] sm:$0xf]  ;;  %v98_v29 = vld [vmem:[#allocation2 + $0x44] sm:$0xf]  ;;  %v3862_v30 = vcombine.low %v4699_v26, %v96_v27  ;;  %v99_v32 = vld [vmem:[#allocation2 + $0x48] sm:$0xf]  ;;  %v474_v20 = vunpack.c.l.b16 %v3895_v5 }
  0x27   :  { %4107 = vmatprep.subr.bf16.mxu0 %v4564_v0  ;;  %v3863_v31 = vcombine.low %v97_v28, %v98_v29  ;;  %v100_v33 = vld [vmem:[#allocation2 + $0x4c] sm:$0xf]  ;;  %v101_v35 = vld [vmem:[#allocation2 + $0x50] sm:$0xf]  ;;  %v102_v36 = vld [vmem:[#allocation2 + $0x54] sm:$0xf]  ;;  %v3899_v37 = vcombine.low %v99_v32, %v99_v32  ;;  %v3898_v44 = vcombine.low %v97_v28, %v97_v28  ;;  %v3897_v28 = vcombine.low %v4699_v26, %v4699_v26 }
  0x28   :  { %v3864_v38 = vcombine.low %v99_v32, %v100_v33  ;;  %v3865_v40 = vcombine.low %v101_v35, %v102_v36  ;;  %v3900_v43 = vcombine.low %v101_v35, %v101_v35  ;;  %v103_v47 = vld [vmem:[#allocation2 + $0x58] sm:$0xf]  ;;  %v104_v49 = vld [vmem:[#allocation2 + $0x5c] sm:$0xf]  ;;  %v485_v52 = vrot.slane %v470_v42, 7 }
  0x29   :  { %4076 = vmatmul.mubr.msk.bf16.vlgmr.msra.gmra.mxu0 %vm216_vm1, %v3856_v10  ;;  %v478_v45 = vunpack.c.l.b16 %v3899_v37  ;;  %v3901_v50 = vcombine.low %v103_v47, %v103_v47  ;;  %v105_v54 = vld [vmem:[#allocation2 + $0x60] sm:$0xf]  ;;  %v106_v55 = vld [vmem:[#allocation2 + $0x64] sm:$0xf]  ;;  %vm486_vm2 = vcmask 1041409   ;;  %v477_v56 = vunpack.c.l.b16 %v3898_v44 }
  0x2a   :  { %4108 = vmatpush3.bf16.msra.mxu0 %v4360_v11  ;;  %4079 = vmatprep.mubr.msk.bf16.mxu0 %vm216_vm1, %v3857_v12  ;;  %v479_v53 = vunpack.c.l.b16 %v3900_v43  ;;  %v3866_v60 = vcombine.low %v103_v47, %v104_v49  ;;  %v3902_v61 = vcombine.low %v105_v54, %v105_v54  ;;  %v488_v62 = vrot.slane %v471_v48, 6  ;;  %v107_v4 = vld [vmem:[#allocation2 + $0x68] sm:$0xf]  ;;  %v109_v8 = vld [vmem:[#allocation2 + $0x70] sm:$0xf] }
  0x2b   :  { %4109 = vmatprep.subr.bf16.mxu0 %v4564_v0  ;;  %v506_v57 = vrot.slane %v478_v45, 7  ;;  %v480_v63 = vunpack.c.l.b16 %v3901_v50  ;;  %v3867_v1 = vcombine.low %v105_v54, %v106_v55  ;;  %v487_v2 = vsel %vm486_vm2, %v485_v52, %v469_v51  ;;  %v108_v14 = vld [vmem:[#allocation2 + $0x6c] sm:$0xf]  ;;  %v110_v17 = vld [vmem:[#allocation2 + $0x74] sm:$0xf] }
  0x2c   :  { %vm489_vm3 = vcmask 1042434   ;;  %v508_v3 = vrot.slane %v479_v53, 6  ;;  %v3903_v7 = vcombine.low %v107_v4, %v107_v4  ;;  %v491_v9 = vrot.slane %v472_v58, 5  ;;  %v4743_v51 = vld [vmem:[%s5910_s5] ss:$0 sm:$0xff] }
  0x2d   :  { %v507_v6 = vsel %vm486_vm2, %v506_v57, %v477_v56  ;;  %v473_v10 = vunpack.c.l.b16 %v3894_v59  ;;  %v481_v11 = vunpack.c.l.b16 %v3902_v61  ;;  %v490_v12 = vsel %vm489_vm3, %v488_v62, %v487_v2 }
  0x2e   :  { %4110 = vmatpush3.bf16.msra.mxu0 %v4377_v15  ;;  %vm492_vm4 = vcmask 1043459   ;;  %v510_v13 = vrot.slane %v480_v63, 5  ;;  %v3896_v15 = vcombine.low %v4693_v22, %v4693_v22  ;;  %v509_v16 = vsel %vm489_vm3, %v508_v3, %v507_v6 }
  0x2f   :  { %4157 = vmatprep.subr.bf16.mxu0 %v4564_v0  ;;  %vm495_vm5 = vcmask 1044484   ;;  %v482_v21 = vunpack.c.l.b16 %v3903_v7  ;;  %v493_v23 = vsel %vm492_vm4, %v491_v9, %v490_v12  ;;  %v3868_v27 = vcombine.low %v107_v4, %v108_v14 }
  0x30   :  { %v511_v29 = vsel %vm492_vm4, %v510_v13, %v509_v16  ;;  %v497_v33 = vrot.slane %v474_v20, 3  ;;  %vm498_vm6 = vcmask 1045509   ;;  %v476_v37 = vunpack.c.l.b16 %v3897_v28 }
  0x31   :  { %4080 = vmatmul.mubr.msk.bf16.gmra.mxu0 %vm216_vm1, %v3858_v18  ;;  %v3904_v18 = vcombine.low %v109_v8, %v109_v8  ;;  %v514_v34 = vrot.slane %v482_v21, 3  ;;  %vm501_vm7 = vcmask 1046534   ;;  %vm504_vm8 = vcmask 1047559  }
  0x32   :  { %4083 = vmatprep.mubr.msk.bf16.mxu0 %vm216_vm1, %v3859_v19  ;;  %v111_v19 = vld [vmem:[#allocation2 + $0x78] sm:$0xf]  ;;  %v503_v44 = vrot.slane %v476_v37, 1  ;;  %vm1572_vm9 = vcmask 130048   ;;  %vm3631_vm10 = vcmask 253952  }
  0x33   :  { %v3905_v22 = vcombine.low %v111_v19, %v111_v19  ;;  %v483_v32 = vunpack.c.l.b16 %v3904_v18  ;;  %vm3632_vm11 = vsmask.f32 256  ;;  %vm3810_vm12 = vsmask.f32 7938 }
  0x34   :  { %vm5835_vm13 = vmand %vm3631_vm10, %vm3632_vm11 }
  0x35   :  { %v484_v26 = vunpack.c.l.b16 %v3905_v22  ;;  %vm5882_vm14 = vmand %vm3631_vm10, %vm3810_vm12 }
  0x37   :  { %v518_v45 = vrot.slane %v484_v26, 1 }
  0x39   :  { %4084 = vmatmul.mubr.msk.bf16.gmra.mxu0 %vm216_vm1, %v3860_v24  ;;  %v494_v24 = vrot.slane %v473_v10, 4 }
  0x3a   :  { %4087 = vmatprep.mubr.msk.bf16.mxu0 %vm216_vm1, %v3861_v25  ;;  %v512_v25 = vrot.slane %v481_v11, 4 }
  0x3b   :  { %v496_v35 = vsel %vm495_vm5, %v494_v24, %v493_v23 }
  0x3c   :  { %v513_v36 = vsel %vm495_vm5, %v512_v25, %v511_v29  ;;  %v499_v41 = vsel %vm498_vm6, %v497_v33, %v496_v35 }
  0x3d   :  { %v515_v42 = vsel %vm498_vm6, %v514_v34, %v513_v36 }
  0x41   :  { %4088 = vmatmul.mubr.msk.bf16.gmra.mxu0 %vm216_vm1, %v3862_v30  ;;  %v3869_v30 = vcombine.low %v109_v8, %v110_v17 }
  0x42   :  { %4091 = vmatprep.mubr.msk.bf16.mxu0 %vm216_vm1, %v3863_v31  ;;  %v475_v31 = vunpack.c.l.b16 %v3896_v15 }
  0x44   :  { %v500_v39 = vrot.slane %v475_v31, 2 }
  0x46   :  { %v502_v46 = vsel %vm501_vm7, %v500_v39, %v499_v41 }
  0x47   :  { %v505_v48 = vsel %vm504_vm8, %v503_v44, %v502_v46 }
  0x49   :  { %4092 = vmatmul.mubr.msk.bf16.gmra.mxu0 %vm216_vm1, %v3864_v38  ;;  %v112_v38 = vld [vmem:[#allocation2 + $0x7c] sm:$0xf] }
  0x4a   :  { %4095 = vmatprep.mubr.msk.bf16.mxu0 %vm216_vm1, %v3865_v40  ;;  %v516_v40 = vrot.slane %v483_v32, 2  ;;  %v3870_v43 = vcombine.low %v111_v19, %v112_v38 }
  0x4c   :  { %v517_v47 = vsel %vm501_vm7, %v516_v40, %v515_v42 }
  0x4d   :  { %v519_v49 = vsel %vm504_vm8, %v518_v45, %v517_v47 }
  0x4e   :  { %v520_v50 = vpack.c.b16 %v519_v49, %v505_v48 }
  0x51   :  { %4096 = vmatmul.mubr.msk.bf16.gmra.mxu0 %vm216_vm1, %v3866_v60 }
  0x52   :  { %4099 = vmatprep.mubr.msk.bf16.mxu0 %vm216_vm1, %v3867_v1 }
  0x59   :  { %4100 = vmatmul.mubr.msk.bf16.gmra.mxu0 %vm216_vm1, %v3868_v27 }
  0x5a   :  { %4103 = vmatprep.mubr.msk.bf16.mxu0 %vm216_vm1, %v3869_v30 }
  0x61   :  { %4104 = vmatmul.mubr.msk.bf16.gmra.mxu0 %vm216_vm1, %v3870_v43 }
  0x62   :  { %4111 = vmatprep.mubr.msk.bf16.mxu0 %vm4565_vm0, %v4564_v0 }
  0x69   :  { %4112 = vmatmul.mubr.msk.bf16.vlgmr.msra.gmra.mxu0 %vm216_vm1, %v520_v50 }
  0x6a   :  { %4159 = vmatprep.mubr.msk.bf16.mxu0 %vm4565_vm0, %v4564_v0 }
  0xe9   :  { %v4077_v52 = vpop.f32.mrf.mxu0 }
  0xea   :  { %v308_v53 = vadd.f32 %v4077_v52, %v4743_v51 }
  0xeb   :  { %v299_v54 = vpop.f32.mrf.mxu0 }
  0xec   :  { %v300_v58 = vadd.f32 %v4743_v51, %v299_v54 }
  0xed   :  { %v4078_v55 = vpop.f32.mrf.mxu0 }
  0xee   :  { %v311_v56 = vadd.f32 %v4078_v55, %v4743_v51 }
  0xef   :  { %v302_v57 = vpop.f32.mrf.mxu0 }
  0xf0   :  { %v4748_v59 = vpack.c.bf16 %v311_v56, %v308_v53  ;;  %v303_v60 = vadd.f32 %v4743_v51, %v302_v57  ;;  %v4566_v57 = vmov 1966171168  }
  0xf1   :  { %v4081_v61 = vpop.f32.mrf.mxu0 }
  0xf2   :  { %v324_v62 = vadd.f32 %v4081_v61, %v4743_v51  ;;  %v4752_v63 = vpack.c.bf16 %v303_v60, %v300_v58  ;;  %v581_v58 = vunpack.c.l.s4 %v4566_v57  ;;  %v583_v60 = vlaneseq }
  0xf3   :  { %v315_v1 = vpop.f32.mrf.mxu0 }
  0xf4   :  { %v316_v2 = vadd.f32 %v4743_v51, %v315_v1  ;;  %v653_v3 = vsel %vm216_vm1, %v4752_v63, 0 }
  0xf5   :  { %v4082_v4 = vpop.f32.mrf.mxu0  ;;  %4116 = vmatpush3.bf16.xpose.msra.mxu1 %v653_v3  ;;  %v582_v3 = vunpack.c.0.s8 %v581_v58 }
  0xf6   :  { %v327_v5 = vadd.f32 %v4082_v4, %v4743_v51  ;;  %4121 = vmatprep.subr.bf16.mxu1 %v4564_v0  ;;  %v584_v4 = vshrl.u32 %v583_v60, 7 }
  0xf7   :  { %v318_v6 = vpop.f32.mrf.mxu0 }
  0xf8   :  { %v4759_v7 = vpack.c.bf16 %v327_v5, %v324_v62  ;;  %v319_v8 = vadd.f32 %v4743_v51, %v318_v6  ;;  %v3889_v5 = vld [vmem:[%s5908_s3] ss:$0 sm:$0xff] }
  0xf9   :  { %v4085_v9 = vpop.f32.mrf.mxu0 }
  0xfa   :  { %v4762_v10 = vpack.c.bf16 %v319_v8, %v316_v2  ;;  %v340_v11 = vadd.f32 %v4085_v9, %v4743_v51 }
  0xfb   :  { %v331_v12 = vpop.f32.mrf.mxu0 }
  0xfc   :  { %v332_v13 = vadd.f32 %v4743_v51, %v331_v12  ;;  %v4812_v12 = vsub.s32 %v582_v3, %v584_v4  ;;  %v755_v57 = vsel %vm216_vm1, %v4762_v10, 0 }
  0xfd   :  { %v4086_v14 = vpop.f32.mrf.mxu0 }
  0xfe   :  { %v343_v15 = vadd.f32 %v4086_v14, %v4743_v51 }
  0xff   :  { %v334_v16 = vpop.f32.mrf.mxu0 }
 0x100   :  { %v4767_v17 = vpack.c.bf16 %v343_v15, %v340_v11  ;;  %v335_v18 = vadd.f32 %v4743_v51, %v334_v16 }
 0x101   :  { %v4089_v19 = vpop.f32.mrf.mxu0 }
 0x102   :  { %v4770_v20 = vpack.c.bf16 %v335_v18, %v332_v13  ;;  %v356_v25 = vadd.f32 %v4089_v19, %v4743_v51 }
 0x103   :  { %v347_v21 = vpop.f32.mrf.mxu0 }
 0x104   :  { %v348_v23 = vadd.f32 %v4743_v51, %v347_v21 }
 0x105   :  { %v4090_v24 = vpop.f32.mrf.mxu0 }
 0x106   :  { %v359_v27 = vadd.f32 %v4090_v24, %v4743_v51 }
 0x107   :  { %v350_v28 = vpop.f32.mrf.mxu0 }
 0x108   :  { %v4775_v29 = vpack.c.bf16 %v359_v27, %v356_v25  ;;  %v351_v30 = vadd.f32 %v4743_v51, %v350_v28  ;;  %v4824_v27 = vsub.s32 0, %v584_v4 }
 0x109   :  { %v4093_v22 = vpop.f32.mrf.mxu0 }
 0x10a   :  { %v4778_v31 = vpack.c.bf16 %v351_v30, %v348_v23  ;;  %v1010_v32 = vsel %vm216_vm1, %v4775_v29, 0  ;;  %v372_v30 = vadd.f32 %v4093_v22, %v4743_v51 }
 0x10b   :  { %v363_v33 = vpop.f32.mrf.mxu0  ;;  %4158 = vmatpush3.bf16.xpose.msra.mxu0 %v1010_v32 }
 0x10c   :  { %v364_v34 = vadd.f32 %v4743_v51, %v363_v33  ;;  %4169 = vmatprep.subr.bf16.mxu0 %v4564_v0 }
 0x10d   :  { %v4094_v35 = vpop.f32.mrf.mxu0 }
 0x10e   :  { %v375_v28 = vadd.f32 %v4094_v35, %v4743_v51 }
 0x10f   :  { %v366_v36 = vpop.f32.mrf.mxu0 }
 0x110   :  { %v367_v37 = vadd.f32 %v4743_v51, %v366_v36 }
 0x111   :  { %v4785_v38 = vpop.f32.mrf.mxu0 }
 0x112   :  { %v4787_v26 = vpack.c.bf16 %v367_v37, %v364_v34  ;;  %v4834_v37 = vpack.c.bf16 %v375_v28, %v372_v30 }
 0x113   :  { %v379_v39 = vpop.f32.mrf.mxu0 }
 0x114   :  { %v380_v40 = vadd.f32 %v4743_v51, %v379_v39  ;;  %v704_v39 = vsel %vm216_vm1, %v4748_v59, 0 }
 0x115   :  { %v4098_v41 = vpop.f32.mrf.mxu0 }
 0x117   :  { %v382_v42 = vpop.f32.mrf.mxu0 }
 0x118   :  { %v383_v43 = vadd.f32 %v4743_v51, %v382_v42 }
 0x119   :  { %v4791_v44 = vpop.f32.mrf.mxu0 }
 0x11a   :  { %v4793_v45 = vpack.c.bf16 %v383_v43, %v380_v40 }
 0x11b   :  { %v395_v46 = vpop.f32.mrf.mxu0 }
 0x11c   :  { %v396_v47 = vadd.f32 %v4743_v51, %v395_v46  ;;  %v391_v46 = vadd.f32 %v4098_v41, %v4743_v51 }
 0x11d   :  { %v4796_v48 = vpop.f32.mrf.mxu0 }
 0x11f   :  { %v398_v49 = vpop.f32.mrf.mxu0 }
 0x120   :  { %v399_v50 = vadd.f32 %v4743_v51, %v398_v49  ;;  %v388_v49 = vadd.f32 %v4785_v38, %v4743_v51 }
 0x121   :  { %v4799_v52 = vpop.f32.mrf.mxu0 }
 0x122   :  { %v4801_v53 = vpack.c.bf16 %v399_v50, %v396_v47  ;;  %v1112_v47 = vsel %vm216_vm1, %v4834_v37, 0  ;;  %v4857_v41 = vpack.c.bf16 %v391_v46, %v388_v49  ;;  %v1061_v46 = vsel %vm216_vm1, %v4787_v26, 0 }
 0x123   :  { %v411_v54 = vpop.f32.mrf.mxu0 }
 0x124   :  { %v412_v55 = vadd.f32 %v4743_v51, %v411_v54 }
 0x125   :  { %v4804_v56 = vpop.f32.mrf.mxu0 }
 0x127   :  { %v414_v61 = vpop.f32.mrf.mxu0 }
 0x128   :  { %v415_v62 = vadd.f32 %v4743_v51, %v414_v61  ;;  %v407_v61 = vadd.f32 %v4796_v48, %v4743_v51 }
 0x129   :  { %v570_v1 = vpop.f32.mrf.mxu0 }
 0x12a   :  { %v4807_v2 = vpack.c.bf16 %v415_v62, %v412_v55  ;;  %v571_v9 = vadd.f32 %v3889_v5, %v570_v1  ;;  %v1214_v62 = vsel %vm216_vm1, %v4857_v41, 0  ;;  %v404_v1 = vadd.f32 %v4791_v44, %v4743_v51 }
 0x12b   :  { %v4113_v6 = vpop.f32.mrf.mxu0  ;;  %v806_v44 = vsel %vm216_vm1, %v4759_v7, 0 }
 0x12c   :  { %v4882_v6 = vpack.c.bf16 %v407_v61, %v404_v1 }
 0x12d   :  { %v573_v8 = vpop.f32.mrf.mxu0 }
 0x12e   :  { %v574_v11 = vadd.f32 %v3889_v5, %v573_v8 }
 0x12f   :  { %v4114_v13 = vpop.f32.mrf.mxu0 }
 0x130   :  { %v577_v14 = vpack.c.bf16 %v574_v11, %v571_v9  ;;  %v3909_v16 = vpack.c.bf16 %v574_v11, %v574_v11  ;;  %v423_v13 = vadd.f32 %v4804_v56, %v4743_v51 }
 0x132   :  { %v586_v15 = vrot.slane %v577_v14, %v4812_v12  ;;  %v593_v23 = vrot.slane %v3909_v16, %v4812_v12  ;;  %v1316_v14 = vsel %vm216_vm1, %v4882_v6, 0 }
 0x134   :  { %v594_v18 = vcombine.high %v586_v15, %v586_v15  ;;  %v4816_v19 = vrot.slane %v586_v15, %v4812_v12  ;;  %v4829_v32 = vrot.slane %v593_v23, %v4812_v12  ;;  %v595_v22 = vcombine.high %v593_v23, %v593_v23 }
 0x135   :  { %v420_v15 = vadd.f32 %v4799_v52, %v4743_v51  ;;  %v857_v51 = vsel %vm216_vm1, %v4770_v20, 0 }
 0x136   :  { %v616_v21 = vrot.slane %v594_v18, %v4812_v12  ;;  %v3910_v25 = vpack.i.b16 %v4816_v19, %v4816_v19  ;;  %v629_v33 = vunpack.i.h.s16 %v4816_v19  ;;  %v637_v35 = vunpack.i.h.s16 %v4829_v32 }
 0x137   :  { %v4853_v50 = vrot.slane %v595_v22, %v4812_v12  ;;  %v4878_v3 = vcombine.high %v4829_v32, %v4829_v32  ;;  %v624_v16 = vcombine.high %v4816_v19, %v4816_v19  ;;  %v4909_v23 = vpack.c.bf16 %v423_v13, %v420_v15 }
 0x138   :  { %v4820_v24 = vcombine.high %v616_v21, %v616_v21  ;;  %v648_v34 = vrot.slane %v3910_v25, %v4824_v27  ;;  %v695_v42 = vpack.i.b16 %v629_v33, %v629_v33  ;;  %v1103_v54 = vpack.i.b16 %v637_v35, %v637_v35 }
 0x139   :  { %v639_v38 = vunpack.i.h.s16 %v4853_v50  ;;  %v3913_v58 = vpack.i.b16 %v616_v21, %v616_v21  ;;  %v631_v4 = vunpack.i.h.s16 %v616_v21  ;;  %v641_v8 = vunpack.i.h.s16 %v4878_v3 }
 0x13a   :  { %v635_v36 = vunpack.i.h.s16 %v4820_v24  ;;  %4118 = vmatmul.mubr.msk.bf16.vlgmr.msra.gmra.mxu1 %vm216_vm1, %v648_v34  ;;  %v699_v55 = vrot.slane %v695_v42, %v4824_v27  ;;  %v1107_v60 = vrot.slane %v1103_v54, %v4824_v27  ;;  %v4905_v18 = vcombine.high %v4853_v50, %v4853_v50 }
 0x13b   :  { %4122 = vmatpush3.bf16.xpose.msra.mxu1 %v704_v39  ;;  %4123 = vmatprep.mubr.msk.bf16.mxu1 %vm4565_vm0, %v4564_v0  ;;  %v1205_v5 = vpack.i.b16 %v639_v38, %v639_v38  ;;  %v750_v48 = vrot.slane %v3913_v58, %v4824_v27  ;;  %v797_v9 = vpack.i.b16 %v631_v4, %v631_v4  ;;  %v1418_v28 = vsel %vm216_vm1, %v4909_v23, 0 }
 0x13c   :  { %v1001_v40 = vpack.i.b16 %v635_v36, %v635_v36  ;;  %4127 = vmatprep.subr.bf16.mxu1 %v4564_v0  ;;  %v1307_v56 = vpack.i.b16 %v641_v8, %v641_v8  ;;  %v3916_v52 = vpack.i.b16 %v624_v16, %v624_v16  ;;  %v643_v25 = vunpack.i.h.s16 %v4905_v18 }
 0x13d   :  { %v1209_v11 = vrot.slane %v1205_v5, %v4824_v27  ;;  %v801_v21 = vrot.slane %v797_v9, %v4824_v27  ;;  %v633_v30 = vunpack.i.h.s16 %v624_v16  ;;  %v908_v36 = vsel %vm216_vm1, %v4767_v17, 0 }
 0x13e   :  { %v1005_v43 = vrot.slane %v1001_v40, %v4824_v27  ;;  %v1311_v19 = vrot.slane %v1307_v56, %v4824_v27  ;;  %v852_v33 = vrot.slane %v3916_v52, %v4824_v27  ;;  %v1409_v34 = vpack.i.b16 %v643_v25, %v643_v25 }
 0x13f   :  { %v899_v39 = vpack.i.b16 %v633_v30, %v633_v30  ;;  %v959_v35 = vsel %vm216_vm1, %v4778_v31, 0  ;;  %v3919_v42 = vpack.i.b16 %v4820_v24, %v4820_v24  ;;  %v1163_v24 = vsel %vm216_vm1, %v4793_v45, 0 }
 0x140   :  { %4160 = vmatmul.mubr.msk.bf16.vlgmr.msra.gmra.mxu0 %vm216_vm1, %v1005_v43  ;;  %v1413_v40 = vrot.slane %v1409_v34, %v4824_v27  ;;  %v3925_v54 = vpack.i.b16 %v4853_v50, %v4853_v50  ;;  %v1367_v38 = vsel %vm216_vm1, %v4807_v2, 0  ;;  %v3931_v58 = vpack.i.b16 %v4905_v18, %v4905_v18 }
 0x141   :  { %4170 = vmatpush3.bf16.xpose.msra.mxu0 %v1112_v47  ;;  %4171 = vmatprep.mubr.msk.bf16.mxu0 %vm4565_vm0, %v4564_v0  ;;  %v903_v22 = vrot.slane %v899_v39, %v4824_v27  ;;  %v954_v43 = vrot.slane %v3919_v42, %v4824_v27  ;;  %v3922_v47 = vpack.i.b16 %v4829_v32, %v4829_v32 }
 0x142   :  { %4181 = vmatprep.subr.bf16.mxu0 %v4564_v0  ;;  %4124 = vmatmul.mubr.msk.bf16.vlgmr.msra.gmra.mxu1 %vm216_vm1, %v699_v55  ;;  %v1158_v32 = vrot.slane %v3925_v54, %v4824_v27  ;;  %v1265_v55 = vsel %vm216_vm1, %v4801_v53, 0 }
 0x143   :  { %4128 = vmatpush3.bf16.xpose.msra.mxu1 %v755_v57  ;;  %4129 = vmatprep.mubr.msk.bf16.mxu1 %vm4565_vm0, %v4564_v0  ;;  %v1056_v49 = vrot.slane %v3922_v47, %v4824_v27  ;;  %v3928_v57 = vpack.i.b16 %v4878_v3, %v4878_v3 }
 0x144   :  { %4133 = vmatprep.subr.bf16.mxu1 %v4564_v0 }
 0x145   :  { %v1260_v50 = vrot.slane %v3928_v57, %v4824_v27 }
 0x148   :  { %4172 = vmatmul.mubr.msk.bf16.vlgmr.msra.gmra.mxu0 %vm216_vm1, %v1107_v60  ;;  %v1362_v60 = vrot.slane %v3931_v58, %v4824_v27 }
 0x149   :  { %4182 = vmatpush3.bf16.xpose.msra.mxu0 %v1214_v62  ;;  %4183 = vmatprep.mubr.msk.bf16.mxu0 %vm4565_vm0, %v4564_v0 }
 0x14a   :  { %4193 = vmatprep.subr.bf16.mxu0 %v4564_v0  ;;  %4130 = vmatmul.mubr.msk.bf16.vlgmr.msra.gmra.mxu1 %vm216_vm1, %v750_v48 }
 0x14b   :  { %4134 = vmatpush3.bf16.xpose.msra.mxu1 %v806_v44  ;;  %4135 = vmatprep.mubr.msk.bf16.mxu1 %vm4565_vm0, %v4564_v0 }
 0x14c   :  { %4139 = vmatprep.subr.bf16.mxu1 %v4564_v0 }
 0x150   :  { %4184 = vmatmul.mubr.msk.bf16.vlgmr.msra.gmra.mxu0 %vm216_vm1, %v1209_v11 }
 0x151   :  { %4194 = vmatpush3.bf16.xpose.msra.mxu0 %v1316_v14  ;;  %4195 = vmatprep.mubr.msk.bf16.mxu0 %vm4565_vm0, %v4564_v0 }
 0x152   :  { %4205 = vmatprep.subr.bf16.mxu0 %v4564_v0  ;;  %4136 = vmatmul.mubr.msk.bf16.vlgmr.msra.gmra.mxu1 %vm216_vm1, %v801_v21 }
 0x153   :  { %4140 = vmatpush3.bf16.xpose.msra.mxu1 %v857_v51  ;;  %4141 = vmatprep.mubr.msk.bf16.mxu1 %vm4565_vm0, %v4564_v0 }
 0x154   :  { %4145 = vmatprep.subr.bf16.mxu1 %v4564_v0 }
 0x158   :  { %4196 = vmatmul.mubr.msk.bf16.vlgmr.msra.gmra.mxu0 %vm216_vm1, %v1311_v19 }
 0x159   :  { %4206 = vmatpush3.bf16.xpose.msra.mxu0 %v1418_v28  ;;  %4207 = vmatprep.mubr.msk.bf16.mxu0 %vm4565_vm0, %v4564_v0 }
 0x15a   :  { %4217 = vmatprep.subr.bf16.mxu0 %v4564_v0  ;;  %4142 = vmatmul.mubr.msk.bf16.vlgmr.msra.gmra.mxu1 %vm216_vm1, %v852_v33 }
 0x15b   :  { %4146 = vmatpush3.bf16.xpose.msra.mxu1 %v908_v36  ;;  %4147 = vmatprep.mubr.msk.bf16.mxu1 %vm4565_vm0, %v4564_v0 }
 0x15c   :  { %4151 = vmatprep.subr.bf16.mxu1 %v4564_v0 }
 0x160   :  { %4208 = vmatmul.mubr.msk.bf16.vlgmr.msra.gmra.mxu0 %vm216_vm1, %v1413_v40 }
 0x161   :  { %4219 = vmatprep.mubr.msk.bf16.mxu0 %vm4565_vm0, %v4564_v0 }
 0x162   :  { %4148 = vmatmul.mubr.msk.bf16.vlgmr.msra.gmra.mxu1 %vm216_vm1, %v903_v22 }
 0x163   :  { %4152 = vmatpush3.bf16.xpose.msra.mxu1 %v959_v35  ;;  %4153 = vmatprep.mubr.msk.bf16.mxu1 %vm4565_vm0, %v4564_v0 }
 0x164   :  { %4163 = vmatprep.subr.bf16.mxu1 %v4564_v0 }
 0x16a   :  { %4154 = vmatmul.mubr.msk.bf16.vlgmr.msra.gmra.mxu1 %vm216_vm1, %v954_v43 }
 0x16b   :  { %4164 = vmatpush3.bf16.xpose.msra.mxu1 %v1061_v46  ;;  %4165 = vmatprep.mubr.msk.bf16.mxu1 %vm4565_vm0, %v4564_v0 }
 0x16c   :  { %4175 = vmatprep.subr.bf16.mxu1 %v4564_v0 }
 0x172   :  { %4166 = vmatmul.mubr.msk.bf16.vlgmr.msra.gmra.mxu1 %vm216_vm1, %v1056_v49  ;;  %v1476_v49 = vld [vmem:[%s5906_s1] sm:$0xff] }
 0x173   :  { %4176 = vmatpush3.bf16.xpose.msra.mxu1 %v1163_v24  ;;  %4177 = vmatprep.mubr.msk.bf16.mxu1 %vm4565_vm0, %v4564_v0  ;;  %v1480_v54 = vrot.slane %v1476_v49, 1  ;;  %v1482_v58 = vrot.slane %v1476_v49, 3 }
 0x174   :  { %4187 = vmatprep.subr.bf16.mxu1 %v4564_v0 }
 0x17a   :  { %4178 = vmatmul.mubr.msk.bf16.vlgmr.msra.gmra.mxu1 %vm216_vm1, %v1158_v32 }
 0x17b   :  { %4188 = vmatpush3.bf16.xpose.msra.mxu1 %v1265_v55  ;;  %4189 = vmatprep.mubr.msk.bf16.mxu1 %vm4565_vm0, %v4564_v0 }
 0x17c   :  { %4199 = vmatprep.subr.bf16.mxu1 %v4564_v0 }
 0x182   :  { %4190 = vmatmul.mubr.msk.bf16.vlgmr.msra.gmra.mxu1 %vm216_vm1, %v1260_v50  ;;  %v1481_v50 = vrot.slane %v1476_v49, 2 }
 0x183   :  { %4200 = vmatpush3.bf16.xpose.msra.mxu1 %v1367_v38  ;;  %4201 = vmatprep.mubr.msk.bf16.mxu1 %vm4565_vm0, %v4564_v0 }
 0x184   :  { %4211 = vmatprep.subr.bf16.mxu1 %v4564_v0 }
 0x18a   :  { %4202 = vmatmul.mubr.msk.bf16.vlgmr.msra.gmra.mxu1 %vm216_vm1, %v1362_v60 }
 0x18b   :  { %4213 = vmatprep.mubr.msk.bf16.mxu1 %vm4565_vm0, %v4564_v0 }
 0x1fa   :  { %v689_v61 = vpop.f32.mrf.mxu1 }
 0x1fc   :  { %v4119_v62 = vpop.f32.mrf.mxu1 }
 0x1fe   :  { %v692_v1 = vpop.f32.mrf.mxu1 }
 0x200   :  { %v1046_v3 = vpop.f32.mrf.mxu0  ;;  %v4120_v4 = vpop.f32.mrf.mxu1 }
 0x201   :  { %v1483_v4 = vrot.slane %v1476_v49, 4 }
 0x202   :  { %v4161_v5 = vpop.f32.mrf.mxu0  ;;  %v740_v48 = vpop.f32.mrf.mxu1 }
 0x203   :  { %v1461_v24 = vmul.f32 0.17677669, %v740_v48  ;;  %v1460_v48 = vmul.f32 0.17677669, %v689_v61 }
 0x204   :  { %v1049_v44 = vpop.f32.mrf.mxu0  ;;  %v4125_v8 = vpop.f32.mrf.mxu1 }
 0x205   :  { %v4996_v5 = vadd.f32 %v1480_v54, %v1461_v24  ;;  %v1484_v8 = vrot.slane %v1476_v49, 5 }
 0x206   :  { %v4162_v9 = vpop.f32.mrf.mxu0  ;;  %v743_v11 = vpop.f32.mrf.mxu1 }
 0x208   :  { %v4985_v13 = vpop.f32.mrf.mxu0  ;;  %v4126_v14 = vpop.f32.mrf.mxu1 }
 0x20a   :  { %v4173_v27 = vpop.f32.mrf.mxu0  ;;  %v791_v15 = vpop.f32.mrf.mxu1 }
 0x20b   :  { %v1462_v57 = vmul.f32 0.17677669, %v791_v15 }
 0x20c   :  { %v1151_v16 = vpop.f32.mrf.mxu0  ;;  %v4131_v18 = vpop.f32.mrf.mxu1 }
 0x20d   :  { %v4998_v14 = vadd.f32 %v1481_v50, %v1462_v57  ;;  %v1467_v18 = vmul.f32 0.17677669, %v1046_v3 }
 0x20e   :  { %v4174_v56 = vpop.f32.mrf.mxu0  ;;  %v794_v21 = vpop.f32.mrf.mxu1 }
 0x20f   :  { %v1486_v56 = vrot.slane %v1476_v49, 7  ;;  %v1542_v21 = vrot.slane %v4996_v5, 7 }
 0x210   :  { %v4987_v51 = vpop.f32.mrf.mxu0  ;;  %v4132_v52 = vpop.f32.mrf.mxu1 }
 0x212   :  { %v4185_v19 = vpop.f32.mrf.mxu0  ;;  %v842_v25 = vpop.f32.mrf.mxu1 }
 0x213   :  { %v1463_v38 = vmul.f32 0.17677669, %v842_v25  ;;  %v1544_v25 = vrot.slane %v4998_v14, 6 }
 0x214   :  { %v1253_v28 = vpop.f32.mrf.mxu0  ;;  %v4137_v30 = vpop.f32.mrf.mxu1 }
 0x215   :  { %v5000_v27 = vadd.f32 %v1482_v58, %v1463_v38  ;;  %v1485_v28 = vrot.slane %v1476_v49, 6  ;;  %v5008_v30 = vadd.f32 %v1476_v49, %v1460_v48 }
 0x216   :  { %v4186_v33 = vpop.f32.mrf.mxu0  ;;  %v845_v34 = vpop.f32.mrf.mxu1 }
 0x217   :  { %v1546_v33 = vrot.slane %v5000_v27, 5  ;;  %v1543_v3 = vsel %vm486_vm2, %v1542_v21, %v5008_v30 }
 0x218   :  { %v4989_v36 = vpop.f32.mrf.mxu0  ;;  %v4138_v39 = vpop.f32.mrf.mxu1 }
 0x21a   :  { %v4197_v40 = vpop.f32.mrf.mxu0  ;;  %v893_v22 = vpop.f32.mrf.mxu1 }
 0x21b   :  { %v1464_v1 = vmul.f32 0.17677669, %v893_v22  ;;  %v5012_v40 = vadd.f32 %v1486_v56, %v1467_v18 }
 0x21c   :  { %v1355_v35 = vpop.f32.mrf.mxu0  ;;  %v4143_v42 = vpop.f32.mrf.mxu1 }
 0x21d   :  { %v5002_v15 = vadd.f32 %v1483_v4, %v1464_v1  ;;  %v1545_v42 = vsel %vm489_vm3, %v1544_v25, %v1543_v3 }
 0x21e   :  { %v4198_v43 = vpop.f32.mrf.mxu0  ;;  %v896_v46 = vpop.f32.mrf.mxu1 }
 0x21f   :  { %v1548_v34 = vrot.slane %v5002_v15, 4  ;;  %v1547_v46 = vsel %vm492_vm4, %v1546_v33, %v1545_v42 }
 0x220   :  { %v4991_v47 = vpop.f32.mrf.mxu0  ;;  %v4144_v32 = vpop.f32.mrf.mxu1 }
 0x221   :  { %v1549_v54 = vsel %vm495_vm5, %v1548_v34, %v1547_v46  ;;  %v1554_v32 = vrot.slane %v5012_v40, 1 }
 0x222   :  { %v4209_v55 = vpop.f32.mrf.mxu0  ;;  %v944_v60 = vpop.f32.mrf.mxu1 }
 0x223   :  { %v1465_v44 = vmul.f32 0.17677669, %v944_v60 }
 0x224   :  { %v1457_v62 = vpop.f32.mrf.mxu0  ;;  %v4149_v9 = vpop.f32.mrf.mxu1 }
 0x225   :  { %v5005_v52 = vadd.f32 %v1484_v8, %v1465_v44  ;;  %v1477_v8 = vld [vmem:[%s5906_s1 + $0x8] sm:$0xff]  ;;  %s4567_s1 = smov 96  }
 0x226   :  { %v4210_v11 = vpop.f32.mrf.mxu0  ;;  %v947_v16 = vpop.f32.mrf.mxu1  ;;  %v1488_v48 = vrot.slane %v1477_v8, 2  ;;  %v1487_v18 = vrot.slane %v1477_v8, 1  ;;  %v1489_v34 = vrot.slane %v1477_v8, 3 }
 0x227   :  { %v1550_v22 = vrot.slane %v5005_v52, 3  ;;  %v1469_v16 = vmul.f32 0.17677669, %v4985_v13 }
 0x228   :  { %v4150_v19 = vpop.f32.mrf.mxu1 }
 0x229   :  { %v1551_v57 = vsel %vm498_vm6, %v1550_v22, %v1549_v54  ;;  %v5034_v33 = vadd.f32 %v1487_v18, %v1469_v16  ;;  %v1491_v54 = vrot.slane %v1477_v8, 5 }
 0x22a   :  { %v995_v61 = vpop.f32.mrf.mxu1 }
 0x22b   :  { %v1466_v39 = vmul.f32 0.17677669, %v995_v61  ;;  %v1471_v61 = vmul.f32 0.17677669, %v4987_v51  ;;  %v1556_v46 = vrot.slane %v5034_v33, 7 }
 0x22c   :  { %v4155_v35 = vpop.f32.mrf.mxu1  ;;  %v1475_v51 = vmul.f32 0.17677669, %v4991_v47 }
 0x22d   :  { %v5018_v43 = vadd.f32 %v1485_v28, %v1466_v39  ;;  %v1490_v28 = vrot.slane %v1477_v8, 4 }
 0x22e   :  { %v998_v49 = vpop.f32.mrf.mxu1 }
 0x22f   :  { %v1552_v24 = vrot.slane %v5018_v43, 2  ;;  %v5043_v49 = vadd.f32 %v1489_v34, %v1471_v61 }
 0x230   :  { %v4156_v55 = vpop.f32.mrf.mxu1 }
 0x231   :  { %v1553_v50 = vsel %vm501_vm7, %v1552_v24, %v1551_v57  ;;  %v1473_v24 = vmul.f32 0.17677669, %v4989_v36  ;;  %v1493_v55 = vrot.slane %v1477_v8, 7 }
 0x232   :  { %v1097_v38 = vpop.f32.mrf.mxu1  ;;  %v1555_v58 = vsel %vm504_vm8, %v1554_v32, %v1553_v50 }
 0x233   :  { %v1573_v60 = vsel %vm1572_vm9, %v1555_v58, -inf  ;;  %v1468_v21 = vmul.f32 0.17677669, %v1097_v38 }
 0x234   :  { %1574 = vmax.xlane.f32.xlu0 %v1573_v60  ;;  %v4167_v62 = vpop.f32.mrf.mxu1  ;;  %v1492_v60 = vrot.slane %v1477_v8, 6 }
 0x235   :  { %v5037_v22 = vadd.f32 %v1477_v8, %v1468_v21  ;;  %v1560_v62 = vrot.slane %v5043_v49, 5 }
 0x236   :  { %v1100_v1 = vpop.f32.mrf.mxu1 }
 0x237   :  { %v1557_v57 = vsel %vm486_vm2, %v1556_v46, %v5037_v22  ;;  %v5052_v1 = vadd.f32 %v1491_v54, %v1473_v24 }
 0x238   :  { %v4168_v4 = vpop.f32.mrf.mxu1 }
 0x239   :  { %v1564_v16 = vrot.slane %v5052_v1, 3 }
 0x23a   :  { %v1199_v44 = vpop.f32.mrf.mxu1 }
 0x23b   :  { %v1470_v11 = vmul.f32 0.17677669, %v1199_v44  ;;  %v5054_v44 = vadd.f32 %v1493_v55, %v1475_v51 }
 0x23c   :  { %v4179_v9 = vpop.f32.mrf.mxu1 }
 0x23d   :  { %v5032_v25 = vadd.f32 %v1488_v48, %v1470_v11 }
 0x23e   :  { %v1202_v56 = vpop.f32.mrf.mxu1 }
 0x23f   :  { %v1558_v42 = vrot.slane %v5032_v25, 6  ;;  %v1568_v56 = vrot.slane %v5054_v44, 1 }
 0x240   :  { %v4180_v19 = vpop.f32.mrf.mxu1 }
 0x241   :  { %v1559_v38 = vsel %vm489_vm3, %v1558_v42, %v1557_v57 }
 0x242   :  { %v1301_v39 = vpop.f32.mrf.mxu1  ;;  %v1561_v47 = vsel %vm492_vm4, %v1560_v62, %v1559_v38 }
 0x243   :  { %v1472_v3 = vmul.f32 0.17677669, %v1301_v39 }
 0x244   :  { %v4191_v35 = vpop.f32.mrf.mxu1 }
 0x245   :  { %v5040_v13 = vadd.f32 %v1490_v28, %v1472_v3 }
 0x246   :  { %v1304_v32 = vpop.f32.mrf.mxu1 }
 0x247   :  { %v1562_v58 = vrot.slane %v5040_v13, 4 }
 0x248   :  { %v4192_v50 = vpop.f32.mrf.mxu1 }
 0x249   :  { %v1563_v48 = vsel %vm495_vm5, %v1562_v58, %v1561_v47 }
 0x24a   :  { %v1403_v4 = vpop.f32.mrf.mxu1  ;;  %v1565_v19 = vsel %vm498_vm6, %v1564_v16, %v1563_v48 }
 0x24b   :  { %v1474_v36 = vmul.f32 0.17677669, %v1403_v4 }
 0x24c   :  { %v4203_v9 = vpop.f32.mrf.mxu1 }
 0x24d   :  { %v5057_v11 = vadd.f32 %v1492_v60, %v1474_v36 }
 0x24e   :  { %v1406_v18 = vpop.f32.mrf.mxu1 }
 0x24f   :  { %v1566_v8 = vrot.slane %v5057_v11, 2 }
 0x250   :  { %v4204_v21 = vpop.f32.mrf.mxu1 }
 0x251   :  { %v1567_v28 = vsel %vm501_vm7, %v1566_v8, %v1565_v19 }
 0x252   :  { %v1569_v61 = vsel %vm504_vm8, %v1568_v56, %v1567_v28 }
 0x253   :  { %v1576_v34 = vsel %vm1572_vm9, %v1569_v61, -inf }
 0x254   :  { %1577 = vmax.xlane.f32.xlu0 %v1576_v34 }
 0x26a   :  { %1839 = vrot.lane.b32.xlu0 %v4748_v59, %s4567_s1 }
 0x26e   :  { %1886 = vrot.lane.b32.xlu0 %v4762_v10, %s4567_s1 }
 0x272   :  { %1933 = vrot.lane.b32.xlu0 %v4759_v7, %s4567_s1 }
 0x276   :  { %1980 = vrot.lane.b32.xlu0 %v4770_v20, %s4567_s1 }
 0x27a   :  { %2027 = vrot.lane.b32.xlu0 %v4767_v17, %s4567_s1 }
 0x27e   :  { %2074 = vrot.lane.b32.xlu0 %v4778_v31, %s4567_s1 }
 0x282   :  { %2121 = vrot.lane.b32.xlu0 %v4775_v29, %s4567_s1 }
 0x286   :  { %2168 = vrot.lane.b32.xlu0 %v4787_v26, %s4567_s1 }
 0x28a   :  { %2262 = vrot.lane.b32.xlu0 %v4793_v45, %s4567_s1 }
 0x28e   :  { %2309 = vrot.lane.b32.xlu0 %v4857_v41, %s4567_s1 }
 0x292   :  { %2356 = vrot.lane.b32.xlu0 %v4801_v53, %s4567_s1 }
 0x296   :  { %2403 = vrot.lane.b32.xlu0 %v4882_v6, %s4567_s1 }
 0x29a   :  { %2450 = vrot.lane.b32.xlu0 %v4807_v2, %s4567_s1 }
 0x2bd   :  { %v1575_v59 = vpop.xlane.xlu0 %1574 }
 0x2be   :  { %v1581_v7 = vrot.slane %v1575_v59, 1  ;;  %v1582_v10 = vrot.slane %v1575_v59, 2  ;;  %v1583_v17 = vrot.slane %v1575_v59, 3  ;;  %v1584_v20 = vrot.slane %v1575_v59, 4 }
 0x2bf   :  { %v1585_v29 = vrot.slane %v1575_v59, 5  ;;  %v1586_v31 = vrot.slane %v1575_v59, 6  ;;  %v1587_v26 = vrot.slane %v1575_v59, 7  ;;  %v1611_v45 = vsub.f32 %v5008_v30, %v1575_v59 }
 0x2c0   :  { %v1612_v41 = vsub.f32 %v4996_v5, %v1581_v7  ;;  %v1613_v53 = vsub.f32 %v4998_v14, %v1582_v10  ;;  %v1614_v39 = vsub.f32 %v5000_v27, %v1583_v17  ;;  %v1615_v6 = vsub.f32 %v5002_v15, %v1584_v20 }
 0x2c1   :  { %v1616_v2 = vsub.f32 %v5005_v52, %v1585_v29  ;;  %v1617_v3 = vsub.f32 %v5018_v43, %v1586_v31  ;;  %v1627_v35 = vmul.f32 1.442695, %v1611_v45  ;;  %v1618_v54 = vsub.f32 %v5012_v40, %v1587_v26 }
 0x2c2   :  { %v1629_v42 = vmul.f32 1.442695, %v1612_v41  ;;  %v1631_v46 = vmul.f32 1.442695, %v1613_v53  ;;  %v1633_v24 = vmul.f32 1.442695, %v1614_v39 }
 0x2c3   :  { %4402 = vpow2.f32 %v1627_v35  ;;  %v1635_v30 = vmul.f32 1.442695, %v1615_v6  ;;  %v1637_v5 = vmul.f32 1.442695, %v1616_v2  ;;  %v1639_v14 = vmul.f32 1.442695, %v1617_v3 }
 0x2c4   :  { %4404 = vpow2.f32 %v1629_v42  ;;  %v1641_v27 = vmul.f32 1.442695, %v1618_v54 }
 0x2c5   :  { %4406 = vpow2.f32 %v1631_v46 }
 0x2c6   :  { %4408 = vpow2.f32 %v1633_v24 }
 0x2c7   :  { %4410 = vpow2.f32 %v1635_v30 }
 0x2c8   :  { %4412 = vpow2.f32 %v1637_v5 }
 0x2c9   :  { %4414 = vpow2.f32 %v1639_v14 }
 0x2ca   :  { %4416 = vpow2.f32 %v1641_v27 }
 0x2d0   :  { %v5101_v15 = vpop.eup %4402 }
 0x2d1   :  { %v5103_v52 = vpop.eup %4404 }
 0x2d2   :  { %v5105_v43 = vpop.eup %4406  ;;  %v1675_v40 = vrot.slane %v5103_v52, 7 }
 0x2d3   :  { %v5108_v32 = vpop.eup %4408  ;;  %v1677_v51 = vrot.slane %v5105_v43, 6 }
 0x2d4   :  { %v5111_v55 = vpop.eup %4410  ;;  %v1676_v57 = vsel %vm486_vm2, %v1675_v40, %v5101_v15  ;;  %v1679_v50 = vrot.slane %v5108_v32, 5 }
 0x2d5   :  { %v5116_v38 = vpop.eup %4412  ;;  %v1678_v58 = vsel %vm489_vm3, %v1677_v51, %v1676_v57  ;;  %v1681_v60 = vrot.slane %v5111_v55, 4 }
 0x2d6   :  { %v5120_v62 = vpop.eup %4414  ;;  %v1680_v4 = vsel %vm492_vm4, %v1679_v50, %v1678_v58  ;;  %v1683_v36 = vrot.slane %v5116_v38, 3 }
 0x2d7   :  { %v5124_v9 = vpop.eup %4416  ;;  %v1682_v47 = vsel %vm495_vm5, %v1681_v60, %v1680_v4  ;;  %v1685_v48 = vrot.slane %v5120_v62, 2 }
 0x2d8   :  { %v1684_v16 = vsel %vm498_vm6, %v1683_v36, %v1682_v47  ;;  %v1687_v18 = vrot.slane %v5124_v9, 1 }
 0x2d9   :  { %v1686_v8 = vsel %vm501_vm7, %v1685_v48, %v1684_v16 }
 0x2da   :  { %v1688_v56 = vsel %vm504_vm8, %v1687_v18, %v1686_v8 }
 0x2db   :  { %v1705_v21 = vsel %vm1572_vm9, %v1688_v56, 0.0 }
 0x2dc   :  { %1706 = vadd.xlane.f32.xlu1 %v1705_v21 }
 0x2dd   :  { %v1578_v19 = vpop.xlane.xlu0 %1577 }
 0x2de   :  { %v1588_v28 = vrot.slane %v1578_v19, 1  ;;  %v1589_v61 = vrot.slane %v1578_v19, 2  ;;  %v1590_v10 = vrot.slane %v1578_v19, 3  ;;  %v1619_v20 = vsub.f32 %v5037_v22, %v1578_v19 }
 0x2df   :  { %v1591_v29 = vrot.slane %v1578_v19, 4  ;;  %v1592_v45 = vrot.slane %v1578_v19, 5  ;;  %v1593_v39 = vrot.slane %v1578_v19, 6  ;;  %v1594_v22 = vrot.slane %v1578_v19, 7 }
 0x2e0   :  { %v1620_v34 = vsub.f32 %v5034_v33, %v1588_v28  ;;  %v1621_v7 = vsub.f32 %v5032_v25, %v1589_v61  ;;  %v1622_v26 = vsub.f32 %v5043_v49, %v1590_v10  ;;  %v1643_v41 = vmul.f32 1.442695, %v1619_v20 }
 0x2e1   :  { %v1840_v59 = vpop.permute.xlu0 %1839  ;;  %v1623_v53 = vsub.f32 %v5040_v13, %v1591_v29  ;;  %v1624_v25 = vsub.f32 %v5052_v1, %v1592_v45  ;;  %v1625_v2 = vsub.f32 %v5057_v11, %v1593_v39  ;;  %v1626_v3 = vsub.f32 %v5054_v44, %v1594_v22 }
 0x2e2   :  { %4218 = vmatpush3.bf16.msra.mxu0 %v1840_v59  ;;  %v1645_v17 = vmul.f32 1.442695, %v1620_v34  ;;  %v1647_v31 = vmul.f32 1.442695, %v1621_v7  ;;  %v1649_v33 = vmul.f32 1.442695, %v1622_v26 }
 0x2e3   :  { %4229 = vmatprep.subr.bf16.mxu0 %v4564_v0  ;;  %v1651_v6 = vmul.f32 1.442695, %v1623_v53  ;;  %v1653_v49 = vmul.f32 1.442695, %v1624_v25  ;;  %v1655_v13 = vmul.f32 1.442695, %v1625_v2 }
 0x2e4   :  { %4418 = vpow2.f32 %v1645_v17  ;;  %v1657_v1 = vmul.f32 1.442695, %v1626_v3 }
 0x2e5   :  { %4420 = vpow2.f32 %v1647_v31  ;;  %v1887_v28 = vpop.permute.xlu0 %1886 }
 0x2e6   :  { %4422 = vpow2.f32 %v1643_v41 }
 0x2e7   :  { %4424 = vpow2.f32 %v1649_v33 }
 0x2e8   :  { %4426 = vpow2.f32 %v1651_v6 }
 0x2e9   :  { %4428 = vpow2.f32 %v1653_v49  ;;  %v1934_v59 = vpop.permute.xlu0 %1933 }
 0x2ea   :  { %4430 = vpow2.f32 %v1655_v13 }
 0x2eb   :  { %4432 = vpow2.f32 %v1657_v1 }
 0x2ed   :  { %1792 = vrot.lane.b32.xlu1 %v4752_v63, %s4567_s1  ;;  %v1981_v31 = vpop.permute.xlu0 %1980 }
 0x2f1   :  { %v5144_v35 = vpop.eup %4418  ;;  %v2028_v53 = vpop.permute.xlu0 %2027 }
 0x2f2   :  { %v5146_v42 = vpop.eup %4420  ;;  %v1689_v46 = vrot.slane %v5144_v35, 7 }
 0x2f3   :  { %v5149_v63 = vpop.eup %4422  ;;  %v1691_v24 = vrot.slane %v5146_v42, 6 }
 0x2f4   :  { %v1690_v11 = vsel %vm486_vm2, %v1689_v46, %v5149_v63  ;;  %v5154_v54 = vpop.eup %4424 }
 0x2f5   :  { %v1692_v44 = vsel %vm489_vm3, %v1691_v24, %v1690_v11  ;;  %v5157_v30 = vpop.eup %4426  ;;  %v1693_v5 = vrot.slane %v5154_v54, 5  ;;  %v2075_v22 = vpop.permute.xlu0 %2074 }
 0x2f6   :  { %v5161_v27 = vpop.eup %4428  ;;  %v1695_v40 = vrot.slane %v5157_v30, 4 }
 0x2f7   :  { %v1694_v14 = vsel %vm492_vm4, %v1693_v5, %v1692_v44  ;;  %v5165_v57 = vpop.eup %4430  ;;  %v1697_v50 = vrot.slane %v5161_v27, 3 }
 0x2f8   :  { %v1696_v51 = vsel %vm495_vm5, %v1695_v40, %v1694_v14  ;;  %v5169_v60 = vpop.eup %4432  ;;  %v1699_v4 = vrot.slane %v5165_v57, 2 }
 0x2f9   :  { %v1698_v58 = vsel %vm498_vm6, %v1697_v50, %v1696_v51  ;;  %v1701_v47 = vrot.slane %v5169_v60, 1  ;;  %v2122_v1 = vpop.permute.xlu0 %2121 }
 0x2fa   :  { %v1700_v36 = vsel %vm501_vm7, %v1699_v4, %v1698_v58 }
 0x2fb   :  { %v1702_v48 = vsel %vm504_vm8, %v1701_v47, %v1700_v36 }
 0x2fc   :  { %v1708_v16 = vsel %vm1572_vm9, %v1702_v48, 0.0 }
 0x2fd   :  { %v2169_v11 = vpop.permute.xlu0 %2168 }
 0x301   :  { %v2263_v51 = vpop.permute.xlu0 %2262 }
 0x305   :  { %v2310_v47 = vpop.permute.xlu0 %2309 }
 0x311   :  { %1709 = vadd.xlane.f32.xlu1 %v1708_v16 }
 0x322   :  { %2215 = vrot.lane.b32.xlu1 %v4834_v37, %s4567_s1 }
 0x326   :  { %2497 = vrot.lane.b32.xlu1 %v4909_v23, %s4567_s1 }
 0x365   :  { %v1707_v18 = vpop.xlane.xlu1 %1706 }
 0x366   :  { %v1713_v8 = vrot.slane %v1707_v18, 1  ;;  %v1714_v56 = vrot.slane %v1707_v18, 2  ;;  %4434 = vrcp.f32 %v1707_v18  ;;  %v1715_v21 = vrot.slane %v1707_v18, 3 }
 0x367   :  { %v1716_v61 = vrot.slane %v1707_v18, 4  ;;  %v1717_v34 = vrot.slane %v1707_v18, 5  ;;  %v1718_v17 = vrot.slane %v1707_v18, 6  ;;  %v1719_v26 = vrot.slane %v1707_v18, 7 }
 0x368   :  { %4436 = vrcp.f32 %v1713_v8 }
 0x369   :  { %v1793_v19 = vpop.permute.xlu1 %1792  ;;  %4438 = vrcp.f32 %v1714_v56 }
 0x36a   :  { %4212 = vmatpush3.bf16.msra.mxu1 %v1793_v19  ;;  %4440 = vrcp.f32 %v1715_v21 }
 0x36b   :  { %4223 = vmatprep.subr.bf16.mxu1 %v4564_v0  ;;  %4442 = vrcp.f32 %v1716_v61 }
 0x36c   :  { %4444 = vrcp.f32 %v1717_v34 }
 0x36d   :  { %4446 = vrcp.f32 %v1718_v17 }
 0x36e   :  { %4448 = vrcp.f32 %v1719_v26 }
 0x373   :  { %v4435_v37 = vpop.eup %4434 }
 0x374   :  { %v1744_v7 = vmul.f32 %v4435_v37, %v5101_v15 }
 0x375   :  { %v4437_v23 = vpop.eup %4436 }
 0x376   :  { %v1746_v10 = vmul.f32 %v4437_v23, %v5103_v52  ;;  %v1775_v20 = vpack.c.bf16 %v1744_v7, %v1744_v7  ;;  %v4439_v29 = vpop.eup %4438 }
 0x377   :  { %v4441_v41 = vpop.eup %4440  ;;  %v1748_v15 = vmul.f32 %v4439_v29, %v5105_v43 }
 0x378   :  { %v1776_v45 = vpack.c.bf16 %v1746_v10, %v1746_v10  ;;  %4214 = vmatmul.mubr.msk.bf16.vlgmr.msra.gmra.mxu1 %vm1572_vm9, %v1775_v20  ;;  %v1750_v52 = vmul.f32 %v4441_v41, %v5108_v32  ;;  %v4443_v39 = vpop.eup %4442 }
 0x379   :  { %4224 = vmatpush3.bf16.msra.mxu1 %v1887_v28  ;;  %4225 = vmatprep.mubr.msk.bf16.mxu1 %vm4565_vm0, %v4564_v0  ;;  %v1777_v33 = vpack.c.bf16 %v1748_v15, %v1748_v15  ;;  %v4445_v6 = vpop.eup %4444  ;;  %v1752_v43 = vmul.f32 %v4443_v39, %v5111_v55  ;;  %v2357_v28 = vpop.permute.xlu0 %2356 }
 0x37a   :  { %4220 = vmatmul.mubr.msk.bf16.vlgmr.msra.gmra.mxu0 %vm1572_vm9, %v1776_v45  ;;  %4235 = vmatprep.subr.bf16.mxu1 %v4564_v0  ;;  %v1778_v25 = vpack.c.bf16 %v1750_v52, %v1750_v52  ;;  %v1754_v32 = vmul.f32 %v4445_v6, %v5116_v38  ;;  %v4447_v49 = vpop.eup %4446 }
 0x37b   :  { %4230 = vmatpush3.bf16.msra.mxu0 %v1934_v59  ;;  %4231 = vmatprep.mubr.msk.bf16.mxu0 %vm4565_vm0, %v4564_v0  ;;  %v1779_v2 = vpack.c.bf16 %v1752_v43, %v1752_v43  ;;  %v4449_v13 = vpop.eup %4448  ;;  %v1756_v55 = vmul.f32 %v4447_v49, %v5120_v62 }
 0x37c   :  { %4241 = vmatprep.subr.bf16.mxu0 %v4564_v0  ;;  %v1780_v3 = vpack.c.bf16 %v1754_v32, %v1754_v32  ;;  %v1758_v38 = vmul.f32 %v4449_v13, %v5124_v9 }
 0x37d   :  { %v1781_v46 = vpack.c.bf16 %v1756_v55, %v1756_v55  ;;  %v2404_v23 = vpop.permute.xlu0 %2403 }
 0x37e   :  { %v1782_v24 = vpack.c.bf16 %v1758_v38, %v1758_v38 }
 0x380   :  { %4226 = vmatmul.mubr.msk.bf16.vlgmr.msra.gmra.mxu1 %vm1572_vm9, %v1777_v33 }
 0x381   :  { %4236 = vmatpush3.bf16.msra.mxu1 %v1981_v31  ;;  %4237 = vmatprep.mubr.msk.bf16.mxu1 %vm4565_vm0, %v4564_v0  ;;  %v2451_v29 = vpop.permute.xlu0 %2450 }
 0x382   :  { %4232 = vmatmul.mubr.msk.bf16.vlgmr.msra.gmra.mxu0 %vm1572_vm9, %v1778_v25  ;;  %4247 = vmatprep.subr.bf16.mxu1 %v4564_v0 }
 0x383   :  { %4242 = vmatpush3.bf16.msra.mxu0 %v2028_v53  ;;  %4243 = vmatprep.mubr.msk.bf16.mxu0 %vm4565_vm0, %v4564_v0 }
 0x384   :  { %4253 = vmatprep.subr.bf16.mxu0 %v4564_v0 }
 0x388   :  { %4238 = vmatmul.mubr.msk.bf16.vlgmr.msra.gmra.mxu1 %vm1572_vm9, %v1779_v2 }
 0x389   :  { %4248 = vmatpush3.bf16.msra.mxu1 %v2075_v22  ;;  %4249 = vmatprep.mubr.msk.bf16.mxu1 %vm4565_vm0, %v4564_v0 }
 0x38a   :  { %4244 = vmatmul.mubr.msk.bf16.vlgmr.msra.gmra.mxu0 %vm1572_vm9, %v1780_v3  ;;  %4259 = vmatprep.subr.bf16.mxu1 %v4564_v0 }
 0x38b   :  { %4254 = vmatpush3.bf16.msra.mxu0 %v2122_v1  ;;  %4255 = vmatprep.mubr.msk.bf16.mxu0 %vm4565_vm0, %v4564_v0 }
 0x38c   :  { %4265 = vmatprep.subr.bf16.mxu0 %v4564_v0 }
 0x390   :  { %4250 = vmatmul.mubr.msk.bf16.vlgmr.msra.gmra.mxu1 %vm1572_vm9, %v1781_v46 }
 0x391   :  { %4260 = vmatpush3.bf16.msra.mxu1 %v2169_v11  ;;  %4261 = vmatprep.mubr.msk.bf16.mxu1 %vm4565_vm0, %v4564_v0 }
 0x392   :  { %4256 = vmatmul.mubr.msk.bf16.vlgmr.msra.gmra.mxu0 %vm1572_vm9, %v1782_v24  ;;  %4271 = vmatprep.subr.bf16.mxu1 %v4564_v0 }
 0x393   :  { %4267 = vmatprep.mubr.msk.bf16.mxu0 %vm4565_vm0, %v4564_v0 }
 0x39a   :  { %v1710_v62 = vpop.xlane.xlu1 %1709 }
 0x39b   :  { %v1720_v9 = vrot.slane %v1710_v62, 1  ;;  %v1721_v44 = vrot.slane %v1710_v62, 2  ;;  %4450 = vrcp.f32 %v1710_v62  ;;  %v1722_v5 = vrot.slane %v1710_v62, 3 }
 0x39c   :  { %v1723_v40 = vrot.slane %v1710_v62, 4  ;;  %v1724_v50 = vrot.slane %v1710_v62, 5  ;;  %v1725_v16 = vrot.slane %v1710_v62, 6  ;;  %v1726_v56 = vrot.slane %v1710_v62, 7 }
 0x39d   :  { %4452 = vrcp.f32 %v1720_v9 }
 0x39e   :  { %v2216_v14 = vpop.permute.xlu1 %2215  ;;  %4454 = vrcp.f32 %v1721_v44 }
 0x39f   :  { %4266 = vmatpush3.bf16.msra.mxu0 %v2216_v14  ;;  %4456 = vrcp.f32 %v1722_v5 }
 0x3a0   :  { %4277 = vmatprep.subr.bf16.mxu0 %v4564_v0  ;;  %4458 = vrcp.f32 %v1723_v40 }
 0x3a1   :  { %4460 = vrcp.f32 %v1724_v50 }
 0x3a2   :  { %4462 = vrcp.f32 %v1725_v16  ;;  %v2498_v31 = vpop.permute.xlu1 %2497 }
 0x3a3   :  { %4464 = vrcp.f32 %v1726_v56 }
 0x3a8   :  { %v4451_v58 = vpop.eup %4450 }
 0x3a9   :  { %v1760_v36 = vmul.f32 %v4451_v58, %v5149_v63 }
 0x3aa   :  { %v4453_v4 = vpop.eup %4452 }
 0x3ab   :  { %v1762_v48 = vmul.f32 %v4453_v4, %v5144_v35  ;;  %v1783_v18 = vpack.c.bf16 %v1760_v36, %v1760_v36  ;;  %v4455_v8 = vpop.eup %4454 }
 0x3ac   :  { %v4457_v19 = vpop.eup %4456  ;;  %v1764_v63 = vmul.f32 %v4455_v8, %v5146_v42 }
 0x3ad   :  { %v1784_v21 = vpack.c.bf16 %v1762_v48, %v1762_v48  ;;  %4262 = vmatmul.mubr.msk.bf16.vlgmr.msra.gmra.mxu1 %vm1572_vm9, %v1783_v18  ;;  %v1766_v35 = vmul.f32 %v4457_v19, %v5154_v54  ;;  %v4459_v34 = vpop.eup %4458 }
 0x3ae   :  { %4272 = vmatpush3.bf16.msra.mxu1 %v2263_v51  ;;  %4273 = vmatprep.mubr.msk.bf16.mxu1 %vm4565_vm0, %v4564_v0  ;;  %v1785_v61 = vpack.c.bf16 %v1764_v63, %v1764_v63  ;;  %v4461_v37 = vpop.eup %4460  ;;  %v1768_v42 = vmul.f32 %v4459_v34, %v5157_v30 }
 0x3af   :  { %4268 = vmatmul.mubr.msk.bf16.vlgmr.msra.gmra.mxu0 %vm1572_vm9, %v1784_v21  ;;  %4283 = vmatprep.subr.bf16.mxu1 %v4564_v0  ;;  %v1786_v59 = vpack.c.bf16 %v1766_v35, %v1766_v35  ;;  %v1770_v54 = vmul.f32 %v4461_v37, %v5161_v27  ;;  %v4463_v10 = vpop.eup %4462 }
 0x3b0   :  { %4278 = vmatpush3.bf16.msra.mxu0 %v2310_v47  ;;  %4279 = vmatprep.mubr.msk.bf16.mxu0 %vm4565_vm0, %v4564_v0  ;;  %v1787_v7 = vpack.c.bf16 %v1768_v42, %v1768_v42  ;;  %v4465_v20 = vpop.eup %4464  ;;  %v1772_v30 = vmul.f32 %v4463_v10, %v5165_v57  ;;  %v4390_v57 = vld [vmem:[%s5911_s6 + $0x8] sm:$0xff]  }
 0x3b1   :  { %4289 = vmatprep.subr.bf16.mxu0 %v4564_v0  ;;  %v1788_v17 = vpack.c.bf16 %v1770_v54, %v1770_v54  ;;  %v1774_v27 = vmul.f32 %v4465_v20, %v5169_v60  ;;  %v4391_v60 = vld [vmem:[%s5911_s6] sm:$0xff]  }
 0x3b2   :  { %v1789_v26 = vpack.c.bf16 %v1772_v30, %v1772_v30 }
 0x3b3   :  { %v1790_v45 = vpack.c.bf16 %v1774_v27, %v1774_v27 }
 0x3b5   :  { %4274 = vmatmul.mubr.msk.bf16.vlgmr.msra.gmra.mxu1 %vm1572_vm9, %v1785_v61 }
 0x3b6   :  { %4284 = vmatpush3.bf16.msra.mxu1 %v2357_v28  ;;  %4285 = vmatprep.mubr.msk.bf16.mxu1 %vm4565_vm0, %v4564_v0 }
 0x3b7   :  { %4280 = vmatmul.mubr.msk.bf16.vlgmr.msra.gmra.mxu0 %vm1572_vm9, %v1786_v59  ;;  %4295 = vmatprep.subr.bf16.mxu1 %v4564_v0 }
 0x3b8   :  { %4290 = vmatpush3.bf16.msra.mxu0 %v2404_v23  ;;  %4291 = vmatprep.mubr.msk.bf16.mxu0 %vm4565_vm0, %v4564_v0 }
 0x3b9   :  { %4301 = vmatprep.subr.bf16.mxu0 %v4564_v0 }
 0x3bd   :  { %4286 = vmatmul.mubr.msk.bf16.vlgmr.msra.gmra.mxu1 %vm1572_vm9, %v1787_v7 }
 0x3be   :  { %4296 = vmatpush3.bf16.msra.mxu1 %v2451_v29  ;;  %4297 = vmatprep.mubr.msk.bf16.mxu1 %vm4565_vm0, %v4564_v0 }
 0x3bf   :  { %4292 = vmatmul.mubr.msk.bf16.vlgmr.msra.gmra.mxu0 %vm1572_vm9, %v1788_v17  ;;  %4307 = vmatprep.subr.bf16.mxu1 %v4564_v0 }
 0x3c0   :  { %4302 = vmatpush3.bf16.msra.mxu0 %v2498_v31  ;;  %4303 = vmatprep.mubr.msk.bf16.mxu0 %vm4565_vm0, %v4564_v0 }
 0x3c1   :  { %4315 = vmatprep.subr.bf16.mxu0 %v4564_v0 }
 0x3c5   :  { %4298 = vmatmul.mubr.msk.bf16.vlgmr.msra.gmra.mxu1 %vm1572_vm9, %v1789_v26 }
 0x3c6   :  { %4311 = vmatprep.mubr.msk.bf16.mxu1 %vm4565_vm0, %v4564_v0  ;;  %4308 = vmatpush3.bf16.msra.mxu1 %v4390_v57 }
 0x3c7   :  { %4304 = vmatmul.mubr.msk.bf16.vlgmr.msra.gmra.mxu0 %vm1572_vm9, %v1790_v45  ;;  %4309 = vmatprep.subr.bf16.mxu1 %v4564_v0 }
 0x3c8   :  { %4319 = vmatprep.mubr.msk.bf16.mxu0 %vm4565_vm0, %v4564_v0 }
 0x3ca   :  { %4310 = vmatpush3.bf16.msra.mxu1 %v4391_v60 }
 0x3cb   :  { %4323 = vmatprep.subr.bf16.mxu1 %v4564_v0 }
 0x438   :  { %v1832_v41 = vpop.f32.mrf.mxu1 }
 0x439   :  { %v2543_v52 = vpack.c.bf16 %v1832_v41, %v1832_v41 }
 0x43a   :  { %v1879_v15 = vpop.f32.mrf.mxu0  ;;  %v4215_v53 = vpop.f32.mrf.mxu1 }
 0x43b   :  { %v2544_v33 = vpack.c.bf16 %v1879_v15, %v1879_v15  ;;  %v2586_v22 = vunpack.c.l.b16 %v2543_v52 }
 0x43c   :  { %v4221_v39 = vpop.f32.mrf.mxu0  ;;  %v1835_v6 = vpop.f32.mrf.mxu1 }
 0x43d   :  { %v2587_v25 = vunpack.c.l.b16 %v2544_v33 }
 0x43e   :  { %v1882_v43 = vpop.f32.mrf.mxu0  ;;  %v4216_v2 = vpop.f32.mrf.mxu1 }
 0x43f   :  { %v2602_v32 = vrot.slane %v2587_v25, 7 }
 0x440   :  { %v4222_v49 = vpop.f32.mrf.mxu0  ;;  %v1926_v13 = vpop.f32.mrf.mxu1 }
 0x441   :  { %v2603_v3 = vsel %vm486_vm2, %v2602_v32, %v2586_v22  ;;  %v2545_v1 = vpack.c.bf16 %v1926_v13, %v1926_v13 }
 0x442   :  { %v1973_v55 = vpop.f32.mrf.mxu0  ;;  %v4227_v38 = vpop.f32.mrf.mxu1 }
 0x443   :  { %v2546_v46 = vpack.c.bf16 %v1973_v55, %v1973_v55  ;;  %v2588_v24 = vunpack.c.l.b16 %v2545_v1 }
 0x444   :  { %v4233_v11 = vpop.f32.mrf.mxu0  ;;  %v1929_v9 = vpop.f32.mrf.mxu1 }
 0x445   :  { %v2589_v62 = vunpack.c.l.b16 %v2546_v46  ;;  %v2604_v44 = vrot.slane %v2588_v24, 6 }
 0x446   :  { %v1976_v5 = vpop.f32.mrf.mxu0  ;;  %v4228_v40 = vpop.f32.mrf.mxu1 }
 0x447   :  { %v2606_v14 = vrot.slane %v2589_v62, 5  ;;  %v2605_v51 = vsel %vm489_vm3, %v2604_v44, %v2603_v3 }
 0x448   :  { %v4234_v50 = vpop.f32.mrf.mxu0  ;;  %v2020_v4 = vpop.f32.mrf.mxu1 }
 0x449   :  { %v5270_v58 = vsel %vm492_vm4, %v2606_v14, %v2605_v51  ;;  %v2547_v60 = vpack.c.bf16 %v2020_v4, %v2020_v4 }
 0x44a   :  { %v2067_v36 = vpop.f32.mrf.mxu0  ;;  %v4239_v47 = vpop.f32.mrf.mxu1 }
 0x44b   :  { %v2548_v25 = vpack.c.bf16 %v2067_v36, %v2067_v36  ;;  %v2590_v22 = vunpack.c.l.b16 %v2547_v60 }
 0x44c   :  { %v4245_v48 = vpop.f32.mrf.mxu0  ;;  %v2023_v16 = vpop.f32.mrf.mxu1 }
 0x44d   :  { %v2591_v11 = vunpack.c.l.b16 %v2548_v25  ;;  %v2608_v5 = vrot.slane %v2590_v22, 4  ;;  %v4480_v25 = vld [vmem:[#allocation2 + $0x10] sm:$0xf] }
 0x44e   :  { %v2070_v18 = vpop.f32.mrf.mxu0  ;;  %v4240_v8 = vpop.f32.mrf.mxu1 }
 0x44f   :  { %v2610_v18 = vrot.slane %v2591_v11, 3 }
 0x450   :  { %v4246_v56 = vpop.f32.mrf.mxu0  ;;  %v2114_v21 = vpop.f32.mrf.mxu1 }
 0x451   :  { %v2549_v32 = vpack.c.bf16 %v2114_v21, %v2114_v21  ;;  %v2609_v21 = vsel %vm495_vm5, %v2608_v5, %v5270_v58  ;;  %v4488_v5 = vld [vmem:[#allocation2 + $0x58] sm:$0xf] }
 0x452   :  { %v2161_v19 = vpop.f32.mrf.mxu0  ;;  %v4251_v63 = vpop.f32.mrf.mxu1 }
 0x453   :  { %v2550_v62 = vpack.c.bf16 %v2161_v19, %v2161_v19  ;;  %v2592_v14 = vunpack.c.l.b16 %v2549_v32  ;;  %v4482_v32 = vld [vmem:[#allocation2 + $0x20] sm:$0xf] }
 0x454   :  { %v4257_v28 = vpop.f32.mrf.mxu0  ;;  %v2117_v35 = vpop.f32.mrf.mxu1 }
 0x455   :  { %v2593_v8 = vunpack.c.l.b16 %v2550_v62  ;;  %v2612_v19 = vrot.slane %v2592_v14, 2  ;;  %v4487_v62 = vld [vmem:[#allocation2 + $0x50] sm:$0xf]  ;;  %v2698_v14 = vunpack.c.l.bf16 %v4488_v5 }
 0x456   :  { %v2164_v61 = vpop.f32.mrf.mxu0  ;;  %v4252_v34 = vpop.f32.mrf.mxu1 }
 0x458   :  { %v4258_v59 = vpop.f32.mrf.mxu0 }
 0x46d   :  { %v2208_v37 = vpop.f32.mrf.mxu1 }
 0x46e   :  { %v2551_v6 = vpack.c.bf16 %v2208_v37, %v2208_v37 }
 0x46f   :  { %v2255_v23 = vpop.f32.mrf.mxu0  ;;  %v4263_v42 = vpop.f32.mrf.mxu1 }
 0x470   :  { %v2552_v30 = vpack.c.bf16 %v2255_v23, %v2255_v23  ;;  %v2594_v9 = vunpack.c.l.b16 %v2551_v6  ;;  %v2689_v6 = vunpack.c.l.bf16 %v4480_v25 }
 0x471   :  { %v4269_v54 = vpop.f32.mrf.mxu0  ;;  %v2211_v7 = vpop.f32.mrf.mxu1 }
 0x472   :  { %v2595_v15 = vunpack.c.l.b16 %v2552_v30  ;;  %v2611_v54 = vsel %vm498_vm6, %v2610_v18, %v2609_v21  ;;  %v2614_v7 = vrot.slane %v2593_v8, 1 }
 0x473   :  { %v2258_v10 = vpop.f32.mrf.mxu0  ;;  %v4264_v17 = vpop.f32.mrf.mxu1 }
 0x474   :  { %v2616_v3 = vrot.slane %v2595_v15, 7  ;;  %v3950_v15 = vld [vmem:[%s5912_s7] ss:$0 sm:$0xff] }
 0x475   :  { %v4270_v20 = vpop.f32.mrf.mxu0  ;;  %v2302_v29 = vpop.f32.mrf.mxu1 }
 0x476   :  { %v2553_v26 = vpack.c.bf16 %v2302_v29, %v2302_v29  ;;  %v2617_v51 = vsel %vm486_vm2, %v2616_v3, %v2594_v9  ;;  %v2613_v20 = vsel %vm501_vm7, %v2612_v19, %v2611_v54  ;;  %v2697_v9 = vunpack.c.l.bf16 %v4487_v62  ;;  %v4492_v19 = vld [vmem:[#allocation2 + $0x38] sm:$0xf] }
 0x477   :  { %v2349_v31 = vpop.f32.mrf.mxu0  ;;  %v4275_v27 = vpop.f32.mrf.mxu1 }
 0x478   :  { %v2554_v52 = vpack.c.bf16 %v2349_v31, %v2349_v31  ;;  %v2596_v33 = vunpack.c.l.b16 %v2553_v26 }
 0x479   :  { %v4281_v45 = vpop.f32.mrf.mxu0  ;;  %v2305_v57 = vpop.f32.mrf.mxu1 }
 0x47a   :  { %v2597_v13 = vunpack.c.l.b16 %v2554_v52  ;;  %v2618_v38 = vrot.slane %v2596_v33, 6  ;;  %v2615_v57 = vsel %vm504_vm8, %v2614_v7, %v2613_v20  ;;  %v4478_v52 = vld [vmem:[#allocation2] sm:$0xf]  ;;  %v4479_v33 = vld [vmem:[#allocation2 + $0x8] sm:$0xf] }
 0x47b   :  { %v2352_v41 = vpop.f32.mrf.mxu0  ;;  %v4276_v53 = vpop.f32.mrf.mxu1 }
 0x47c   :  { %v2620_v50 = vrot.slane %v2597_v13, 5  ;;  %v2619_v47 = vsel %vm489_vm3, %v2618_v38, %v2617_v51  ;;  %v2687_v53 = vunpack.c.l.bf16 %v4478_v52  ;;  %v4484_v13 = vld [vmem:[#allocation2 + $0x30] sm:$0xf]  ;;  %v4485_v38 = vld [vmem:[#allocation2 + $0x40] sm:$0xf] }
 0x47d   :  { %v4282_v39 = vpop.f32.mrf.mxu0  ;;  %v2396_v43 = vpop.f32.mrf.mxu1 }
 0x47e   :  { %v2555_v2 = vpack.c.bf16 %v2396_v43, %v2396_v43  ;;  %v2621_v35 = vsel %vm492_vm4, %v2620_v50, %v2619_v47  ;;  %v2688_v39 = vunpack.c.l.bf16 %v4479_v33  ;;  %v4481_v43 = vld [vmem:[#allocation2 + $0x18] sm:$0xf]  ;;  %v4490_v50 = vld [vmem:[#allocation2 + $0x68] sm:$0xf] }
 0x47f   :  { %v2443_v49 = vpop.f32.mrf.mxu0  ;;  %v4287_v1 = vpop.f32.mrf.mxu1  ;;  %v2690_v22 = vunpack.c.l.bf16 %v4481_v43 }
 0x480   :  { %v2556_v55 = vpack.c.bf16 %v2443_v49, %v2443_v49  ;;  %v2598_v46 = vunpack.c.l.b16 %v2555_v2  ;;  %v2691_v2 = vunpack.c.l.bf16 %v4482_v32  ;;  %v4483_v49 = vld [vmem:[#allocation2 + $0x28] sm:$0xf]  ;;  %v2693_v1 = vunpack.c.l.bf16 %v4484_v13 }
 0x481   :  { %v4293_v24 = vpop.f32.mrf.mxu0  ;;  %v2399_v44 = vpop.f32.mrf.mxu1  ;;  %v2692_v3 = vunpack.c.l.bf16 %v4483_v49 }
 0x482   :  { %v2599_v4 = vunpack.c.l.b16 %v2556_v55  ;;  %v2622_v48 = vrot.slane %v2598_v46, 4  ;;  %v2695_v46 = vunpack.c.l.bf16 %v4485_v38  ;;  %v4486_v24 = vld [vmem:[#allocation2 + $0x48] sm:$0xf] }
 0x483   :  { %v2446_v40 = vpop.f32.mrf.mxu0  ;;  %v4288_v36 = vpop.f32.mrf.mxu1  ;;  %v2696_v11 = vunpack.c.l.bf16 %v4486_v24 }
 0x484   :  { %v2624_v61 = vrot.slane %v2599_v4, 3  ;;  %v2623_v37 = vsel %vm495_vm5, %v2622_v48, %v2621_v35  ;;  %v4489_v40 = vld [vmem:[#allocation2 + $0x60] sm:$0xf]  ;;  %v2700_v4 = vunpack.c.l.bf16 %v4490_v50  ;;  %v4491_v36 = vld [vmem:[#allocation2 + $0x70] sm:$0xf] }
 0x485   :  { %v4294_v16 = vpop.f32.mrf.mxu0  ;;  %v2490_v56 = vpop.f32.mrf.mxu1  ;;  %v2699_v51 = vunpack.c.l.bf16 %v4489_v40  ;;  %v2701_v47 = vunpack.c.l.bf16 %v4491_v36 }
 0x486   :  { %v2557_v63 = vpack.c.bf16 %v2490_v56, %v2490_v56  ;;  %v2625_v31 = vsel %vm498_vm6, %v2624_v61, %v2623_v37 }
 0x487   :  { %v2537_v28 = vpop.f32.mrf.mxu0  ;;  %v4299_v34 = vpop.f32.mrf.mxu1 }
 0x488   :  { %v2558_v59 = vpack.c.bf16 %v2537_v28, %v2537_v28  ;;  %v2600_v23 = vunpack.c.l.b16 %v2557_v63  ;;  %v2694_v63 = vunpack.c.l.bf16 %v4492_v19 }
 0x489   :  { %v4305_v42 = vpop.f32.mrf.mxu0  ;;  %v2493_v17 = vpop.f32.mrf.mxu1 }
 0x48a   :  { %v2601_v10 = vunpack.c.l.b16 %v2558_v59  ;;  %v2626_v58 = vrot.slane %v2600_v23, 2  ;;  %v4493_v17 = vld [vmem:[#allocation2 + $0x78] sm:$0xf] }
 0x48b   :  { %v2540_v29 = vpop.f32.mrf.mxu0  ;;  %v4300_v27 = vpop.f32.mrf.mxu1  ;;  %v2702_v20 = vunpack.c.l.bf16 %v4493_v17 }
 0x48c   :  { %v2628_v30 = vrot.slane %v2601_v10, 1  ;;  %v2627_v26 = vsel %vm501_vm7, %v2626_v58, %v2625_v31 }
 0x48d   :  { %v4306_v45 = vpop.f32.mrf.mxu0 }
 0x48e   :  { %v2629_v60 = vsel %vm504_vm8, %v2628_v30, %v2627_v26 }
 0x48f   :  { %v2630_v41 = vpack.c.b16 %v2629_v60, %v2615_v57 }
 0x491   :  { %4312 = vmatmul.mubr.msk.bf16.vlgmr.msra.gmra.mxu1 %vm216_vm1, %v2630_v41 }
 0x492   :  { %4339 = vmatprep.mubr.msk.bf16.mxu1 %vm4565_vm0, %v4564_v0 }
 0x551   :  { %v2680_v55 = vpop.f32.mrf.mxu1 }
 0x552   :  { %v2681_v44 = vadd.f32 %v3950_v15, %v2680_v55 }
 0x553   :  { %v4313_v48 = vpop.f32.mrf.mxu1 }
 0x554   :  { %v2705_v16 = vrot.slane %v2681_v44, 1  ;;  %v2706_v18 = vrot.slane %v2681_v44, 2  ;;  %v2707_v8 = vrot.slane %v2681_v44, 3  ;;  %v2708_v56 = vrot.slane %v2681_v44, 4 }
 0x555   :  { %v2683_v21 = vpop.f32.mrf.mxu1  ;;  %v2709_v28 = vrot.slane %v2681_v44, 5  ;;  %v2710_v35 = vrot.slane %v2681_v44, 6  ;;  %v2711_v61 = vrot.slane %v2681_v44, 7  ;;  %v2735_v58 = vadd.f32 %v2687_v53, %v2681_v44 }
 0x556   :  { %v2684_v34 = vadd.f32 %v3950_v15, %v2683_v21  ;;  %v5290_v59 = vadd.f32 %v2705_v16, %v2688_v39  ;;  %v5292_v37 = vadd.f32 %v2706_v18, %v2689_v6  ;;  %v5294_v23 = vadd.f32 %v2707_v8, %v2690_v22 }
 0x557   :  { %v4314_v42 = vpop.f32.mrf.mxu1  ;;  %v5296_v54 = vadd.f32 %v2708_v56, %v2691_v2  ;;  %v5298_v7 = vadd.f32 %v2709_v28, %v2692_v3  ;;  %v5300_v10 = vadd.f32 %v2710_v35, %v2693_v1  ;;  %v2742_v27 = vadd.f32 %v2711_v61, %v2694_v63 }
 0x558   :  { %v2769_v29 = vrot.slane %v5290_v59, 7  ;;  %v2771_v31 = vrot.slane %v5292_v37, 6  ;;  %v2712_v30 = vrot.slane %v2684_v34, 1  ;;  %v2773_v26 = vrot.slane %v5294_v23, 5 }
 0x559   :  { %v2775_v45 = vrot.slane %v5296_v54, 4  ;;  %v2777_v57 = vrot.slane %v5298_v7, 3  ;;  %v2713_v41 = vrot.slane %v2684_v34, 2  ;;  %v2714_v15 = vrot.slane %v2684_v34, 3 }
 0x55a   :  { %v2770_v60 = vsel %vm486_vm2, %v2769_v29, %v2735_v58  ;;  %v2715_v52 = vrot.slane %v2684_v34, 4  ;;  %v2779_v53 = vrot.slane %v5300_v10, 2  ;;  %v2716_v39 = vrot.slane %v2684_v34, 5 }
 0x55b   :  { %v2772_v33 = vsel %vm489_vm3, %v2771_v31, %v2770_v60  ;;  %v2717_v25 = vrot.slane %v2684_v34, 6  ;;  %v2718_v43 = vrot.slane %v2684_v34, 7  ;;  %v5311_v22 = vadd.f32 %v2712_v30, %v2696_v11 }
 0x55c   :  { %v2774_v6 = vsel %vm492_vm4, %v2773_v26, %v2772_v33  ;;  %v5313_v32 = vadd.f32 %v2713_v41, %v2697_v9  ;;  %v2781_v49 = vrot.slane %v2742_v27, 1  ;;  %v5316_v3 = vadd.f32 %v2714_v15, %v2698_v14 }
 0x55d   :  { %v2776_v2 = vsel %vm495_vm5, %v2775_v45, %v2774_v6  ;;  %v5318_v13 = vadd.f32 %v2715_v52, %v2699_v51  ;;  %v5321_v55 = vadd.f32 %v2695_v46, %v2684_v34  ;;  %v5323_v38 = vadd.f32 %v2716_v39, %v2700_v4 }
 0x55e   :  { %v2778_v1 = vsel %vm498_vm6, %v2777_v57, %v2776_v2  ;;  %v2783_v24 = vrot.slane %v5311_v22, 7  ;;  %v5327_v62 = vadd.f32 %v2717_v25, %v2701_v47  ;;  %v2785_v9 = vrot.slane %v5313_v32, 6 }
 0x55f   :  { %v2780_v11 = vsel %vm501_vm7, %v2779_v53, %v2778_v1  ;;  %v5331_v5 = vadd.f32 %v2718_v43, %v2702_v20  ;;  %v2787_v46 = vrot.slane %v5316_v3, 5  ;;  %v2789_v50 = vrot.slane %v5318_v13, 4 }
 0x560   :  { %v2782_v44 = vsel %vm504_vm8, %v2781_v49, %v2780_v11  ;;  %v2784_v14 = vsel %vm486_vm2, %v2783_v24, %v5321_v55  ;;  %v2791_v36 = vrot.slane %v5323_v38, 3  ;;  %v2793_v48 = vrot.slane %v5327_v62, 2 }
 0x561   :  { %v2799_v40 = vsel %vm216_vm1, %v2782_v44, 0.0  ;;  %v2786_v51 = vsel %vm489_vm3, %v2785_v9, %v2784_v14  ;;  %v2795_v18 = vrot.slane %v5331_v5, 1 }
 0x562   :  { %2800 = vadd.xlane.f32.xlu0 %v2799_v40  ;;  %v2788_v4 = vsel %vm492_vm4, %v2787_v46, %v2786_v51 }
 0x563   :  { %v2790_v47 = vsel %vm495_vm5, %v2789_v50, %v2788_v4 }
 0x564   :  { %v2792_v16 = vsel %vm498_vm6, %v2791_v36, %v2790_v47 }
 0x565   :  { %v2794_v8 = vsel %vm501_vm7, %v2793_v48, %v2792_v16 }
 0x566   :  { %v2796_v56 = vsel %vm504_vm8, %v2795_v18, %v2794_v8 }
 0x567   :  { %v2802_v21 = vsel %vm216_vm1, %v2796_v56, 0.0 }
 0x568   :  { %2803 = vadd.xlane.f32.xlu1 %v2802_v21 }
 0x5eb   :  { %v2801_v19 = vpop.xlane.xlu0 %2800 }
 0x5ec   :  { %v2806_v63 = vmul.f32 0.03125, %v2801_v19 }
 0x5ee   :  { %v2810_v28 = vrot.slane %v2806_v63, 1  ;;  %v2811_v35 = vrot.slane %v2806_v63, 2  ;;  %v2812_v61 = vrot.slane %v2806_v63, 3  ;;  %v2813_v34 = vrot.slane %v2806_v63, 4 }
 0x5ef   :  { %v2814_v42 = vrot.slane %v2806_v63, 5  ;;  %v2815_v17 = vrot.slane %v2806_v63, 6  ;;  %v2816_v20 = vrot.slane %v2806_v63, 7  ;;  %v5348_v29 = vsub.f32 %v2735_v58, %v2806_v63 }
 0x5f0   :  { %v5351_v31 = vsub.f32 %v5290_v59, %v2810_v28  ;;  %v5354_v30 = vsub.f32 %v5292_v37, %v2811_v35  ;;  %v5357_v26 = vsub.f32 %v5294_v23, %v2812_v61  ;;  %v5360_v45 = vsub.f32 %v5296_v54, %v2813_v34 }
 0x5f1   :  { %v2804_v57 = vpop.xlane.xlu1 %2803  ;;  %v5363_v60 = vsub.f32 %v5298_v7, %v2814_v42  ;;  %v5366_v41 = vsub.f32 %v5300_v10, %v2815_v17  ;;  %v5368_v58 = vsub.f32 %v2742_v27, %v2816_v20  ;;  %v2856_v15 = vmul.f32 %v5348_v29, %v5348_v29 }
 0x5f2   :  { %v2807_v59 = vmul.f32 0.03125, %v2804_v57  ;;  %v2857_v37 = vmul.f32 %v5351_v31, %v5351_v31  ;;  %v2858_v23 = vmul.f32 %v5354_v30, %v5354_v30  ;;  %v2859_v54 = vmul.f32 %v5357_v26, %v5357_v26 }
 0x5f3   :  { %v2860_v7 = vmul.f32 %v5360_v45, %v5360_v45  ;;  %v2861_v10 = vmul.f32 %v5363_v60, %v5363_v60  ;;  %v2862_v27 = vmul.f32 %v5366_v41, %v5366_v41  ;;  %v2863_v52 = vmul.f32 %v5368_v58, %v5368_v58 }
 0x5f4   :  { %v2888_v33 = vrot.slane %v2857_v37, 7  ;;  %v2890_v53 = vrot.slane %v2858_v23, 6  ;;  %v2817_v39 = vrot.slane %v2807_v59, 1  ;;  %v2892_v25 = vrot.slane %v2859_v54, 5 }
 0x5f5   :  { %v2894_v6 = vrot.slane %v2860_v7, 4  ;;  %v2896_v43 = vrot.slane %v2861_v10, 3  ;;  %v2898_v2 = vrot.slane %v2862_v27, 2  ;;  %v2818_v1 = vrot.slane %v2807_v59, 2 }
 0x5f6   :  { %v2889_v49 = vsel %vm486_vm2, %v2888_v33, %v2856_v15  ;;  %v2819_v24 = vrot.slane %v2807_v59, 3  ;;  %v2820_v11 = vrot.slane %v2807_v59, 4  ;;  %v2821_v44 = vrot.slane %v2807_v59, 5  ;;  %v4393_v33 = vld [vmem:[%s5915_s10] sm:$0xff]  }
 0x5f7   :  { %v2891_v9 = vsel %vm489_vm3, %v2890_v53, %v2889_v49  ;;  %v2822_v14 = vrot.slane %v2807_v59, 6  ;;  %v2823_v46 = vrot.slane %v2807_v59, 7  ;;  %v5390_v51 = vsub.f32 %v5321_v55, %v2807_v59 }
 0x5f8   :  { %v2893_v40 = vsel %vm492_vm4, %v2892_v25, %v2891_v9  ;;  %v5393_v50 = vsub.f32 %v5311_v22, %v2817_v39  ;;  %v5396_v4 = vsub.f32 %v5313_v32, %v2818_v1  ;;  %v5400_v47 = vsub.f32 %v5316_v3, %v2819_v24  ;;  %v3954_v1 = vld [vmem:[%s5913_s8] ss:$0 sm:$0xff] }
 0x5f9   :  { %v2895_v36 = vsel %vm495_vm5, %v2894_v6, %v2893_v40  ;;  %v5403_v48 = vsub.f32 %v5318_v13, %v2820_v11  ;;  %v5406_v16 = vsub.f32 %v5323_v38, %v2821_v44  ;;  %v2900_v18 = vrot.slane %v2863_v52, 1  ;;  %v4392_v52 = vld [vmem:[%s5915_s10 + $0x8] sm:$0xff]  }
 0x5fa   :  { %v2897_v55 = vsel %vm498_vm6, %v2896_v43, %v2895_v36  ;;  %v5410_v22 = vsub.f32 %v5327_v62, %v2822_v14  ;;  %v5413_v32 = vsub.f32 %v5331_v5, %v2823_v46  ;;  %v2865_v3 = vmul.f32 %v5393_v50, %v5393_v50  ;;  %4316 = vmatpush3.bf16.msra.mxu0 %v4392_v52 }
 0x5fb   :  { %v2899_v8 = vsel %vm501_vm7, %v2898_v2, %v2897_v55  ;;  %v2866_v13 = vmul.f32 %v5396_v4, %v5396_v4  ;;  %v2867_v38 = vmul.f32 %v5400_v47, %v5400_v47  ;;  %v2864_v62 = vmul.f32 %v5390_v51, %v5390_v51  ;;  %4317 = vmatprep.subr.bf16.mxu0 %v4564_v0 }
 0x5fc   :  { %v2901_v56 = vsel %vm504_vm8, %v2900_v18, %v2899_v8  ;;  %v2868_v5 = vmul.f32 %v5403_v48, %v5403_v48  ;;  %v2869_v19 = vmul.f32 %v5406_v16, %v5406_v16  ;;  %v2902_v63 = vrot.slane %v2865_v3, 7 }
 0x5fd   :  { %v2918_v21 = vsel %vm216_vm1, %v2901_v56, 0.0  ;;  %v2904_v28 = vrot.slane %v2866_v13, 6  ;;  %v2870_v35 = vmul.f32 %v5410_v22, %v5410_v22  ;;  %v2871_v61 = vmul.f32 %v5413_v32, %v5413_v32 }
 0x5fe   :  { %2919 = vadd.xlane.f32.xlu0 %v2918_v21  ;;  %v2903_v34 = vsel %vm486_vm2, %v2902_v63, %v2864_v62  ;;  %v2906_v42 = vrot.slane %v2867_v38, 5  ;;  %v2908_v20 = vrot.slane %v2868_v5, 4  ;;  %v2910_v59 = vrot.slane %v2869_v19, 3  ;;  %4318 = vmatpush3.bf16.msra.mxu0 %v4393_v33  ;;  %v3955_v5 = vld [vmem:[%s5914_s9] ss:$0 sm:$0xff] }
 0x5ff   :  { %v2905_v17 = vsel %vm489_vm3, %v2904_v28, %v2903_v34  ;;  %v2912_v23 = vrot.slane %v2870_v35, 2  ;;  %v2914_v15 = vrot.slane %v2871_v61, 1 }
 0x600   :  { %v2907_v57 = vsel %vm492_vm4, %v2906_v42, %v2905_v17 }
 0x601   :  { %v2909_v37 = vsel %vm495_vm5, %v2908_v20, %v2907_v57 }
 0x602   :  { %v2911_v54 = vsel %vm498_vm6, %v2910_v59, %v2909_v37 }
 0x603   :  { %v2913_v7 = vsel %vm501_vm7, %v2912_v23, %v2911_v54 }
 0x604   :  { %v2915_v10 = vsel %vm504_vm8, %v2914_v15, %v2913_v7 }
 0x605   :  { %v2921_v27 = vsel %vm216_vm1, %v2915_v10, 0.0 }
 0x606   :  { %2922 = vadd.xlane.f32.xlu0 %v2921_v27 }
 0x687   :  { %v2920_v53 = vpop.xlane.xlu0 %2919 }
 0x688   :  { %v2924_v39 = vmul.f32 0.03125, %v2920_v53 }
 0x68a   :  { %v2926_v25 = vadd.f32 1e-05, %v2924_v39 }
 0x68c   :  { %4466 = vrsqrt.f32 %v2926_v25 }
 0x68f   :  { %v2923_v6 = vpop.xlane.xlu0 %2922 }
 0x690   :  { %v2925_v43 = vmul.f32 0.03125, %v2923_v6 }
 0x692   :  { %v2927_v2 = vadd.f32 1e-05, %v2925_v43 }
 0x694   :  { %4468 = vrsqrt.f32 %v2927_v2 }
 0x699   :  { %v4467_v49 = vpop.eup %4466 }
 0x69a   :  { %v2932_v24 = vrot.slane %v4467_v49, 1  ;;  %v2933_v11 = vrot.slane %v4467_v49, 2  ;;  %v2934_v9 = vrot.slane %v4467_v49, 3  ;;  %v2935_v44 = vrot.slane %v4467_v49, 4 }
 0x69b   :  { %v2936_v14 = vrot.slane %v4467_v49, 5  ;;  %v2937_v46 = vrot.slane %v4467_v49, 6  ;;  %v2938_v40 = vrot.slane %v4467_v49, 7  ;;  %v2962_v36 = vmul.f32 %v4467_v49, %v5348_v29 }
 0x69c   :  { %v2963_v55 = vmul.f32 %v2932_v24, %v5351_v31  ;;  %v2964_v18 = vmul.f32 %v2933_v11, %v5354_v30  ;;  %v2965_v8 = vmul.f32 %v2934_v9, %v5357_v26  ;;  %v2966_v3 = vmul.f32 %v2935_v44, %v5360_v45 }
 0x69d   :  { %v2967_v13 = vmul.f32 %v2936_v14, %v5363_v60  ;;  %v2968_v38 = vmul.f32 %v2937_v46, %v5366_v41  ;;  %v2969_v56 = vmul.f32 %v2938_v40, %v5368_v58  ;;  %v2984_v62 = vmul.f32 %v3954_v1, %v2962_v36 }
 0x69e   :  { %v2985_v29 = vmul.f32 %v3954_v1, %v2963_v55  ;;  %v2986_v21 = vmul.f32 %v3954_v1, %v2964_v18  ;;  %v2987_v31 = vmul.f32 %v3954_v1, %v2965_v8  ;;  %v2988_v19 = vmul.f32 %v3954_v1, %v2966_v3 }
 0x69f   :  { %v2989_v30 = vmul.f32 %v3954_v1, %v2967_v13  ;;  %v2990_v63 = vmul.f32 %v3954_v1, %v2968_v38  ;;  %v2991_v26 = vmul.f32 %v3954_v1, %v2969_v56  ;;  %v5463_v28 = vadd.f32 %v3955_v5, %v2984_v62 }
 0x6a0   :  { %v5465_v45 = vadd.f32 %v3955_v5, %v2985_v29  ;;  %v5467_v60 = vadd.f32 %v3955_v5, %v2986_v21  ;;  %v5469_v58 = vadd.f32 %v3955_v5, %v2987_v31  ;;  %v5471_v35 = vadd.f32 %v3955_v5, %v2988_v19 }
 0x6a1   :  { %v4469_v41 = vpop.eup %4468  ;;  %v5473_v61 = vadd.f32 %v3955_v5, %v2989_v30  ;;  %v5475_v34 = vadd.f32 %v3955_v5, %v2990_v63  ;;  %v5485_v24 = vadd.f32 %v3955_v5, %v2991_v26  ;;  %v3022_v40 = vpack.c.bf16 %v5463_v28, %v5463_v28 }
 0x6a2   :  { %v2939_v42 = vrot.slane %v4469_v41, 1  ;;  %v2940_v17 = vrot.slane %v4469_v41, 2  ;;  %v2941_v20 = vrot.slane %v4469_v41, 3  ;;  %v2942_v57 = vrot.slane %v4469_v41, 4 }
 0x6a3   :  { %v2943_v59 = vrot.slane %v4469_v41, 5  ;;  %v2944_v37 = vrot.slane %v4469_v41, 6  ;;  %v2945_v23 = vrot.slane %v4469_v41, 7  ;;  %v2970_v54 = vmul.f32 %v4469_v41, %v5390_v51 }
 0x6a4   :  { %v2971_v15 = vmul.f32 %v2939_v42, %v5393_v50  ;;  %v2972_v7 = vmul.f32 %v2940_v17, %v5396_v4  ;;  %v2973_v10 = vmul.f32 %v2941_v20, %v5400_v47  ;;  %v2974_v27 = vmul.f32 %v2942_v57, %v5403_v48 }
 0x6a5   :  { %v2975_v52 = vmul.f32 %v2943_v59, %v5406_v16  ;;  %v2976_v33 = vmul.f32 %v2944_v37, %v5410_v22  ;;  %v2977_v53 = vmul.f32 %v2945_v23, %v5413_v32  ;;  %v2992_v39 = vmul.f32 %v3954_v1, %v2970_v54 }
 0x6a6   :  { %v2993_v25 = vmul.f32 %v3954_v1, %v2971_v15  ;;  %v2994_v6 = vmul.f32 %v3954_v1, %v2972_v7  ;;  %v2995_v43 = vmul.f32 %v3954_v1, %v2973_v10  ;;  %v2996_v2 = vmul.f32 %v3954_v1, %v2974_v27 }
 0x6a7   :  { %v2997_v51 = vmul.f32 %v3954_v1, %v2975_v52  ;;  %v2998_v49 = vmul.f32 %v3954_v1, %v2976_v33  ;;  %v2999_v50 = vmul.f32 %v3954_v1, %v2977_v53  ;;  %v3023_v16 = vpack.c.bf16 %v5465_v45, %v5465_v45 }
 0x6a8   :  { %v5487_v4 = vadd.f32 %v3955_v5, %v2993_v25  ;;  %v5489_v47 = vadd.f32 %v3955_v5, %v2994_v6  ;;  %v5491_v48 = vadd.f32 %v3955_v5, %v2995_v43  ;;  %v5495_v22 = vadd.f32 %v3955_v5, %v2992_v39 }
 0x6a9   :  { %v5497_v32 = vadd.f32 %v3955_v5, %v2996_v2  ;;  %v5499_v11 = vadd.f32 %v3955_v5, %v2997_v51  ;;  %v3024_v1 = vpack.c.bf16 %v5467_v60, %v5467_v60  ;;  %v5503_v9 = vadd.f32 %v3955_v5, %v2998_v49 }
 0x6aa   :  { %v5505_v44 = vadd.f32 %v3955_v5, %v2999_v50  ;;  %v3025_v14 = vpack.c.bf16 %v5469_v58, %v5469_v58  ;;  %v3031_v46 = vpack.c.bf16 %v5487_v4, %v5487_v4  ;;  %v3026_v36 = vpack.c.bf16 %v5471_v35, %v5471_v35 }
 0x6ab   :  { %v3027_v55 = vpack.c.bf16 %v5473_v61, %v5473_v61  ;;  %v3032_v18 = vpack.c.bf16 %v5489_v47, %v5489_v47  ;;  %v3028_v8 = vpack.c.bf16 %v5475_v34, %v5475_v34  ;;  %v3029_v3 = vpack.c.bf16 %v5485_v24, %v5485_v24 }
 0x6ac   :  { %v3033_v13 = vpack.c.bf16 %v5491_v48, %v5491_v48  ;;  %v3066_v38 = vunpack.c.l.b16 %v3023_v16  ;;  %v3030_v56 = vpack.c.bf16 %v5495_v22, %v5495_v22  ;;  %v3034_v62 = vpack.c.bf16 %v5497_v32, %v5497_v32 }
 0x6ad   :  { %v3035_v5 = vpack.c.bf16 %v5499_v11, %v5499_v11  ;;  %v3067_v29 = vunpack.c.l.b16 %v3024_v1  ;;  %v3036_v21 = vpack.c.bf16 %v5503_v9, %v5503_v9  ;;  %v3037_v31 = vpack.c.bf16 %v5505_v44, %v5505_v44 }
 0x6ae   :  { %v3068_v19 = vunpack.c.l.b16 %v3025_v14  ;;  %v3074_v30 = vunpack.c.l.b16 %v3031_v46  ;;  %v3065_v63 = vunpack.c.l.b16 %v3022_v40  ;;  %v3069_v26 = vunpack.c.l.b16 %v3026_v36 }
 0x6af   :  { %v3070_v41 = vunpack.c.l.b16 %v3027_v55  ;;  %v3075_v42 = vunpack.c.l.b16 %v3032_v18  ;;  %v3071_v17 = vunpack.c.l.b16 %v3028_v8  ;;  %v3076_v20 = vunpack.c.l.b16 %v3033_v13 }
 0x6b0   :  { %v3081_v57 = vrot.slane %v3066_v38, 7  ;;  %v3083_v59 = vrot.slane %v3067_v29, 6  ;;  %v3072_v37 = vunpack.c.l.b16 %v3029_v3  ;;  %v3073_v23 = vunpack.c.l.b16 %v3030_v56  ;;  %v4394_v29 = vld [vmem:[%s5917_s12 + $0x38] sm:$0xff]  }
 0x6b1   :  { %v3077_v54 = vunpack.c.l.b16 %v3034_v62  ;;  %v3078_v15 = vunpack.c.l.b16 %v3035_v5  ;;  %v3085_v10 = vrot.slane %v3068_v19, 5  ;;  %v3095_v27 = vrot.slane %v3074_v30, 7  ;;  %4324 = vmatpush3.bf16.msra.mxu1 %v4394_v29  ;;  %v4397_v19 = vld [vmem:[%s5917_s12 + $0x20] sm:$0xff]   ;;  %v4398_v30 = vld [vmem:[%s5917_s12 + $0x18] sm:$0xff]  }
 0x6b2   :  { %v3082_v7 = vsel %vm486_vm2, %v3081_v57, %v3065_v63  ;;  %v3097_v52 = vrot.slane %v3075_v42, 6  ;;  %v3079_v33 = vunpack.c.l.b16 %v3036_v21  ;;  %v3080_v53 = vunpack.c.l.b16 %v3037_v31  ;;  %4325 = vmatprep.subr.bf16.mxu1 %v4564_v0  ;;  %v4395_v21 = vld [vmem:[%s5917_s12 + $0x30] sm:$0xff]   ;;  %v4396_v31 = vld [vmem:[%s5917_s12 + $0x28] sm:$0xff]   ;;  %v3956_v42 = vld [vmem:[#allocation5] ss:$0 sm:$0xff] }
 0x6b3   :  { %v3084_v39 = vsel %vm489_vm3, %v3083_v59, %v3082_v7  ;;  %v3087_v25 = vrot.slane %v3069_v26, 4  ;;  %v3089_v43 = vrot.slane %v3070_v41, 3  ;;  %v3096_v2 = vsel %vm486_vm2, %v3095_v27, %v3073_v23  ;;  %v4399_v63 = vld [vmem:[%s5917_s12 + $0x10] sm:$0xff]   ;;  %v4400_v26 = vld [vmem:[%s5917_s12 + $0x8] sm:$0xff]   ;;  %v4401_v41 = vld [vmem:[%s5917_s12] sm:$0xff]  }
 0x6b4   :  { %v3086_v6 = vsel %vm492_vm4, %v3085_v10, %v3084_v39  ;;  %v3099_v51 = vrot.slane %v3076_v20, 5  ;;  %v3091_v50 = vrot.slane %v3071_v17, 2  ;;  %v3098_v16 = vsel %vm489_vm3, %v3097_v52, %v3096_v2 }
 0x6b5   :  { %v3088_v49 = vsel %vm495_vm5, %v3087_v25, %v3086_v6  ;;  %v3101_v1 = vrot.slane %v3077_v54, 4  ;;  %v3103_v40 = vrot.slane %v3078_v15, 3  ;;  %v3105_v18 = vrot.slane %v3079_v33, 2  ;;  %4326 = vmatpush3.bf16.msra.mxu1 %v4395_v21 }
 0x6b6   :  { %v3090_v14 = vsel %vm498_vm6, %v3089_v43, %v3088_v49  ;;  %v3100_v46 = vsel %vm492_vm4, %v3099_v51, %v3098_v16  ;;  %v3093_v8 = vrot.slane %v3072_v37, 1  ;;  %v3107_v13 = vrot.slane %v3080_v53, 1  ;;  %4327 = vmatprep.subr.bf16.mxu1 %v4564_v0 }
 0x6b7   :  { %v3092_v36 = vsel %vm501_vm7, %v3091_v50, %v3090_v14  ;;  %v3102_v55 = vsel %vm495_vm5, %v3101_v1, %v3100_v46  ;;  %v3960_v14 = vld [vmem:[%s5918_s13] ss:$0 sm:$0xff] }
 0x6b8   :  { %v3104_v3 = vsel %vm498_vm6, %v3103_v40, %v3102_v55  ;;  %v3094_v56 = vsel %vm504_vm8, %v3093_v8, %v3092_v36 }
 0x6b9   :  { %v3106_v38 = vsel %vm501_vm7, %v3105_v18, %v3104_v3  ;;  %4328 = vmatpush3.bf16.msra.mxu1 %v4396_v31 }
 0x6ba   :  { %v3108_v62 = vsel %vm504_vm8, %v3107_v13, %v3106_v38  ;;  %4329 = vmatprep.subr.bf16.mxu1 %v4564_v0 }
 0x6bb   :  { %v3109_v5 = vpack.c.b16 %v3108_v62, %v3094_v56 }
 0x6bd   :  { %4320 = vmatmul.mubr.msk.bf16.vlgmr.msra.gmra.mxu0 %vm216_vm1, %v3109_v5  ;;  %4330 = vmatpush3.bf16.msra.mxu1 %v4397_v19 }
 0x6be   :  { %4331 = vmatprep.subr.bf16.mxu1 %v4564_v0 }
 0x6c1   :  { %4332 = vmatpush3.bf16.msra.mxu1 %v4398_v30 }
 0x6c2   :  { %4333 = vmatprep.subr.bf16.mxu1 %v4564_v0 }
 0x6c5   :  { %4334 = vmatpush3.bf16.msra.mxu1 %v4399_v63 }
 0x6c6   :  { %4335 = vmatprep.subr.bf16.mxu1 %v4564_v0 }
 0x6c9   :  { %4336 = vmatpush3.bf16.msra.mxu1 %v4400_v26 }
 0x6ca   :  { %4337 = vmatprep.subr.bf16.mxu1 %v4564_v0 }
 0x6cd   :  { %4338 = vmatpush3.bf16.msra.mxu1 %v4401_v41 }
 0x77d   :  { %v3159_v17 = vpop.f32.mrf.mxu0 }
 0x77e   :  { %v3160_v20 = vadd.f32 %v3956_v42, %v3159_v17 }
 0x77f   :  { %v4321_v57 = vpop.f32.mrf.mxu0 }
 0x780   :  { %v3166_v59 = vmul.f32 %v3160_v20, %v3160_v20 }
 0x781   :  { %v3162_v37 = vpop.f32.mrf.mxu0 }
 0x782   :  { %v3168_v23 = vmul.f32 %v3166_v59, %v3160_v20  ;;  %v3163_v54 = vadd.f32 %v3956_v42, %v3162_v37 }
 0x783   :  { %v4322_v15 = vpop.f32.mrf.mxu0 }
 0x784   :  { %v3170_v7 = vmul.f32 0.044715, %v3168_v23  ;;  %v3167_v10 = vmul.f32 %v3163_v54, %v3163_v54 }
 0x786   :  { %v3172_v27 = vadd.f32 %v3170_v7, %v3160_v20  ;;  %v3169_v52 = vmul.f32 %v3167_v10, %v3163_v54 }
 0x788   :  { %v3174_v33 = vmul.f32 0.7978846, %v3172_v27  ;;  %v3171_v53 = vmul.f32 0.044715, %v3169_v52 }
 0x78a   :  { %4470 = vtanh.f32 %v3174_v33  ;;  %v3173_v39 = vadd.f32 %v3171_v53, %v3163_v54 }
 0x78c   :  { %v3175_v25 = vmul.f32 0.7978846, %v3173_v39 }
 0x78e   :  { %4472 = vtanh.f32 %v3175_v25 }
 0x797   :  { %v4471_v0 = vpop.eup %4470 }
 0x798   :  { %v3178_v6 = vadd.f32 1.0, %v4471_v0 }
 0x79a   :  { %v3180_v2 = vmul.f32 0.5, %v3178_v6 }
 0x79b   :  { %v4473_v43 = vpop.eup %4472 }
 0x79c   :  { %v3179_v51 = vadd.f32 1.0, %v4473_v43  ;;  %v3182_v50 = vmul.f32 %v3180_v2, %v3160_v20 }
 0x79e   :  { %v3181_v49 = vmul.f32 0.5, %v3179_v51 }
 0x7a0   :  { %v3183_v16 = vmul.f32 %v3181_v49, %v3163_v54 }
 0x7a2   :  { %v3184_v1 = vpack.c.bf16 %v3183_v16, %v3182_v50 }
 0x7a4   :  { %4340 = vmatmul.mubr.bf16.vlgmr.msra.gmra.mxu1 %v3184_v1 }
 0x864   :  { %v3290_v46 = vpop.f32.mrf.mxu1 }
 0x865   :  { %v3291_v40 = vadd.f32 %v3960_v14, %v3290_v46 }
 0x866   :  { %v4341_v36 = vpop.f32.mrf.mxu1 }
 0x867   :  { %v3299_v55 = vrot.slane %v3291_v40, 1  ;;  %v3300_v18 = vrot.slane %v3291_v40, 2  ;;  %v3301_v8 = vrot.slane %v3291_v40, 3  ;;  %v3302_v3 = vrot.slane %v3291_v40, 4 }
 0x868   :  { %v3293_v13 = vpop.f32.mrf.mxu1  ;;  %v3303_v38 = vrot.slane %v3291_v40, 5  ;;  %v3304_v56 = vrot.slane %v3291_v40, 6  ;;  %v3305_v62 = vrot.slane %v3291_v40, 7  ;;  %v3329_v41 = vadd.f32 %v3291_v40, %v5463_v28 }
 0x869   :  { %v3294_v5 = vadd.f32 %v3960_v14, %v3293_v13  ;;  %v5585_v29 = vadd.f32 %v3299_v55, %v5465_v45  ;;  %v5588_v21 = vadd.f32 %v3300_v18, %v5467_v60  ;;  %v5591_v31 = vadd.f32 %v3301_v8, %v5469_v58 }
 0x86a   :  { %v4342_v19 = vpop.f32.mrf.mxu1  ;;  %v5594_v30 = vadd.f32 %v3302_v3, %v5471_v35  ;;  %v5597_v63 = vadd.f32 %v3303_v38, %v5473_v61  ;;  %v5600_v26 = vadd.f32 %v3304_v56, %v5475_v34  ;;  %v3336_v58 = vadd.f32 %v3305_v62, %v5485_v24 }
 0x86b   :  { %v3363_v45 = vrot.slane %v5585_v29, 7  ;;  %v3365_v60 = vrot.slane %v5588_v21, 6  ;;  %v3306_v42 = vrot.slane %v3294_v5, 1  ;;  %v3367_v17 = vrot.slane %v5591_v31, 5 }
 0x86c   :  { %v3369_v35 = vrot.slane %v5594_v30, 4  ;;  %v3371_v20 = vrot.slane %v5597_v63, 3  ;;  %v3307_v57 = vrot.slane %v3294_v5, 2  ;;  %v3308_v34 = vrot.slane %v3294_v5, 3 }
 0x86d   :  { %v3364_v61 = vsel %vm486_vm2, %v3363_v45, %v3329_v41  ;;  %v3309_v59 = vrot.slane %v3294_v5, 4  ;;  %v3373_v37 = vrot.slane %v5600_v26, 2  ;;  %v3310_v23 = vrot.slane %v3294_v5, 5 }
 0x86e   :  { %v3366_v28 = vsel %vm489_vm3, %v3365_v60, %v3364_v61  ;;  %v3311_v54 = vrot.slane %v3294_v5, 6  ;;  %v3312_v24 = vrot.slane %v3294_v5, 7  ;;  %v5614_v7 = vadd.f32 %v3306_v42, %v5487_v4 }
 0x86f   :  { %v3368_v15 = vsel %vm492_vm4, %v3367_v17, %v3366_v28  ;;  %v5617_v10 = vadd.f32 %v3307_v57, %v5489_v47  ;;  %v3375_v52 = vrot.slane %v3336_v58, 1  ;;  %v5621_v33 = vadd.f32 %v3308_v34, %v5491_v48 }
 0x870   :  { %v3370_v27 = vsel %vm495_vm5, %v3369_v35, %v3368_v15  ;;  %v5624_v53 = vadd.f32 %v3309_v59, %v5497_v32  ;;  %v5628_v25 = vadd.f32 %v3294_v5, %v5495_v22  ;;  %v5631_v4 = vadd.f32 %v3310_v23, %v5499_v11 }
 0x871   :  { %v3372_v39 = vsel %vm498_vm6, %v3371_v20, %v3370_v27  ;;  %v3377_v47 = vrot.slane %v5614_v7, 7  ;;  %v5636_v6 = vadd.f32 %v3311_v54, %v5503_v9  ;;  %v3379_v48 = vrot.slane %v5617_v10, 6 }
 0x872   :  { %v3374_v0 = vsel %vm501_vm7, %v3373_v37, %v3372_v39  ;;  %v5641_v43 = vadd.f32 %v3312_v24, %v5505_v44  ;;  %v3381_v11 = vrot.slane %v5621_v33, 5  ;;  %v3383_v49 = vrot.slane %v5624_v53, 4 }
 0x873   :  { %v3376_v32 = vsel %vm504_vm8, %v3375_v52, %v3374_v0  ;;  %v3378_v22 = vsel %vm486_vm2, %v3377_v47, %v5628_v25  ;;  %v3385_v50 = vrot.slane %v5631_v4, 3  ;;  %v3387_v44 = vrot.slane %v5636_v6, 2 }
 0x874   :  { %v3393_v2 = vsel %vm216_vm1, %v3376_v32, 0.0  ;;  %v3380_v51 = vsel %vm489_vm3, %v3379_v48, %v3378_v22  ;;  %v3389_v14 = vrot.slane %v5641_v43, 1 }
 0x875   :  { %3394 = vadd.xlane.f32.xlu1 %v3393_v2  ;;  %v3382_v9 = vsel %vm492_vm4, %v3381_v11, %v3380_v51 }
 0x876   :  { %v3384_v16 = vsel %vm495_vm5, %v3383_v49, %v3382_v9 }
 0x877   :  { %v3386_v1 = vsel %vm498_vm6, %v3385_v50, %v3384_v16 }
 0x878   :  { %v3388_v46 = vsel %vm501_vm7, %v3387_v44, %v3386_v1 }
 0x879   :  { %v3390_v40 = vsel %vm504_vm8, %v3389_v14, %v3388_v46 }
 0x87a   :  { %v3396_v36 = vsel %vm216_vm1, %v3390_v40, 0.0 }
 0x87b   :  { %3397 = vadd.xlane.f32.xlu0 %v3396_v36 }
 0x8fe   :  { %v3395_v55 = vpop.xlane.xlu1 %3394 }
 0x8ff   :  { %v3399_v18 = vmul.f32 0.03125, %v3395_v55 }
 0x901   :  { %v3403_v8 = vrot.slane %v3399_v18, 1  ;;  %v3404_v3 = vrot.slane %v3399_v18, 2  ;;  %v3405_v13 = vrot.slane %v3399_v18, 3  ;;  %v3406_v38 = vrot.slane %v3399_v18, 4 }
 0x902   :  { %v3407_v56 = vrot.slane %v3399_v18, 5  ;;  %v3408_v62 = vrot.slane %v3399_v18, 6  ;;  %v3409_v5 = vrot.slane %v3399_v18, 7  ;;  %v5658_v19 = vsub.f32 %v3329_v41, %v3399_v18 }
 0x903   :  { %v5661_v45 = vsub.f32 %v5585_v29, %v3403_v8  ;;  %v5664_v60 = vsub.f32 %v5588_v21, %v3404_v3  ;;  %v5667_v42 = vsub.f32 %v5591_v31, %v3405_v13  ;;  %v5670_v17 = vsub.f32 %v5594_v30, %v3406_v38 }
 0x904   :  { %v3398_v35 = vpop.xlane.xlu0 %3397  ;;  %v5673_v20 = vsub.f32 %v5597_v63, %v3407_v56  ;;  %v5676_v61 = vsub.f32 %v5600_v26, %v3408_v62  ;;  %v5678_v41 = vsub.f32 %v3336_v58, %v3409_v5  ;;  %v3449_v57 = vmul.f32 %v5658_v19, %v5658_v19 }
 0x905   :  { %v3400_v29 = vmul.f32 0.03125, %v3398_v35  ;;  %v3450_v21 = vmul.f32 %v5661_v45, %v5661_v45  ;;  %v3451_v31 = vmul.f32 %v5664_v60, %v5664_v60  ;;  %v3452_v30 = vmul.f32 %v5667_v42, %v5667_v42 }
 0x906   :  { %v3453_v63 = vmul.f32 %v5670_v17, %v5670_v17  ;;  %v3454_v26 = vmul.f32 %v5673_v20, %v5673_v20  ;;  %v3455_v58 = vmul.f32 %v5676_v61, %v5676_v61  ;;  %v3456_v34 = vmul.f32 %v5678_v41, %v5678_v41 }
 0x907   :  { %v3481_v59 = vrot.slane %v3450_v21, 7  ;;  %v3483_v28 = vrot.slane %v3451_v31, 6  ;;  %v3410_v37 = vrot.slane %v3400_v29, 1  ;;  %v3485_v23 = vrot.slane %v3452_v30, 5 }
 0x908   :  { %v3487_v54 = vrot.slane %v3453_v63, 4  ;;  %v3489_v15 = vrot.slane %v3454_v26, 3  ;;  %v3491_v24 = vrot.slane %v3455_v58, 2  ;;  %v3411_v52 = vrot.slane %v3400_v29, 2 }
 0x909   :  { %v3482_v27 = vsel %vm486_vm2, %v3481_v59, %v3449_v57  ;;  %v3412_v39 = vrot.slane %v3400_v29, 3  ;;  %v3413_v47 = vrot.slane %v3400_v29, 4  ;;  %v3414_v48 = vrot.slane %v3400_v29, 5 }
 0x90a   :  { %v3484_v0 = vsel %vm489_vm3, %v3483_v28, %v3482_v27  ;;  %v3415_v32 = vrot.slane %v3400_v29, 6  ;;  %v3416_v22 = vrot.slane %v3400_v29, 7  ;;  %v5700_v2 = vsub.f32 %v5628_v25, %v3400_v29 }
 0x90b   :  { %v3486_v11 = vsel %vm492_vm4, %v3485_v23, %v3484_v0  ;;  %v5703_v51 = vsub.f32 %v5614_v7, %v3410_v37  ;;  %v5706_v49 = vsub.f32 %v5617_v10, %v3411_v52  ;;  %v5710_v50 = vsub.f32 %v5621_v33, %v3412_v39 }
 0x90c   :  { %v3488_v9 = vsel %vm495_vm5, %v3487_v54, %v3486_v11  ;;  %v5713_v16 = vsub.f32 %v5624_v53, %v3413_v47  ;;  %v5716_v44 = vsub.f32 %v5631_v4, %v3414_v48  ;;  %v3493_v1 = vrot.slane %v3456_v34, 1 }
 0x90d   :  { %v3490_v25 = vsel %vm498_vm6, %v3489_v15, %v3488_v9  ;;  %v5720_v7 = vsub.f32 %v5636_v6, %v3415_v32  ;;  %v5723_v10 = vsub.f32 %v5641_v43, %v3416_v22  ;;  %v3458_v33 = vmul.f32 %v5703_v51, %v5703_v51  ;;  %v5755_v15 = vld [vmem:[%s5919_s14] ss:$0 sm:$0xff]  ;;  %s4568_s14 = smov [#allocation7]  }
 0x90e   :  { %v3492_v14 = vsel %vm501_vm7, %v3491_v24, %v3490_v25  ;;  %v3459_v53 = vmul.f32 %v5706_v49, %v5706_v49  ;;  %v3460_v4 = vmul.f32 %v5710_v50, %v5710_v50  ;;  %v3457_v6 = vmul.f32 %v5700_v2, %v5700_v2  ;;  %v5761_v22 = vld [vmem:[%s5920_s15] ss:$0 sm:$0xff]  ;;  %s3841_s15 = sshll.u32 %s4568_s14, 4  ;;  %s3842_s15 = int_to_ptr.vmem [resolvable:$true] %s3841_s15 }
 0x90f   :  { %v3494_v46 = vsel %vm504_vm8, %v3493_v1, %v3492_v14  ;;  %v3461_v43 = vmul.f32 %v5713_v16, %v5713_v16  ;;  %v3462_v36 = vmul.f32 %v5716_v44, %v5716_v44  ;;  %v3495_v55 = vrot.slane %v3458_v33, 7  ;;  %s4534_s22 = scalar_lea.vmem %s3842_s15, 128  ;;  %p4539_p11 = scmp.lt.s32.totalorder %s3842_s15, %s3842_s15 }
 0x910   :  { %v3511_v40 = vsel %vm216_vm1, %v3494_v46, 0.0  ;;  %v3497_v18 = vrot.slane %v3459_v53, 6  ;;  %v3463_v8 = vmul.f32 %v5720_v7, %v5720_v7  ;;  %v3464_v3 = vmul.f32 %v5723_v10, %v5723_v10  ;;  %p4535_p10 = scmp.ne.s32.totalorder %s3842_s15, %s4534_s22  ;;  %p4540_p12 = scmp.lt.s32.totalorder %s4534_s22, %s4534_s22 }
 0x911   :  { %3512 = vadd.xlane.f32.xlu1 %v3511_v40  ;;  %v3496_v13 = vsel %vm486_vm2, %v3495_v55, %v3457_v6  ;;  %v3499_v38 = vrot.slane %v3460_v4, 5  ;;  %v3501_v62 = vrot.slane %v3461_v43, 4  ;;  %v3503_v35 = vrot.slane %v3462_v36, 3 }
 0x912   :  { %v3498_v56 = vsel %vm489_vm3, %v3497_v18, %v3496_v13  ;;  %v3505_v21 = vrot.slane %v3463_v8, 2  ;;  %v3507_v30 = vrot.slane %v3464_v3, 1  ;;  %p4541_p13 = por %p4540_p12, %p4539_p11 }
 0x913   :  { %v3500_v5 = vsel %vm492_vm4, %v3499_v38, %v3498_v56 }
 0x914   :  { %v3502_v29 = vsel %vm495_vm5, %v3501_v62, %v3500_v5  ;;  %p4542_p0 = pnand %p4541_p13, %p4535_p10 }
 0x915   :  { %v3504_v31 = vsel %vm498_vm6, %v3503_v35, %v3502_v29 }
 0x916   :  { %v3506_v57 = vsel %vm501_vm7, %v3505_v21, %v3504_v31 }
 0x917   :  { %v3508_v63 = vsel %vm504_vm8, %v3507_v30, %v3506_v57 }
 0x918   :  { %v3514_v26 = vsel %vm216_vm1, %v3508_v63, 0.0 }
 0x919   :  { %3515 = vadd.xlane.f32.xlu0 %v3514_v26 }
 0x99a   :  { %v3513_v58 = vpop.xlane.xlu1 %3512 }
 0x99b   :  { %v3517_v34 = vmul.f32 0.03125, %v3513_v58 }
 0x99d   :  { %v3519_v59 = vadd.f32 1e-05, %v3517_v34 }
 0x99f   :  { %4474 = vrsqrt.f32 %v3519_v59 }
 0x9a2   :  { %v3516_v28 = vpop.xlane.xlu0 %3515 }
 0x9a3   :  { %v3518_v37 = vmul.f32 0.03125, %v3516_v28 }
 0x9a5   :  { %v3520_v23 = vadd.f32 1e-05, %v3518_v37 }
 0x9a7   :  { %4476 = vrsqrt.f32 %v3520_v23 }
 0x9ac   :  { %v4475_v54 = vpop.eup %4474 }
 0x9ad   :  { %v3525_v24 = vrot.slane %v4475_v54, 1  ;;  %v3526_v27 = vrot.slane %v4475_v54, 2  ;;  %v3527_v52 = vrot.slane %v4475_v54, 3  ;;  %v3528_v39 = vrot.slane %v4475_v54, 4 }
 0x9ae   :  { %v3529_v47 = vrot.slane %v4475_v54, 5  ;;  %v3530_v0 = vrot.slane %v4475_v54, 6  ;;  %v3531_v48 = vrot.slane %v4475_v54, 7  ;;  %v3555_v32 = vmul.f32 %v4475_v54, %v5658_v19 }
 0x9af   :  { %v3556_v11 = vmul.f32 %v3525_v24, %v5661_v45  ;;  %v3557_v9 = vmul.f32 %v3526_v27, %v5664_v60  ;;  %v3558_v25 = vmul.f32 %v3527_v52, %v5667_v42  ;;  %v3559_v1 = vmul.f32 %v3528_v39, %v5670_v17 }
 0x9b0   :  { %v3560_v14 = vmul.f32 %v3529_v47, %v5673_v20  ;;  %v3561_v33 = vmul.f32 %v3530_v0, %v5676_v61  ;;  %v3562_v53 = vmul.f32 %v3531_v48, %v5678_v41  ;;  %v3577_v19 = vmul.f32 %v5755_v15, %v3555_v32 }
 0x9b1   :  { %v3578_v4 = vmul.f32 %v5755_v15, %v3556_v11  ;;  %v3579_v46 = vmul.f32 %v5755_v15, %v3557_v9  ;;  %v3580_v45 = vmul.f32 %v5755_v15, %v3558_v25  ;;  %v3581_v60 = vmul.f32 %v5755_v15, %v3559_v1  ;;  %v3634_v11 = vld [vmem:[#allocation7] sm:$0x1]  ;;  %v3637_v9 = vld [vmem:[#allocation7 + $0x1] sm:$0x1]  ;;  %v3640_v25 = vld [vmem:[#allocation7 + $0x2] sm:$0x1] }
 0x9b2   :  { %v3582_v42 = vmul.f32 %v5755_v15, %v3560_v14  ;;  %v3583_v17 = vmul.f32 %v5755_v15, %v3561_v33  ;;  %v3584_v20 = vmul.f32 %v5755_v15, %v3562_v53  ;;  %v5779_v61 = vadd.f32 %v5761_v22, %v3577_v19  ;;  %v3643_v19 = vld [vmem:[#allocation7 + $0x3] sm:$0x1] }
 0x9b3   :  { %v5782_v41 = vadd.f32 %v5761_v22, %v3578_v4  ;;  %v5785_v6 = vadd.f32 %v5761_v22, %v3579_v46  ;;  %v5788_v43 = vadd.f32 %v5761_v22, %v3580_v45  ;;  %v5791_v40 = vadd.f32 %v5761_v22, %v3581_v60  ;;  %v3646_v4 = vld [vmem:[#allocation7 + $0x4] sm:$0x1]  ;;  %v3649_v46 = vld [vmem:[#allocation7 + $0x5] sm:$0x1] }
 0x9b4   :  { %v5794_v36 = vadd.f32 %v5761_v22, %v3582_v42  ;;  %v5797_v55 = vadd.f32 %v5761_v22, %v3583_v17  ;;  %v5800_v18 = vadd.f32 %v5761_v22, %v3584_v20  ;;  %v3615_v8 = vpack.c.bf16 %v5779_v61, %v5779_v61  ;;  %v4477_v3 = vpop.eup %4476  ;;  %v3652_v17 = vld [vmem:[#allocation7 + $0x6] sm:$0x1]  ;;  %v3655_v20 = vld [vmem:[#allocation7 + $0x7] sm:$0x1] }
 0x9b5   :  { %v3616_v13 = vpack.c.bf16 %v5782_v41, %v5782_v41  ;;  %v3617_v38 = vpack.c.bf16 %v5785_v6, %v5785_v6  ;;  %v3618_v56 = vpack.c.bf16 %v5788_v43, %v5788_v43  ;;  %v3619_v62 = vpack.c.bf16 %v5791_v40, %v5791_v40 }
 0x9b6   :  { %v3532_v5 = vrot.slane %v4477_v3, 1  ;;  %v3533_v35 = vrot.slane %v4477_v3, 2  ;;  %v3534_v29 = vrot.slane %v4477_v3, 3  ;;  %v3535_v21 = vrot.slane %v4477_v3, 4 }
 0x9b7   :  { %v3536_v31 = vrot.slane %v4477_v3, 5  ;;  %v3537_v30 = vrot.slane %v4477_v3, 6  ;;  %v3538_v57 = vrot.slane %v4477_v3, 7  ;;  %v3563_v63 = vmul.f32 %v4477_v3, %v5700_v2 }
 0x9b8   :  { %v3564_v26 = vmul.f32 %v3532_v5, %v5703_v51  ;;  %v3565_v58 = vmul.f32 %v3533_v35, %v5706_v49  ;;  %v3566_v34 = vmul.f32 %v3534_v29, %v5710_v50  ;;  %v3567_v59 = vmul.f32 %v3535_v21, %v5713_v16 }
 0x9b9   :  { %v3568_v28 = vmul.f32 %v3536_v31, %v5716_v44  ;;  %v3569_v37 = vmul.f32 %v3537_v30, %v5720_v7  ;;  %v3570_v23 = vmul.f32 %v3538_v57, %v5723_v10  ;;  %v3585_v54 = vmul.f32 %v5755_v15, %v3563_v63 }
 0x9ba   :  { %v3586_v24 = vmul.f32 %v5755_v15, %v3564_v26  ;;  %v3587_v2 = vmul.f32 %v5755_v15, %v3565_v58  ;;  %v3588_v51 = vmul.f32 %v5755_v15, %v3566_v34  ;;  %v3589_v49 = vmul.f32 %v5755_v15, %v3567_v59 }
 0x9bb   :  { %v3590_v50 = vmul.f32 %v5755_v15, %v3568_v28  ;;  %v3591_v16 = vmul.f32 %v5755_v15, %v3569_v37  ;;  %v3592_v44 = vmul.f32 %v5755_v15, %v3570_v23  ;;  %v3607_v7 = vadd.f32 %v5761_v22, %v3585_v54 }
 0x9bc   :  { %v3608_v10 = vadd.f32 %v5761_v22, %v3586_v24  ;;  %v3609_v27 = vadd.f32 %v5761_v22, %v3587_v2  ;;  %v3610_v52 = vadd.f32 %v5761_v22, %v3588_v51  ;;  %v3611_v39 = vadd.f32 %v5761_v22, %v3589_v49 }
 0x9bd   :  { %v3612_v0 = vadd.f32 %v5761_v22, %v3590_v50  ;;  %v3613_v15 = vadd.f32 %v5761_v22, %v3591_v16  ;;  %v3614_v48 = vadd.f32 %v5761_v22, %v3592_v44  ;;  %v3620_v32 = vpack.c.bf16 %v5794_v36, %v5794_v36 }
 0x9be   :  { %v3621_v1 = vpack.c.bf16 %v5797_v55, %v5797_v55  ;;  %v3622_v14 = vpack.c.bf16 %v5800_v18, %v5800_v18  ;;  %v3623_v33 = vpack.c.bf16 %v3607_v7, %v3607_v7  ;;  %v3624_v53 = vpack.c.bf16 %v3608_v10, %v3608_v10 }
 0x9bf   :  { %v3625_v45 = vpack.c.bf16 %v3609_v27, %v3609_v27  ;;  %v3626_v60 = vpack.c.bf16 %v3610_v52, %v3610_v52  ;;  %v3627_v22 = vpack.c.bf16 %v3611_v39, %v3611_v39  ;;  %v3628_v42 = vpack.c.bf16 %v3612_v0, %v3612_v0 }
 0x9c0   :  { %v3629_v61 = vpack.c.bf16 %v3613_v15, %v3613_v15  ;;  %v3630_v41 = vpack.c.bf16 %v3614_v48, %v3614_v48  ;;  %v3635_v6 = vsel %vm5835_vm13, %v3615_v8, %v3634_v11  ;;  %v3638_v43 = vsel %vm5835_vm13, %v3616_v13, %v3637_v9 }
 0x9c1   :  { %3636 = vst [vmem:[#allocation7] sm:$0x1] %v3635_v6  ;;  %3639 = vst [vmem:[#allocation7 + $0x1] sm:$0x1] %v3638_v43  ;;  %v3641_v40 = vsel %vm5835_vm13, %v3617_v38, %v3640_v25  ;;  %v3644_v36 = vsel %vm5835_vm13, %v3618_v56, %v3643_v19  ;;  %v3647_v55 = vsel %vm5835_vm13, %v3619_v62, %v3646_v4 }
 0x9c2   :  { %v3650_v18 = vsel %vm5835_vm13, %v3620_v32, %v3649_v46  ;;  %3642 = vst [vmem:[#allocation7 + $0x2] sm:$0x1] %v3641_v40  ;;  %3645 = vst [vmem:[#allocation7 + $0x3] sm:$0x1] %v3644_v36  ;;  %v3653_v8 = vsel %vm5835_vm13, %v3621_v1, %v3652_v17  ;;  %v3656_v3 = vsel %vm5835_vm13, %v3622_v14, %v3655_v20 }
 0x9c3   :  { %3648 = vst [vmem:[#allocation7 + $0x4] sm:$0x1] %v3647_v55  ;;  %3651 = vst [vmem:[#allocation7 + $0x5] sm:$0x1] %v3650_v18  ;;  %v3672_v13 = vrot.slane %v3623_v33, %v4812_v12  ;;  %v3686_v38 = vrot.slane %v3624_v53, %v4812_v12  ;;  %v3700_v56 = vrot.slane %v3625_v45, %v4812_v12 }
 0x9c4   :  { %3654 = vst [vmem:[#allocation7 + $0x6] sm:$0x1] %v3653_v8  ;;  %3657 = vst [vmem:[#allocation7 + $0x7] sm:$0x1] %v3656_v3  ;;  %v3714_v62 = vrot.slane %v3626_v60, %v4812_v12  ;;  %v3728_v5 = vrot.slane %v3627_v22, %v4812_v12  ;;  %v3742_v35 = vrot.slane %v3628_v42, %v4812_v12 }
 0x9c5   :  { %v3679_v29 = vrot.slane %v3672_v13, %v4812_v12  ;;  %v3693_v21 = vrot.slane %v3686_v38, %v4812_v12  ;;  %v3756_v31 = vrot.slane %v3629_v61, %v4812_v12  ;;  %v3770_v30 = vrot.slane %v3630_v41, %v4812_v12 }
 0x9c6   :  { %v3707_v57 = vrot.slane %v3700_v56, %v4812_v12  ;;  %v3721_v63 = vrot.slane %v3714_v62, %v4812_v12  ;;  %v3735_v26 = vrot.slane %v3728_v5, %v4812_v12  ;;  %v3749_v58 = vrot.slane %v3742_v35, %v4812_v12 }
 0x9c7   :  { %v3763_v34 = vrot.slane %v3756_v31, %v4812_v12  ;;  %v3777_v59 = vrot.slane %v3770_v30, %v4812_v12  ;;  %v3779_v28 = vshll.u32 %v3679_v29, 16  ;;  %v3782_v37 = vshll.u32 %v3693_v21, 16 }
 0x9c8   :  { %v3785_v54 = vshll.u32 %v3707_v57, 16  ;;  %v3788_v24 = vshll.u32 %v3721_v63, 16  ;;  %v3791_v2 = vshll.u32 %v3735_v26, 16  ;;  %v3794_v51 = vshll.u32 %v3749_v58, 16  ;;  %v3812_v16 = vld [vmem:[#allocation7] sm:$0x1] }
 0x9c9   :  { %v3797_v49 = vshll.u32 %v3763_v34, 16  ;;  %v3800_v50 = vshll.u32 %v3777_v59, 16  ;;  %v3815_v44 = vld [vmem:[#allocation7 + $0x1] sm:$0x1]  ;;  %v3813_v12 = vsel %vm5882_vm14, %v3779_v28, %v3812_v16  ;;  %v3818_v10 = vld [vmem:[#allocation7 + $0x2] sm:$0x1] }
 0x9ca   :  { %v3816_v7 = vsel %vm5882_vm14, %v3782_v37, %v3815_v44  ;;  %v3821_v27 = vld [vmem:[#allocation7 + $0x3] sm:$0x1]  ;;  %v3824_v52 = vld [vmem:[#allocation7 + $0x4] sm:$0x1]  ;;  %3814 = vst [vmem:[#allocation7] sm:$0x1] %v3813_v12  ;;  %v3819_v39 = vsel %vm5882_vm14, %v3785_v54, %v3818_v10 }
 0x9cb   :  { %3817 = vst [vmem:[#allocation7 + $0x1] sm:$0x1] %v3816_v7  ;;  %v3822_v47 = vsel %vm5882_vm14, %v3788_v24, %v3821_v27  ;;  %v3825_v0 = vsel %vm5882_vm14, %v3791_v2, %v3824_v52  ;;  %v3827_v15 = vld [vmem:[#allocation7 + $0x5] sm:$0x1]  ;;  %v3830_v48 = vld [vmem:[#allocation7 + $0x6] sm:$0x1] }
 0x9cc   :  { %v3833_v32 = vld [vmem:[#allocation7 + $0x7] sm:$0x1]  ;;  %3820 = vst [vmem:[#allocation7 + $0x2] sm:$0x1] %v3819_v39  ;;  %3823 = vst [vmem:[#allocation7 + $0x3] sm:$0x1] %v3822_v47  ;;  %v3828_v11 = vsel %vm5882_vm14, %v3794_v51, %v3827_v15  ;;  %v3831_v9 = vsel %vm5882_vm14, %v3797_v49, %v3830_v48 }
 0x9cd   :  { %3826 = vst [vmem:[#allocation7 + $0x4] sm:$0x1] %v3825_v0  ;;  %v3834_v25 = vsel %vm5882_vm14, %v3800_v50, %v3833_v32  ;;  %3829 = vst [vmem:[#allocation7 + $0x5] sm:$0x1] %v3828_v11 }
 0x9ce   :  { %3832 = vst [vmem:[#allocation7 + $0x6] sm:$0x1] %v3831_v9  ;;  %3835 = vst [vmem:[#allocation7 + $0x7] sm:$0x1] %v3834_v25 }
 0x9cf   :  { %4545 = shalt.err (!%p4542_p0)
}
 0x9d0   :  { %s4569_s23 = smov 16   ;;  %s4570_s11 = smov 1  }
 0x9d1   :  { %3847 = dma.vmem_to_hbm [thread:$0]  %s3842_s15, 128, %s5921_s16, [#allocation4], %s4569_s23, %s4569_s23, %s4570_s11  }
 0x9d2   :  { %4558 = dma.done.wait [#allocation4], 128  }
 0x9d3   :  { %4559 = vsyncadd [#allocation4], 4294967168 }
 0x9d4   :  { %3851 = vsyncpa [#allocation3], 1 }
 0x9d5   :  { %3852 = vsyncpa [#allocation6], 1 }
 0x9d6   :  { %3853 = vsyncpa [#allocation4], 1 }

</bundles_post_ra>
